<compile_context>
chip_gen: v7x
topology: tpu7x:2x2x1
jax: 0.10.0
libtpu: 0.0.40
codegen_flags: <defaults>
</compile_context>

<pallas_src>
import jax
import jax.numpy as jnp
from jax.experimental import pallas as pl
from jax.experimental.pallas import tpu as pltpu


def _round_up(x, m):
    return (x + m - 1) // m * m


# --------------------------------------------------------------------------
# Pallas kernel: fused conv3x3 + BN + ReLU, shifts realized on the matmul output via roll
# --------------------------------------------------------------------------
def _conv3x3_bn_relu_kernel(x_ref, w_ref, b_ref, o_ref):
    """x_ref: (nb, (H+2)*Wp, Cin_p) bf16  flattened, spatially padded images (Wp % 8 == 0)
       w_ref: (9, Cin_p, tn)        bf16  BN-folded weights, tap-major
       b_ref: (1, tn)               f32   BN-folded bias
       o_ref: (nb, H, W, tn)        bf16  fused output tile (tn multiple of 128 -> lane-dense)
    """
    nb, rows_img, cin_p = x_ref.shape
    h, w, tn = o_ref.shape[1], o_ref.shape[2], o_ref.shape[3]
    wp = rows_img // (h + 2)                       # padded width (static)
    m = nb * rows_img

    # Contiguous LHS slab: no per-tap input relayouts.
    if nb == 1:
        xt = x_ref[0]                              # (rows_img, Cin_p)
    else:
        xt = x_ref[...].reshape(m, cin_p)          # rows_img % 16 == 0 -> tile-aligned merge

    acc = jnp.zeros((m, tn), dtype=jnp.float32)
    for kh in range(3):                            # 9 taps, statically unrolled
        for kw in range(3):
            p = jnp.dot(xt, w_ref[kh * 3 + kw],    # MXU bf16 x bf16 -> f32
                        preferred_element_type=jnp.float32)
            # Realize the (kh, kw) spatial shift on the matmul output: one sublane roll (XLU).
            # Contributions wrapped by the cyclic roll only land in pad rows/columns that are
            # never read back below.
            shift = ((1 - kh) * wp + (1 - kw)) % m
            if shift:
                p = pltpu.roll(p, shift, 0)
            acc = acc + p

    # BN bias + ReLU epilogue in f32, then bf16 output.
    y = jnp.maximum(acc + b_ref[...], 0.0).astype(o_ref.dtype)

    # Extract valid rows/columns (drop the 1-pixel halo + right width padding) and store.
    for bi in range(nb):
        for yy in range(h):
            start = bi * rows_img + (1 + yy) * wp + 1
            o_ref[bi, yy, :, :] = y[start:start + w, :]


# --------------------------------------------------------------------------
# Wrapper: BN folding, layout/padding glue, tiling heuristics, pallas_call
# --------------------------------------------------------------------------
def conv3x3_bn_relu_pallas(x_nchw, w_oihw, gamma, beta, mean, var, eps=1e-5):
    n, cin, h, w = x_nchw.shape
    cout = w_oihw.shape[0]

    cout_p = _round_up(cout, 128)      # lane-dense output stores (unmasked vst)
    cin_p = _round_up(cin, 16)         # only pad Cin to bf16 packing granularity (not 128)
    wp = _round_up(w + 2, 8)           # sublane-aligned padded width (left pad 1, right pad >= 1)
    rows_img = (h + 2) * wp

    # Cout tiling: keep the entire folded weight resident across the batch when it fits VMEM.
    w_bytes = 9 * cin_p * cout_p * 2
    if w_bytes <= 8 * 1024 * 1024:
        tn = cout_p                    # single Cout block -> weights DMA'd once per launch
    elif cout_p % 256 == 0:
        tn = 256                       # matches v6e/v7x 256-wide MXU (v5e may prefer 128)
    else:
        tn = 128

    # Batch blocking: fill MXU M (target >= 256 rows) with the f32 accumulator <= ~1 MiB.
    nb = 1
    for d in range(1, n + 1):
        if n % d:
            continue
        if d * rows_img * tn * 4 > (1 << 20):
            break
        nb = d
        if d * h * w >= 256:
            break
    if nb > 1 and rows_img % 16:
        nb = 1                         # keep the in-kernel flatten tile-aligned (bf16)
    if cout_p // tn == 1 and nb == n and n > 1:
        # Keep >= 2 grid blocks so v7x's second TensorCore has work.
        nb = next(d for d in range(n // 2, 0, -1) if n % d == 0)

    # NHWC + spatial pad + small channel pad; flatten spatial rows so the kernel needs no
    # input reshapes; bf16 operands for the MXU.
    x = jnp.transpose(x_nchw, (0, 2, 3, 1))                                    # [N, H, W, Cin]
    xp = jnp.pad(x, ((0, 0), (1, 1), (1, wp - w - 1), (0, cin_p - cin)))
    xp = xp.astype(jnp.bfloat16).reshape(n, rows_img, cin_p)

    # Fold eval-mode BN: y = conv(x) * scale + (beta - mean*scale), scale = gamma/sqrt(var+eps)
    scale = (gamma / jnp.sqrt(var + eps)).astype(jnp.float32)
    w_f = w_oihw.astype(jnp.float32) * scale[:, None, None, None]              # [O, I, 3, 3]
    w_t = jnp.transpose(w_f, (2, 3, 1, 0)).reshape(9, cin, cout)               # tap-major
    w_p = jnp.zeros((9, cin_p, cout_p), jnp.float32).at[:, :cin, :cout].set(w_t).astype(jnp.bfloat16)
    bias = jnp.zeros((1, cout_p), jnp.float32).at[0, :cout].set(beta - mean * scale)

    grid = (cout_p // tn, n // nb)     # batch innermost: weight/bias block index constant over it
    out = pl.pallas_call(
        _conv3x3_bn_relu_kernel,
        out_shape=jax.ShapeDtypeStruct((n, h, w, cout_p), jnp.bfloat16),
        grid=grid,
        in_specs=[
            pl.BlockSpec((nb, rows_img, cin_p), lambda j, b: (b, 0, 0)),
            pl.BlockSpec((9, cin_p, tn), lambda j, b: (0, 0, j)),   # constant across b -> no refetch
            pl.BlockSpec((1, tn), lambda j, b: (0, j)),
        ],
        out_specs=pl.BlockSpec((nb, h, w, tn), lambda j, b: (b, 0, 0, j)),
        compiler_params=pltpu.CompilerParams(
            dimension_semantics=("parallel", "parallel"),
            vmem_limit_bytes=40 * 1024 * 1024,      # worst ResNet18/CIFAR layer uses ~13 MB
        ),
    )(xp, w_p, bias)

    # TODO(synk): for chained Oneway blocks keep this NHWC / Cout-padded bf16 layout and skip the
    #             slice + transpose below (kept here only to honor the module's NCHW f32 contract).
    out = out[..., :cout].astype(x_nchw.dtype)
    return jnp.transpose(out, (0, 3, 1, 2))


class OnewayPallas:
    """JAX/Pallas equivalent of the PyTorch `Oneway` module (conv -> bn -> relu, eval mode)."""

    def __init__(self, params, idem=False, eps=1e-5):
        self.p = params
        self.idem = idem
        self.eps = eps

    def __call__(self, x):
        if self.idem:
            return x
        return conv3x3_bn_relu_pallas(
            x, self.p["conv_w"], self.p["bn_gamma"], self.p["bn_beta"],
            self.p["bn_mean"], self.p["bn_var"], eps=self.eps,
        )


# --------------------------------------------------------------------------
# Pure-JAX reference (bf16-rounded operands so it matches the bf16-MXU kernel closely)
# --------------------------------------------------------------------------
def _oneway_reference(x, w, gamma, beta, mean, var, eps=1e-5):
    scale = gamma / jnp.sqrt(var + eps)
    w_folded = (w * scale[:, None, None, None]).astype(jnp.bfloat16).astype(jnp.float32)
    x_bf = x.astype(jnp.bfloat16).astype(jnp.float32)
    y = jax.lax.conv_general_dilated(
        x_bf, w_folded, (1, 1), "SAME",
        dimension_numbers=("NCHW", "OIHW", "NCHW"),
        precision=jax.lax.Precision.HIGHEST,
    )
    y = y + (beta - mean * scale)[None, :, None, None]
    return jnp.maximum(y, 0.0)


# --------------------------------------------------------------------------
# Demo
# --------------------------------------------------------------------------
if __name__ == "__main__":
    key = jax.random.PRNGKey(0)
    k_w, k_g, k_b, k_m, k_v, k_x = jax.random.split(key, 6)

    B, Cin, H, W = 2, 4, 16, 16
    Cout = 8

    params = {
        "conv_w": 0.2 * jax.random.normal(k_w, (Cout, Cin, 3, 3), jnp.float32),
        "bn_gamma": 1.0 + 0.1 * jax.random.normal(k_g, (Cout,), jnp.float32),
        "bn_beta": 0.1 * jax.random.normal(k_b, (Cout,), jnp.float32),
        "bn_mean": 0.05 * jax.random.normal(k_m, (Cout,), jnp.float32),
        "bn_var": 1.0 + 0.1 * jnp.abs(jax.random.normal(k_v, (Cout,), jnp.float32)),
    }

    x = jax.random.normal(k_x, (B, Cin, H, W), jnp.float32)

    module = OnewayPallas(params, idem=False)
    y = jax.block_until_ready(module(x))
    assert y.shape == (B, Cout, H, W)

    # correctness check vs plain-JAX conv+BN+ReLU (kernel output is bf16 -> loose-ish tolerance)
    y_ref = _oneway_reference(
        x, params["conv_w"], params["bn_gamma"], params["bn_beta"],
        params["bn_mean"], params["bn_var"],
    )
    assert jnp.allclose(y, y_ref, atol=2e-2, rtol=2e-2), "conv+bn+relu kernel mismatch"

    # idem path: forward must return the input unchanged
    module_idem = OnewayPallas(params, idem=True)
    assert jnp.array_equal(module_idem(x), x), "idem path mismatch"

    print("KERNEL_OK")
</pallas_src>

<mosaic_0001>
module attributes {stable_mosaic.version = 11 : i64} {
  func.func @_conv3x3_bn_relu_kernel(%arg0: i32, %arg1: i32, %arg2: memref<1x432x16xbf16, #tpu.memory_space<vmem>>, %arg3: memref<9x16x128xbf16, #tpu.memory_space<vmem>>, %arg4: memref<1x128xf32, #tpu.memory_space<vmem>>, %arg5: memref<1x16x16x128xbf16, #tpu.memory_space<vmem>>) attributes {dimension_semantics = [#tpu.dimension_semantics<parallel>, #tpu.dimension_semantics<parallel>], iteration_bounds = array<i64: 1, 2>, scalar_prefetch = 0 : i64, scratch_operands = 0 : i64, tpu.core_type = #tpu.core_type<tc>, window_params = [{transform_indices = @transform_0, window_bounds = array<i64: 1, 432, 16>}, {transform_indices = @transform_1, window_bounds = array<i64: 9, 16, 128>}, {transform_indices = @transform_2, window_bounds = array<i64: 1, 128>}, {transform_indices = @transform_3, window_bounds = array<i64: 1, 16, 16, 128>}]} {
    %c0 = arith.constant 0 : index
    %c0_0 = arith.constant 0 : index
    %c0_1 = arith.constant 0 : index
    %0 = vector.load %arg2[%c0, %c0_0, %c0_1] : memref<1x432x16xbf16, #tpu.memory_space<vmem>>, vector<1x432x16xbf16>
    %1 = vector.shape_cast %0 : vector<1x432x16xbf16> to vector<432x16xbf16>
    %cst = arith.constant 0.000000e+00 : f32
    %2 = vector.broadcast %cst : f32 to vector<432x128xf32>
    %c0_2 = arith.constant 0 : index
    %c0_3 = arith.constant 0 : index
    %c0_4 = arith.constant 0 : index
    %3 = vector.load %arg3[%c0_2, %c0_3, %c0_4] : memref<9x16x128xbf16, #tpu.memory_space<vmem>>, vector<1x16x128xbf16>
    %4 = vector.shape_cast %3 : vector<1x16x128xbf16> to vector<16x128xbf16>
    %cst_5 = arith.constant dense<0.000000e+00> : vector<432x128xf32>
    %5 = tpu.matmul %1, %4, %cst_5 {dimension_numbers = #tpu.dot_dimension_numbers<[1], [0], [0], [1], [0, 0, 1, 1], [], []>} : vector<432x16xbf16>, vector<16x128xbf16>, vector<432x128xf32> -> vector<432x128xf32>
    %c25_i32 = arith.constant 25 : i32
    %6 = tpu.dynamic_rotate %5 by %c25_i32 dim 0 : vector<432x128xf32>, i32 -> vector<432x128xf32>
    %7 = arith.addf %2, %6 : vector<432x128xf32>
    %c1 = arith.constant 1 : index
    %c0_6 = arith.constant 0 : index
    %c0_7 = arith.constant 0 : index
    %8 = vector.load %arg3[%c1, %c0_6, %c0_7] : memref<9x16x128xbf16, #tpu.memory_space<vmem>>, vector<1x16x128xbf16>
    %9 = vector.shape_cast %8 : vector<1x16x128xbf16> to vector<16x128xbf16>
    %cst_8 = arith.constant dense<0.000000e+00> : vector<432x128xf32>
    %10 = tpu.matmul %1, %9, %cst_8 {dimension_numbers = #tpu.dot_dimension_numbers<[1], [0], [0], [1], [0, 0, 1, 1], [], []>} : vector<432x16xbf16>, vector<16x128xbf16>, vector<432x128xf32> -> vector<432x128xf32>
    %c24_i32 = arith.constant 24 : i32
    %11 = tpu.dynamic_rotate %10 by %c24_i32 dim 0 : vector<432x128xf32>, i32 -> vector<432x128xf32>
    %12 = arith.addf %7, %11 : vector<432x128xf32>
    %c2 = arith.constant 2 : index
    %c0_9 = arith.constant 0 : index
    %c0_10 = arith.constant 0 : index
    %13 = vector.load %arg3[%c2, %c0_9, %c0_10] : memref<9x16x128xbf16, #tpu.memory_space<vmem>>, vector<1x16x128xbf16>
    %14 = vector.shape_cast %13 : vector<1x16x128xbf16> to vector<16x128xbf16>
    %cst_11 = arith.constant dense<0.000000e+00> : vector<432x128xf32>
    %15 = tpu.matmul %1, %14, %cst_11 {dimension_numbers = #tpu.dot_dimension_numbers<[1], [0], [0], [1], [0, 0, 1, 1], [], []>} : vector<432x16xbf16>, vector<16x128xbf16>, vector<432x128xf32> -> vector<432x128xf32>
    %c23_i32 = arith.constant 23 : i32
    %16 = tpu.dynamic_rotate %15 by %c23_i32 dim 0 : vector<432x128xf32>, i32 -> vector<432x128xf32>
    %17 = arith.addf %12, %16 : vector<432x128xf32>
    %c3 = arith.constant 3 : index
    %c0_12 = arith.constant 0 : index
    %c0_13 = arith.constant 0 : index
    %18 = vector.load %arg3[%c3, %c0_12, %c0_13] : memref<9x16x128xbf16, #tpu.memory_space<vmem>>, vector<1x16x128xbf16>
    %19 = vector.shape_cast %18 : vector<1x16x128xbf16> to vector<16x128xbf16>
    %cst_14 = arith.constant dense<0.000000e+00> : vector<432x128xf32>
    %20 = tpu.matmul %1, %19, %cst_14 {dimension_numbers = #tpu.dot_dimension_numbers<[1], [0], [0], [1], [0, 0, 1, 1], [], []>} : vector<432x16xbf16>, vector<16x128xbf16>, vector<432x128xf32> -> vector<432x128xf32>
    %c1_i32 = arith.constant 1 : i32
    %21 = tpu.dynamic_rotate %20 by %c1_i32 dim 0 : vector<432x128xf32>, i32 -> vector<432x128xf32>
    %22 = arith.addf %17, %21 : vector<432x128xf32>
    %c4 = arith.constant 4 : index
    %c0_15 = arith.constant 0 : index
    %c0_16 = arith.constant 0 : index
    %23 = vector.load %arg3[%c4, %c0_15, %c0_16] : memref<9x16x128xbf16, #tpu.memory_space<vmem>>, vector<1x16x128xbf16>
    %24 = vector.shape_cast %23 : vector<1x16x128xbf16> to vector<16x128xbf16>
    %cst_17 = arith.constant dense<0.000000e+00> : vector<432x128xf32>
    %25 = tpu.matmul %1, %24, %cst_17 {dimension_numbers = #tpu.dot_dimension_numbers<[1], [0], [0], [1], [0, 0, 1, 1], [], []>} : vector<432x16xbf16>, vector<16x128xbf16>, vector<432x128xf32> -> vector<432x128xf32>
    %26 = arith.addf %22, %25 : vector<432x128xf32>
    %c5 = arith.constant 5 : index
    %c0_18 = arith.constant 0 : index
    %c0_19 = arith.constant 0 : index
    %27 = vector.load %arg3[%c5, %c0_18, %c0_19] : memref<9x16x128xbf16, #tpu.memory_space<vmem>>, vector<1x16x128xbf16>
    %28 = vector.shape_cast %27 : vector<1x16x128xbf16> to vector<16x128xbf16>
    %cst_20 = arith.constant dense<0.000000e+00> : vector<432x128xf32>
    %29 = tpu.matmul %1, %28, %cst_20 {dimension_numbers = #tpu.dot_dimension_numbers<[1], [0], [0], [1], [0, 0, 1, 1], [], []>} : vector<432x16xbf16>, vector<16x128xbf16>, vector<432x128xf32> -> vector<432x128xf32>
    %c431_i32 = arith.constant 431 : i32
    %30 = tpu.dynamic_rotate %29 by %c431_i32 dim 0 : vector<432x128xf32>, i32 -> vector<432x128xf32>
    %31 = arith.addf %26, %30 : vector<432x128xf32>
    %c6 = arith.constant 6 : index
    %c0_21 = arith.constant 0 : index
    %c0_22 = arith.constant 0 : index
    %32 = vector.load %arg3[%c6, %c0_21, %c0_22] : memref<9x16x128xbf16, #tpu.memory_space<vmem>>, vector<1x16x128xbf16>
    %33 = vector.shape_cast %32 : vector<1x16x128xbf16> to vector<16x128xbf16>
    %cst_23 = arith.constant dense<0.000000e+00> : vector<432x128xf32>
    %34 = tpu.matmul %1, %33, %cst_23 {dimension_numbers = #tpu.dot_dimension_numbers<[1], [0], [0], [1], [0, 0, 1, 1], [], []>} : vector<432x16xbf16>, vector<16x128xbf16>, vector<432x128xf32> -> vector<432x128xf32>
    %c409_i32 = arith.constant 409 : i32
    %35 = tpu.dynamic_rotate %34 by %c409_i32 dim 0 : vector<432x128xf32>, i32 -> vector<432x128xf32>
    %36 = arith.addf %31, %35 : vector<432x128xf32>
    %c7 = arith.constant 7 : index
    %c0_24 = arith.constant 0 : index
    %c0_25 = arith.constant 0 : index
    %37 = vector.load %arg3[%c7, %c0_24, %c0_25] : memref<9x16x128xbf16, #tpu.memory_space<vmem>>, vector<1x16x128xbf16>
    %38 = vector.shape_cast %37 : vector<1x16x128xbf16> to vector<16x128xbf16>
    %cst_26 = arith.constant dense<0.000000e+00> : vector<432x128xf32>
    %39 = tpu.matmul %1, %38, %cst_26 {dimension_numbers = #tpu.dot_dimension_numbers<[1], [0], [0], [1], [0, 0, 1, 1], [], []>} : vector<432x16xbf16>, vector<16x128xbf16>, vector<432x128xf32> -> vector<432x128xf32>
    %c408_i32 = arith.constant 408 : i32
    %40 = tpu.dynamic_rotate %39 by %c408_i32 dim 0 : vector<432x128xf32>, i32 -> vector<432x128xf32>
    %41 = arith.addf %36, %40 : vector<432x128xf32>
    %c8 = arith.constant 8 : index
    %c0_27 = arith.constant 0 : index
    %c0_28 = arith.constant 0 : index
    %42 = vector.load %arg3[%c8, %c0_27, %c0_28] : memref<9x16x128xbf16, #tpu.memory_space<vmem>>, vector<1x16x128xbf16>
    %43 = vector.shape_cast %42 : vector<1x16x128xbf16> to vector<16x128xbf16>
    %cst_29 = arith.constant dense<0.000000e+00> : vector<432x128xf32>
    %44 = tpu.matmul %1, %43, %cst_29 {dimension_numbers = #tpu.dot_dimension_numbers<[1], [0], [0], [1], [0, 0, 1, 1], [], []>} : vector<432x16xbf16>, vector<16x128xbf16>, vector<432x128xf32> -> vector<432x128xf32>
    %c407_i32 = arith.constant 407 : i32
    %45 = tpu.dynamic_rotate %44 by %c407_i32 dim 0 : vector<432x128xf32>, i32 -> vector<432x128xf32>
    %46 = arith.addf %41, %45 : vector<432x128xf32>
    %c0_30 = arith.constant 0 : index
    %c0_31 = arith.constant 0 : index
    %47 = vector.load %arg4[%c0_30, %c0_31] : memref<1x128xf32, #tpu.memory_space<vmem>>, vector<1x128xf32>
    %48 = vector.broadcast %47 : vector<1x128xf32> to vector<432x128xf32>
    %49 = arith.addf %46, %48 : vector<432x128xf32>
    %cst_32 = arith.constant 0.000000e+00 : f32
    %50 = vector.broadcast %cst_32 : f32 to vector<432x128xf32>
    %51 = arith.maximumf %49, %50 : vector<432x128xf32>
    %52 = arith.truncf %51 : vector<432x128xf32> to vector<432x128xbf16>
    %53 = vector.extract_strided_slice %52 {offsets = [25, 0], sizes = [16, 128], strides = [1, 1]} : vector<432x128xbf16> to vector<16x128xbf16>
    %c0_33 = arith.constant 0 : index
    %c0_34 = arith.constant 0 : index
    %c0_35 = arith.constant 0 : index
    %c0_36 = arith.constant 0 : index
    %54 = vector.load %arg5[%c0_33, %c0_34, %c0_35, %c0_36] : memref<1x16x16x128xbf16, #tpu.memory_space<vmem>>, vector<1x1x16x128xbf16>
    %55 = vector.shape_cast %54 : vector<1x1x16x128xbf16> to vector<16x128xbf16>
    %56 = vector.shape_cast %53 : vector<16x128xbf16> to vector<1x1x16x128xbf16>
    tpu.vector_store %arg5[%c0_33, %c0_34, %c0_35, %c0_36], %56 {strides = array<i32>} : memref<1x16x16x128xbf16, #tpu.memory_space<vmem>>, vector<1x1x16x128xbf16>,
    %57 = vector.extract_strided_slice %52 {offsets = [49, 0], sizes = [16, 128], strides = [1, 1]} : vector<432x128xbf16> to vector<16x128xbf16>
    %c0_37 = arith.constant 0 : index
    %c1_38 = arith.constant 1 : index
    %c0_39 = arith.constant 0 : index
    %c0_40 = arith.constant 0 : index
    %58 = vector.load %arg5[%c0_37, %c1_38, %c0_39, %c0_40] : memref<1x16x16x128xbf16, #tpu.memory_space<vmem>>, vector<1x1x16x128xbf16>
    %59 = vector.shape_cast %58 : vector<1x1x16x128xbf16> to vector<16x128xbf16>
    %60 = vector.shape_cast %57 : vector<16x128xbf16> to vector<1x1x16x128xbf16>
    tpu.vector_store %arg5[%c0_37, %c1_38, %c0_39, %c0_40], %60 {strides = array<i32>} : memref<1x16x16x128xbf16, #tpu.memory_space<vmem>>, vector<1x1x16x128xbf16>,
    %61 = vector.extract_strided_slice %52 {offsets = [73, 0], sizes = [16, 128], strides = [1, 1]} : vector<432x128xbf16> to vector<16x128xbf16>
    %c0_41 = arith.constant 0 : index
    %c2_42 = arith.constant 2 : index
    %c0_43 = arith.constant 0 : index
    %c0_44 = arith.constant 0 : index
    %62 = vector.load %arg5[%c0_41, %c2_42, %c0_43, %c0_44] : memref<1x16x16x128xbf16, #tpu.memory_space<vmem>>, vector<1x1x16x128xbf16>
    %63 = vector.shape_cast %62 : vector<1x1x16x128xbf16> to vector<16x128xbf16>
    %64 = vector.shape_cast %61 : vector<16x128xbf16> to vector<1x1x16x128xbf16>
    tpu.vector_store %arg5[%c0_41, %c2_42, %c0_43, %c0_44], %64 {strides = array<i32>} : memref<1x16x16x128xbf16, #tpu.memory_space<vmem>>, vector<1x1x16x128xbf16>,
    %65 = vector.extract_strided_slice %52 {offsets = [97, 0], sizes = [16, 128], strides = [1, 1]} : vector<432x128xbf16> to vector<16x128xbf16>
    %c0_45 = arith.constant 0 : index
    %c3_46 = arith.constant 3 : index
    %c0_47 = arith.constant 0 : index
    %c0_48 = arith.constant 0 : index
    %66 = vector.load %arg5[%c0_45, %c3_46, %c0_47, %c0_48] : memref<1x16x16x128xbf16, #tpu.memory_space<vmem>>, vector<1x1x16x128xbf16>
    %67 = vector.shape_cast %66 : vector<1x1x16x128xbf16> to vector<16x128xbf16>
    %68 = vector.shape_cast %65 : vector<16x128xbf16> to vector<1x1x16x128xbf16>
    tpu.vector_store %arg5[%c0_45, %c3_46, %c0_47, %c0_48], %68 {strides = array<i32>} : memref<1x16x16x128xbf16, #tpu.memory_space<vmem>>, vector<1x1x16x128xbf16>,
    %69 = vector.extract_strided_slice %52 {offsets = [121, 0], sizes = [16, 128], strides = [1, 1]} : vector<432x128xbf16> to vector<16x128xbf16>
    %c0_49 = arith.constant 0 : index
    %c4_50 = arith.constant 4 : index
    %c0_51 = arith.constant 0 : index
    %c0_52 = arith.constant 0 : index
    %70 = vector.load %arg5[%c0_49, %c4_50, %c0_51, %c0_52] : memref<1x16x16x128xbf16, #tpu.memory_space<vmem>>, vector<1x1x16x128xbf16>
    %71 = vector.shape_cast %70 : vector<1x1x16x128xbf16> to vector<16x128xbf16>
    %72 = vector.shape_cast %69 : vector<16x128xbf16> to vector<1x1x16x128xbf16>
    tpu.vector_store %arg5[%c0_49, %c4_50, %c0_51, %c0_52], %72 {strides = array<i32>} : memref<1x16x16x128xbf16, #tpu.memory_space<vmem>>, vector<1x1x16x128xbf16>,
    %73 = vector.extract_strided_slice %52 {offsets = [145, 0], sizes = [16, 128], strides = [1, 1]} : vector<432x128xbf16> to vector<16x128xbf16>
    %c0_53 = arith.constant 0 : index
    %c5_54 = arith.constant 5 : index
    %c0_55 = arith.constant 0 : index
    %c0_56 = arith.constant 0 : index
    %74 = vector.load %arg5[%c0_53, %c5_54, %c0_55, %c0_56] : memref<1x16x16x128xbf16, #tpu.memory_space<vmem>>, vector<1x1x16x128xbf16>
    %75 = vector.shape_cast %74 : vector<1x1x16x128xbf16> to vector<16x128xbf16>
    %76 = vector.shape_cast %73 : vector<16x128xbf16> to vector<1x1x16x128xbf16>
    tpu.vector_store %arg5[%c0_53, %c5_54, %c0_55, %c0_56], %76 {strides = array<i32>} : memref<1x16x16x128xbf16, #tpu.memory_space<vmem>>, vector<1x1x16x128xbf16>,
    %77 = vector.extract_strided_slice %52 {offsets = [169, 0], sizes = [16, 128], strides = [1, 1]} : vector<432x128xbf16> to vector<16x128xbf16>
    %c0_57 = arith.constant 0 : index
    %c6_58 = arith.constant 6 : index
    %c0_59 = arith.constant 0 : index
    %c0_60 = arith.constant 0 : index
    %78 = vector.load %arg5[%c0_57, %c6_58, %c0_59, %c0_60] : memref<1x16x16x128xbf16, #tpu.memory_space<vmem>>, vector<1x1x16x128xbf16>
    %79 = vector.shape_cast %78 : vector<1x1x16x128xbf16> to vector<16x128xbf16>
    %80 = vector.shape_cast %77 : vector<16x128xbf16> to vector<1x1x16x128xbf16>
    tpu.vector_store %arg5[%c0_57, %c6_58, %c0_59, %c0_60], %80 {strides = array<i32>} : memref<1x16x16x128xbf16, #tpu.memory_space<vmem>>, vector<1x1x16x128xbf16>,
    %81 = vector.extract_strided_slice %52 {offsets = [193, 0], sizes = [16, 128], strides = [1, 1]} : vector<432x128xbf16> to vector<16x128xbf16>
    %c0_61 = arith.constant 0 : index
    %c7_62 = arith.constant 7 : index
    %c0_63 = arith.constant 0 : index
    %c0_64 = arith.constant 0 : index
    %82 = vector.load %arg5[%c0_61, %c7_62, %c0_63, %c0_64] : memref<1x16x16x128xbf16, #tpu.memory_space<vmem>>, vector<1x1x16x128xbf16>
    %83 = vector.shape_cast %82 : vector<1x1x16x128xbf16> to vector<16x128xbf16>
    %84 = vector.shape_cast %81 : vector<16x128xbf16> to vector<1x1x16x128xbf16>
    tpu.vector_store %arg5[%c0_61, %c7_62, %c0_63, %c0_64], %84 {strides = array<i32>} : memref<1x16x16x128xbf16, #tpu.memory_space<vmem>>, vector<1x1x16x128xbf16>,
    %85 = vector.extract_strided_slice %52 {offsets = [217, 0], sizes = [16, 128], strides = [1, 1]} : vector<432x128xbf16> to vector<16x128xbf16>
    %c0_65 = arith.constant 0 : index
    %c8_66 = arith.constant 8 : index
    %c0_67 = arith.constant 0 : index
    %c0_68 = arith.constant 0 : index
    %86 = vector.load %arg5[%c0_65, %c8_66, %c0_67, %c0_68] : memref<1x16x16x128xbf16, #tpu.memory_space<vmem>>, vector<1x1x16x128xbf16>
    %87 = vector.shape_cast %86 : vector<1x1x16x128xbf16> to vector<16x128xbf16>
    %88 = vector.shape_cast %85 : vector<16x128xbf16> to vector<1x1x16x128xbf16>
    tpu.vector_store %arg5[%c0_65, %c8_66, %c0_67, %c0_68], %88 {strides = array<i32>} : memref<1x16x16x128xbf16, #tpu.memory_space<vmem>>, vector<1x1x16x128xbf16>,
    %89 = vector.extract_strided_slice %52 {offsets = [241, 0], sizes = [16, 128], strides = [1, 1]} : vector<432x128xbf16> to vector<16x128xbf16>
    %c0_69 = arith.constant 0 : index
    %c9 = arith.constant 9 : index
    %c0_70 = arith.constant 0 : index
    %c0_71 = arith.constant 0 : index
    %90 = vector.load %arg5[%c0_69, %c9, %c0_70, %c0_71] : memref<1x16x16x128xbf16, #tpu.memory_space<vmem>>, vector<1x1x16x128xbf16>
    %91 = vector.shape_cast %90 : vector<1x1x16x128xbf16> to vector<16x128xbf16>
    %92 = vector.shape_cast %89 : vector<16x128xbf16> to vector<1x1x16x128xbf16>
    tpu.vector_store %arg5[%c0_69, %c9, %c0_70, %c0_71], %92 {strides = array<i32>} : memref<1x16x16x128xbf16, #tpu.memory_space<vmem>>, vector<1x1x16x128xbf16>,
    %93 = vector.extract_strided_slice %52 {offsets = [265, 0], sizes = [16, 128], strides = [1, 1]} : vector<432x128xbf16> to vector<16x128xbf16>
    %c0_72 = arith.constant 0 : index
    %c10 = arith.constant 10 : index
    %c0_73 = arith.constant 0 : index
    %c0_74 = arith.constant 0 : index
    %94 = vector.load %arg5[%c0_72, %c10, %c0_73, %c0_74] : memref<1x16x16x128xbf16, #tpu.memory_space<vmem>>, vector<1x1x16x128xbf16>
    %95 = vector.shape_cast %94 : vector<1x1x16x128xbf16> to vector<16x128xbf16>
    %96 = vector.shape_cast %93 : vector<16x128xbf16> to vector<1x1x16x128xbf16>
    tpu.vector_store %arg5[%c0_72, %c10, %c0_73, %c0_74], %96 {strides = array<i32>} : memref<1x16x16x128xbf16, #tpu.memory_space<vmem>>, vector<1x1x16x128xbf16>,
    %97 = vector.extract_strided_slice %52 {offsets = [289, 0], sizes = [16, 128], strides = [1, 1]} : vector<432x128xbf16> to vector<16x128xbf16>
    %c0_75 = arith.constant 0 : index
    %c11 = arith.constant 11 : index
    %c0_76 = arith.constant 0 : index
    %c0_77 = arith.constant 0 : index
    %98 = vector.load %arg5[%c0_75, %c11, %c0_76, %c0_77] : memref<1x16x16x128xbf16, #tpu.memory_space<vmem>>, vector<1x1x16x128xbf16>
    %99 = vector.shape_cast %98 : vector<1x1x16x128xbf16> to vector<16x128xbf16>
    %100 = vector.shape_cast %97 : vector<16x128xbf16> to vector<1x1x16x128xbf16>
    tpu.vector_store %arg5[%c0_75, %c11, %c0_76, %c0_77], %100 {strides = array<i32>} : memref<1x16x16x128xbf16, #tpu.memory_space<vmem>>, vector<1x1x16x128xbf16>,
    %101 = vector.extract_strided_slice %52 {offsets = [313, 0], sizes = [16, 128], strides = [1, 1]} : vector<432x128xbf16> to vector<16x128xbf16>
    %c0_78 = arith.constant 0 : index
    %c12 = arith.constant 12 : index
    %c0_79 = arith.constant 0 : index
    %c0_80 = arith.constant 0 : index
    %102 = vector.load %arg5[%c0_78, %c12, %c0_79, %c0_80] : memref<1x16x16x128xbf16, #tpu.memory_space<vmem>>, vector<1x1x16x128xbf16>
    %103 = vector.shape_cast %102 : vector<1x1x16x128xbf16> to vector<16x128xbf16>
    %104 = vector.shape_cast %101 : vector<16x128xbf16> to vector<1x1x16x128xbf16>
    tpu.vector_store %arg5[%c0_78, %c12, %c0_79, %c0_80], %104 {strides = array<i32>} : memref<1x16x16x128xbf16, #tpu.memory_space<vmem>>, vector<1x1x16x128xbf16>,
    %105 = vector.extract_strided_slice %52 {offsets = [337, 0], sizes = [16, 128], strides = [1, 1]} : vector<432x128xbf16> to vector<16x128xbf16>
    %c0_81 = arith.constant 0 : index
    %c13 = arith.constant 13 : index
    %c0_82 = arith.constant 0 : index
    %c0_83 = arith.constant 0 : index
    %106 = vector.load %arg5[%c0_81, %c13, %c0_82, %c0_83] : memref<1x16x16x128xbf16, #tpu.memory_space<vmem>>, vector<1x1x16x128xbf16>
    %107 = vector.shape_cast %106 : vector<1x1x16x128xbf16> to vector<16x128xbf16>
    %108 = vector.shape_cast %105 : vector<16x128xbf16> to vector<1x1x16x128xbf16>
    tpu.vector_store %arg5[%c0_81, %c13, %c0_82, %c0_83], %108 {strides = array<i32>} : memref<1x16x16x128xbf16, #tpu.memory_space<vmem>>, vector<1x1x16x128xbf16>,
    %109 = vector.extract_strided_slice %52 {offsets = [361, 0], sizes = [16, 128], strides = [1, 1]} : vector<432x128xbf16> to vector<16x128xbf16>
    %c0_84 = arith.constant 0 : index
    %c14 = arith.constant 14 : index
    %c0_85 = arith.constant 0 : index
    %c0_86 = arith.constant 0 : index
    %110 = vector.load %arg5[%c0_84, %c14, %c0_85, %c0_86] : memref<1x16x16x128xbf16, #tpu.memory_space<vmem>>, vector<1x1x16x128xbf16>
    %111 = vector.shape_cast %110 : vector<1x1x16x128xbf16> to vector<16x128xbf16>
    %112 = vector.shape_cast %109 : vector<16x128xbf16> to vector<1x1x16x128xbf16>
    tpu.vector_store %arg5[%c0_84, %c14, %c0_85, %c0_86], %112 {strides = array<i32>} : memref<1x16x16x128xbf16, #tpu.memory_space<vmem>>, vector<1x1x16x128xbf16>,
    %113 = vector.extract_strided_slice %52 {offsets = [385, 0], sizes = [16, 128], strides = [1, 1]} : vector<432x128xbf16> to vector<16x128xbf16>
    %c0_87 = arith.constant 0 : index
    %c15 = arith.constant 15 : index
    %c0_88 = arith.constant 0 : index
    %c0_89 = arith.constant 0 : index
    %114 = vector.load %arg5[%c0_87, %c15, %c0_88, %c0_89] : memref<1x16x16x128xbf16, #tpu.memory_space<vmem>>, vector<1x1x16x128xbf16>
    %115 = vector.shape_cast %114 : vector<1x1x16x128xbf16> to vector<16x128xbf16>
    %116 = vector.shape_cast %113 : vector<16x128xbf16> to vector<1x1x16x128xbf16>
    tpu.vector_store %arg5[%c0_87, %c15, %c0_88, %c0_89], %116 {strides = array<i32>} : memref<1x16x16x128xbf16, #tpu.memory_space<vmem>>, vector<1x1x16x128xbf16>,
    return
  }
  func.func @transform_0(%arg0: i32, %arg1: i32) -> (i32, i32, i32) {
    %c0_i32 = arith.constant 0 : i32
    %c0_i32_0 = arith.constant 0 : i32
    %c0_i32_1 = arith.constant 0 : i32
    return %arg1, %c0_i32, %c0_i32_0 : i32, i32, i32
  }
  func.func @transform_1(%arg0: i32, %arg1: i32) -> (i32, i32, i32) {
    %c0_i32 = arith.constant 0 : i32
    %c0_i32_0 = arith.constant 0 : i32
    %c0_i32_1 = arith.constant 0 : i32
    return %c0_i32, %c0_i32_0, %arg0 : i32, i32, i32
  }
  func.func @transform_2(%arg0: i32, %arg1: i32) -> (i32, i32) {
    %c0_i32 = arith.constant 0 : i32
    %c0_i32_0 = arith.constant 0 : i32
    return %c0_i32, %arg0 : i32, i32
  }
  func.func @transform_3(%arg0: i32, %arg1: i32) -> (i32, i32, i32, i32) {
    %c0_i32 = arith.constant 0 : i32
    %c0_i32_0 = arith.constant 0 : i32
    %c0_i32_1 = arith.constant 0 : i32
    return %arg1, %c0_i32, %c0_i32_0, %arg0 : i32, i32, i32, i32
  }
}

</mosaic_0001>

<bundles_post_ra>
// kernel: tpu_custom_call.1
= control target key start
LH: loop header
LB: loop body
LE: loop exit
PB: predicated region body
PF: predicated region fallthrough
CT: control target
= control target key end

     0   :  { %8 = vsyncpa [#allocation3], 0  ;;  %s9175_s0 = inlined_call_operand.vmem [shape: bf16[2,432,16], index: 0, kind: input, shape index: {}]   ;;  %s9176_s1 = inlined_call_operand.vmem [shape: bf16[9,16,128], index: 1, kind: input, shape index: {}]   ;;  %s9177_s2 = inlined_call_operand.vmem [shape: f32[1,128], index: 2, kind: input, shape index: {}]   ;;  %s9178_s3 = inlined_call_operand.hbm [shape: bf16[2,16,16,128], index: 3, kind: output, shape index: {}]  }
   0x1   :  { %10 = vsyncpa [#allocation3 + $0x1], 0  ;;  %s6628_s12 = smov 0   ;;  %s6630_s13 = smov 0  }
   0x2   :  { %s6632_s14 = smov 0   ;;  %s6634_s15 = smov 0  }
   0x3   :  { %s6636_s16 = smov 0   ;;  %s6638_s17 = smov 0  }
   0x4 LB: > { %s4670_s18 = sadd.s32 4294967295, %s6601_s17   ;;  %s4671_s19 = sadd.s32 4294967294, %s6601_s17   ;;  %s6601_s17 = sphi %s6638_s17, %s16_s17   ;;  %s6597_s16 = sphi %s6636_s16, %s9250_s16   ;;  %s6593_s15 = sphi %s6634_s15, %s9249_s15   ;;  %s6589_s14 = sphi %s6632_s14, %s9248_s14   ;;  %s6585_s13 = sphi %s6630_s13, %s9247_s13   ;;  %s6581_s12 = sphi %s6628_s12, %s9246_s12  }
   0x5   : > { %s25_s20 = sadd.s32 1, %s6597_s16  ;;  %s115_s21 = sadd.s32 1, %s6589_s14 }
   0x6   : > { %p26_p0 = scmp.ge.s32.totalorder %s25_s20, 2  ;;  %p125_p1 = scmp.ne.s32.totalorder %s6589_s14, %s6585_s13 }
   0x7   : > { %p126_p2 = scmp.eq.s32.totalorder %s4670_s18, 1  ;;  %p131_p3 = scmp.ne.s32.totalorder %s6585_s13, %s6581_s12 }
   0x8   : > { %s9252_s20 = smov (%p26_p0, %s25_s20), 0  ;;  %p132_p5 = scmp.eq.s32.totalorder %s4671_s19, 1 }
   0x9   : > { %p6668_p4 = por %p126_p2, %p125_p1  ;;  %s110_s23 = ssub.s32 %s6597_s16, %s9252_s20 }
   0xa   : > { %p4676_p6 = scmp.ge.s32.totalorder %s6601_s17, 1  ;;  %p113_p7 = scmp.eq.s32.totalorder %s110_s23, 0 }
   0xb   : > { %p6675_p8 = por %p132_p5, %p131_p3  ;;  %p171_p9 = scmp.lt.s32.totalorder %s6601_s17, 3 }
   0xc   : > { %s6681_s25 = scalar_select %p113_p7, %s6589_s14, %s115_s21  }
   0xd   : > { %p172_p10 = pnand %p4676_p6, %p171_p9 }
   0xf   : > { %175 = sbr.rel (%p172_p10) target bundleno = 1247 (0x4df), region = 32 }
  0x16   : > { %v6411_v0 = vld [vmem:[%s9176_s1] sm:$0xff]   ;;  %v9181_v1 = vmov 0.0   ;;  %p202_p11 = scmp.lt.s32.totalorder %s6593_s15, 1  ;;  %vm6604_vm0 = vmmov 0   ;;  %vm412_vm1 = vcmask 130048   ;;  %v6414_v2 = vld [vmem:[%s9176_s1 + $0x10] sm:$0xff]   ;;  %v791_v33 = vlaneseq }
  0x17   : > { %5359 = vmatprep.subr.bf16.mxu0 %v9181_v1  ;;  %6349 = vmatprep.subr.bf16.mxu1 %v9181_v1  ;;  %v6417_v3 = vld [vmem:[%s9176_s1 + $0x8] sm:$0xff]   ;;  %v6442_v31 = vld [vmem:[%s9176_s1 + $0x18] sm:$0xff]   ;;  %v6441_v32 = vld [vmem:[%s9176_s1 + $0x20] sm:$0xff]   ;;  %vm3977_vm4 = vsmask.f32 3328  ;;  %s5106_s18 = sshll.u32 %s6593_s15, 11 }
  0x18   : > { %5360 = vmatpush3.bf16.msra.mxu0 %v6411_v0  ;;  %6350 = vmatpush3.bf16.msra.mxu1 %v6411_v0  ;;  %s203_s28 = scalar_select %p202_p11, %s6593_s15, 1  ;;  %v7012_v34 = vshrl.u32 %v791_v33, 7  ;;  %vm3978_vm5 = vsmask.f32 7440 }
  0x19   : > { %5361 = vmatprep.mubr.msk.bf16.mxu0 %vm6604_vm0, %v9181_v1  ;;  %5417 = vmatprep.mubr.msk.bf16.mxu1 %vm6604_vm0, %v9181_v1  ;;  %vm8778_vm6 = vmor %vm3977_vm4, %vm3978_vm5  ;;  %s9119_s26 = scalar_lea.hbm %s9178_s3, %s5106_s18 }
  0x1a   : > { %5579 = vmatprep.subr.bf16.mxu0 %v9181_v1  ;;  %5469 = vmatprep.subr.bf16.mxu1 %v9181_v1  ;;  %s6351_s29 = smul.u32 216, %s203_s28  ;;  %vm793_vm2 = vcmp.lt.s32.totalorder %v7012_v34, 1  ;;  %vm1504_vm3 = vcmp.lt.s32.totalorder %v7012_v34, 7  ;;  %s6605_s28 = smov [#allocation2]  }
  0x1c   : > { %s6702_s7 = scalar_lea.vmem %s9175_s0, %s6351_s29  ;;  %s6527_s29 = sshll.u32 %s6605_s28, 4  ;;  %s6528_s29 = int_to_ptr.vmem [resolvable:$false] %s6527_s29 }
  0x1d   : > { %v6708_v4 = vld [vmem:[%s6702_s7] sm:$0xff]   ;;  %v6711_v5 = vld [vmem:[%s6702_s7 + $0x70] sm:$0xff]   ;;  %v6723_v6 = vld [vmem:[%s6702_s7 + $0x8] sm:$0xff]   ;;  %s6529_s30 = scalar_lea.vmem %s6528_s29, 4096 }
  0x1e   : > { %5362 = vmatmul.mubr.msk.bf16.vlgmr.msra.gmra.mrb[0].mxu0 %vm412_vm1, %v6708_v4  ;;  %5418 = vmatmul.mubr.msk.bf16.vlgmr.msra.gmra.mrb[0].mxu1 %vm412_vm1, %v6711_v5  ;;  %v6727_v7 = vld [vmem:[%s6702_s7 + $0x78] sm:$0xff]   ;;  %v6738_v8 = vld [vmem:[%s6702_s7 + $0x10] sm:$0xff]   ;;  %v6741_v9 = vld [vmem:[%s6702_s7 + $0x80] sm:$0xff]  }
  0x1f   : > { %5580 = vmatpush3.bf16.msra.mxu0 %v6414_v2  ;;  %5365 = vmatprep.mubr.msk.bf16.mxu0 %vm6604_vm0, %v9181_v1  ;;  %v6752_v10 = vld [vmem:[%s6702_s7 + $0x18] sm:$0xff]   ;;  %v6755_v11 = vld [vmem:[%s6702_s7 + $0x88] sm:$0xff]   ;;  %v6766_v12 = vld [vmem:[%s6702_s7 + $0x20] sm:$0xff]  }
  0x20   : > { %5421 = vmatprep.mubr.msk.bf16.mxu1 %vm6604_vm0, %v9181_v1  ;;  %5470 = vmatpush3.bf16.msra.mxu1 %v6417_v3  ;;  %v6769_v13 = vld [vmem:[%s6702_s7 + $0x90] sm:$0xff]   ;;  %v6780_v14 = vld [vmem:[%s6702_s7 + $0x28] sm:$0xff]   ;;  %v6783_v15 = vld [vmem:[%s6702_s7 + $0x98] sm:$0xff]  }
  0x21   : > { %5799 = vmatprep.subr.bf16.mxu0 %v9181_v1  ;;  %5689 = vmatprep.subr.bf16.mxu1 %v9181_v1  ;;  %v6794_v16 = vld [vmem:[%s6702_s7 + $0x30] sm:$0xff]   ;;  %v6797_v17 = vld [vmem:[%s6702_s7 + $0xa0] sm:$0xff]   ;;  %v6808_v18 = vld [vmem:[%s6702_s7 + $0x38] sm:$0xff]  }
  0x22   : > { %v6811_v19 = vld [vmem:[%s6702_s7 + $0xa8] sm:$0xff]   ;;  %v6822_v20 = vld [vmem:[%s6702_s7 + $0x40] sm:$0xff]   ;;  %v6825_v21 = vld [vmem:[%s6702_s7 + $0xb0] sm:$0xff]  }
  0x23   : > { %v6836_v22 = vld [vmem:[%s6702_s7 + $0x48] sm:$0xff]   ;;  %v6839_v23 = vld [vmem:[%s6702_s7 + $0xb8] sm:$0xff]   ;;  %v6850_v24 = vld [vmem:[%s6702_s7 + $0x50] sm:$0xff]  }
  0x24   : > { %v6853_v25 = vld [vmem:[%s6702_s7 + $0xc0] sm:$0xff]   ;;  %v6864_v26 = vld [vmem:[%s6702_s7 + $0x58] sm:$0xff]   ;;  %v6867_v27 = vld [vmem:[%s6702_s7 + $0xc8] sm:$0xff]  }
  0x25   : > { %v6878_v28 = vld [vmem:[%s6702_s7 + $0x60] sm:$0xff]   ;;  %v6881_v29 = vld [vmem:[%s6702_s7 + $0xd0] sm:$0xff]   ;;  %v6892_v30 = vld [vmem:[%s6702_s7 + $0x68] sm:$0xff]  }
  0x26   : > { %5366 = vmatmul.mubr.msk.bf16.gmra.mrb[4].mxu0 %vm412_vm1, %v6723_v6  ;;  %5422 = vmatmul.mubr.msk.bf16.gmra.mrb[4].mxu1 %vm412_vm1, %v6727_v7 }
  0x27   : > { %5369 = vmatprep.mubr.msk.bf16.mxu0 %vm6604_vm0, %v9181_v1  ;;  %5425 = vmatprep.mubr.msk.bf16.mxu1 %vm6604_vm0, %v9181_v1 }
  0x2e   : > { %5370 = vmatmul.mubr.msk.bf16.gmra.mrb[8].mxu0 %vm412_vm1, %v6738_v8  ;;  %5426 = vmatmul.mubr.msk.bf16.gmra.mrb[8].mxu1 %vm412_vm1, %v6741_v9 }
  0x2f   : > { %5373 = vmatprep.mubr.msk.bf16.mxu0 %vm6604_vm0, %v9181_v1  ;;  %5429 = vmatprep.mubr.msk.bf16.mxu1 %vm6604_vm0, %v9181_v1 }
  0x36   : > { %5374 = vmatmul.mubr.msk.bf16.gmra.mrb[12].mxu0 %vm412_vm1, %v6752_v10  ;;  %5430 = vmatmul.mubr.msk.bf16.gmra.mrb[12].mxu1 %vm412_vm1, %v6755_v11 }
  0x37   : > { %5377 = vmatprep.mubr.msk.bf16.mxu0 %vm6604_vm0, %v9181_v1  ;;  %5433 = vmatprep.mubr.msk.bf16.mxu1 %vm6604_vm0, %v9181_v1 }
  0x3e   : > { %5378 = vmatmul.mubr.msk.bf16.gmra.mrb[16].mxu0 %vm412_vm1, %v6766_v12  ;;  %5434 = vmatmul.mubr.msk.bf16.gmra.mrb[16].mxu1 %vm412_vm1, %v6769_v13 }
  0x3f   : > { %5381 = vmatprep.mubr.msk.bf16.mxu0 %vm6604_vm0, %v9181_v1  ;;  %5437 = vmatprep.mubr.msk.bf16.mxu1 %vm6604_vm0, %v9181_v1 }
  0x46   : > { %5382 = vmatmul.mubr.msk.bf16.gmra.mrb[20].mxu0 %vm412_vm1, %v6780_v14  ;;  %5438 = vmatmul.mubr.msk.bf16.gmra.mrb[20].mxu1 %vm412_vm1, %v6783_v15 }
  0x47   : > { %5385 = vmatprep.mubr.msk.bf16.mxu0 %vm6604_vm0, %v9181_v1  ;;  %5441 = vmatprep.mubr.msk.bf16.mxu1 %vm6604_vm0, %v9181_v1 }
  0x4e   : > { %5386 = vmatmul.mubr.msk.bf16.gmra.mrb[24].mxu0 %vm412_vm1, %v6794_v16  ;;  %5442 = vmatmul.mubr.msk.bf16.gmra.mrb[24].mxu1 %vm412_vm1, %v6797_v17 }
  0x4f   : > { %5389 = vmatprep.mubr.msk.bf16.mxu0 %vm6604_vm0, %v9181_v1  ;;  %5445 = vmatprep.mubr.msk.bf16.mxu1 %vm6604_vm0, %v9181_v1 }
  0x56   : > { %5390 = vmatmul.mubr.msk.bf16.gmra.mrb[28].mxu0 %vm412_vm1, %v6808_v18  ;;  %5446 = vmatmul.mubr.msk.bf16.gmra.mrb[28].mxu1 %vm412_vm1, %v6811_v19 }
  0x57   : > { %5393 = vmatprep.mubr.msk.bf16.mxu0 %vm6604_vm0, %v9181_v1  ;;  %5449 = vmatprep.mubr.msk.bf16.mxu1 %vm6604_vm0, %v9181_v1 }
  0x5e   : > { %5394 = vmatmul.mubr.msk.bf16.gmra.mrb[32].mxu0 %vm412_vm1, %v6822_v20  ;;  %5450 = vmatmul.mubr.msk.bf16.gmra.mrb[32].mxu1 %vm412_vm1, %v6825_v21 }
  0x5f   : > { %5397 = vmatprep.mubr.msk.bf16.mxu0 %vm6604_vm0, %v9181_v1  ;;  %5453 = vmatprep.mubr.msk.bf16.mxu1 %vm6604_vm0, %v9181_v1 }
  0x66   : > { %5398 = vmatmul.mubr.msk.bf16.gmra.mrb[36].mxu0 %vm412_vm1, %v6836_v22  ;;  %5454 = vmatmul.mubr.msk.bf16.gmra.mrb[36].mxu1 %vm412_vm1, %v6839_v23 }
  0x67   : > { %5401 = vmatprep.mubr.msk.bf16.mxu0 %vm6604_vm0, %v9181_v1  ;;  %5457 = vmatprep.mubr.msk.bf16.mxu1 %vm6604_vm0, %v9181_v1 }
  0x6e   : > { %5402 = vmatmul.mubr.msk.bf16.gmra.mrb[40].mxu0 %vm412_vm1, %v6850_v24  ;;  %5458 = vmatmul.mubr.msk.bf16.gmra.mrb[40].mxu1 %vm412_vm1, %v6853_v25 }
  0x6f   : > { %5405 = vmatprep.mubr.msk.bf16.mxu0 %vm6604_vm0, %v9181_v1  ;;  %5461 = vmatprep.mubr.msk.bf16.mxu1 %vm6604_vm0, %v9181_v1 }
  0x76   : > { %5406 = vmatmul.mubr.msk.bf16.gmra.mrb[44].mxu0 %vm412_vm1, %v6864_v26  ;;  %5462 = vmatmul.mubr.msk.bf16.gmra.mrb[44].mxu1 %vm412_vm1, %v6867_v27 }
  0x77   : > { %5409 = vmatprep.mubr.msk.bf16.mxu0 %vm6604_vm0, %v9181_v1  ;;  %5465 = vmatprep.mubr.msk.bf16.mxu1 %vm6604_vm0, %v9181_v1 }
  0x7e   : > { %5410 = vmatmul.mubr.msk.bf16.gmra.mrb[48].mxu0 %vm412_vm1, %v6878_v28  ;;  %5466 = vmatmul.mubr.msk.bf16.gmra.mrb[48].mxu1 %vm412_vm1, %v6881_v29 }
  0x7f   : > { %5413 = vmatprep.mubr.msk.bf16.mxu0 %vm6604_vm0, %v9181_v1  ;;  %5471 = vmatprep.mubr.msk.bf16.mxu1 %vm6604_vm0, %v9181_v1 }
  0x86   : > { %5414 = vmatmul.mubr.msk.bf16.gmra.mrb[52].mxu0 %vm412_vm1, %v6892_v30  ;;  %5472 = vmatmul.mubr.msk.bf16.vlgmr.msra.gmra.mrb[52].mxu1 %vm412_vm1, %v6708_v4 }
  0x87   : > { %5581 = vmatprep.mubr.msk.bf16.mxu0 %vm6604_vm0, %v9181_v1  ;;  %5475 = vmatprep.mubr.msk.bf16.mxu1 %vm6604_vm0, %v9181_v1 }
  0x88   : > { %5690 = vmatpush3.bf16.msra.mxu1 %v6442_v31 }
  0x89   : > { %5909 = vmatprep.subr.bf16.mxu1 %v9181_v1 }
  0x8e   : > { %5582 = vmatmul.mubr.msk.bf16.vlgmr.msra.gmra.mrb[56].mxu0 %vm412_vm1, %v6708_v4  ;;  %5476 = vmatmul.mubr.msk.bf16.gmra.mrb[56].mxu1 %vm412_vm1, %v6723_v6 }
  0x8f   : > { %5800 = vmatpush3.bf16.msra.mxu0 %v6441_v32  ;;  %5479 = vmatprep.mubr.msk.bf16.mxu1 %vm6604_vm0, %v9181_v1 }
  0x90   : > { %5585 = vmatprep.mubr.msk.bf16.mxu0 %vm6604_vm0, %v9181_v1  ;;  %6019 = vmatprep.subr.bf16.mxu0 %v9181_v1 }
  0x96   : > { %5586 = vmatmul.mubr.msk.bf16.gmra.mrb[60].mxu0 %vm412_vm1, %v6723_v6  ;;  %5480 = vmatmul.mubr.msk.bf16.gmra.mrb[60].mxu1 %vm412_vm1, %v6738_v8 }
  0x97   : > { %5589 = vmatprep.mubr.msk.bf16.mxu0 %vm6604_vm0, %v9181_v1  ;;  %5483 = vmatprep.mubr.msk.bf16.mxu1 %vm6604_vm0, %v9181_v1 }
  0x9e   : > { %5590 = vmatmul.mubr.msk.bf16.gmra.mrb[64].mxu0 %vm412_vm1, %v6738_v8  ;;  %5484 = vmatmul.mubr.msk.bf16.gmra.mrb[64].mxu1 %vm412_vm1, %v6752_v10 }
  0x9f   : > { %5593 = vmatprep.mubr.msk.bf16.mxu0 %vm6604_vm0, %v9181_v1  ;;  %5487 = vmatprep.mubr.msk.bf16.mxu1 %vm6604_vm0, %v9181_v1 }
  0xa6   : > { %5594 = vmatmul.mubr.msk.bf16.gmra.mrb[68].mxu0 %vm412_vm1, %v6752_v10  ;;  %5488 = vmatmul.mubr.msk.bf16.gmra.mrb[68].mxu1 %vm412_vm1, %v6766_v12 }
  0xa7   : > { %5597 = vmatprep.mubr.msk.bf16.mxu0 %vm6604_vm0, %v9181_v1  ;;  %5491 = vmatprep.mubr.msk.bf16.mxu1 %vm6604_vm0, %v9181_v1 }
  0xae   : > { %5598 = vmatmul.mubr.msk.bf16.gmra.mrb[72].mxu0 %vm412_vm1, %v6766_v12  ;;  %5492 = vmatmul.mubr.msk.bf16.gmra.mrb[72].mxu1 %vm412_vm1, %v6780_v14 }
  0xaf   : > { %5601 = vmatprep.mubr.msk.bf16.mxu0 %vm6604_vm0, %v9181_v1  ;;  %5495 = vmatprep.mubr.msk.bf16.mxu1 %vm6604_vm0, %v9181_v1 }
  0xb6   : > { %5602 = vmatmul.mubr.msk.bf16.gmra.mrb[76].mxu0 %vm412_vm1, %v6780_v14  ;;  %5496 = vmatmul.mubr.msk.bf16.gmra.mrb[76].mxu1 %vm412_vm1, %v6794_v16 }
  0xb7   : > { %5605 = vmatprep.mubr.msk.bf16.mxu0 %vm6604_vm0, %v9181_v1  ;;  %5499 = vmatprep.mubr.msk.bf16.mxu1 %vm6604_vm0, %v9181_v1 }
  0xbe   : > { %5606 = vmatmul.mubr.msk.bf16.gmra.mrb[80].mxu0 %vm412_vm1, %v6794_v16  ;;  %5500 = vmatmul.mubr.msk.bf16.gmra.mrb[80].mxu1 %vm412_vm1, %v6808_v18 }
  0xbf   : > { %5609 = vmatprep.mubr.msk.bf16.mxu0 %vm6604_vm0, %v9181_v1  ;;  %5503 = vmatprep.mubr.msk.bf16.mxu1 %vm6604_vm0, %v9181_v1 }
  0xc6   : > { %5610 = vmatmul.mubr.msk.bf16.gmra.mrb[84].mxu0 %vm412_vm1, %v6808_v18  ;;  %5504 = vmatmul.mubr.msk.bf16.gmra.mrb[84].mxu1 %vm412_vm1, %v6822_v20 }
  0xc7   : > { %5613 = vmatprep.mubr.msk.bf16.mxu0 %vm6604_vm0, %v9181_v1  ;;  %5507 = vmatprep.mubr.msk.bf16.mxu1 %vm6604_vm0, %v9181_v1 }
  0xce   : > { %5614 = vmatmul.mubr.msk.bf16.gmra.mrb[88].mxu0 %vm412_vm1, %v6822_v20  ;;  %5508 = vmatmul.mubr.msk.bf16.gmra.mrb[88].mxu1 %vm412_vm1, %v6836_v22 }
  0xcf   : > { %5617 = vmatprep.mubr.msk.bf16.mxu0 %vm6604_vm0, %v9181_v1  ;;  %5511 = vmatprep.mubr.msk.bf16.mxu1 %vm6604_vm0, %v9181_v1 }
  0xd6   : > { %5618 = vmatmul.mubr.msk.bf16.gmra.mrb[92].mxu0 %vm412_vm1, %v6836_v22  ;;  %5512 = vmatmul.mubr.msk.bf16.gmra.mrb[92].mxu1 %vm412_vm1, %v6850_v24 }
  0xd7   : > { %5621 = vmatprep.mubr.msk.bf16.mxu0 %vm6604_vm0, %v9181_v1  ;;  %5515 = vmatprep.mubr.msk.bf16.mxu1 %vm6604_vm0, %v9181_v1 }
  0xde   : > { %5622 = vmatmul.mubr.msk.bf16.gmra.mrb[96].mxu0 %vm412_vm1, %v6850_v24  ;;  %5516 = vmatmul.mubr.msk.bf16.gmra.mrb[96].mxu1 %vm412_vm1, %v6864_v26 }
  0xdf   : > { %5625 = vmatprep.mubr.msk.bf16.mxu0 %vm6604_vm0, %v9181_v1  ;;  %5519 = vmatprep.mubr.msk.bf16.mxu1 %vm6604_vm0, %v9181_v1 }
  0xe6   : > { %5626 = vmatmul.mubr.msk.bf16.gmra.mrb[100].mxu0 %vm412_vm1, %v6864_v26  ;;  %5520 = vmatmul.mubr.msk.bf16.gmra.mrb[100].mxu1 %vm412_vm1, %v6878_v28 }
  0xe7   : > { %5629 = vmatprep.mubr.msk.bf16.mxu0 %vm6604_vm0, %v9181_v1  ;;  %5523 = vmatprep.mubr.msk.bf16.mxu1 %vm6604_vm0, %v9181_v1 }
  0xee   : > { %5630 = vmatmul.mubr.msk.bf16.gmra.mrb[104].mxu0 %vm412_vm1, %v6878_v28  ;;  %5524 = vmatmul.mubr.msk.bf16.gmra.mrb[104].mxu1 %vm412_vm1, %v6892_v30 }
  0xef   : > { %5633 = vmatprep.mubr.msk.bf16.mxu0 %vm6604_vm0, %v9181_v1  ;;  %5527 = vmatprep.mubr.msk.bf16.mxu1 %vm6604_vm0, %v9181_v1 }
  0xf1   : > { %v7016_v35 = vpop.f32.mrb[0].mxu0  ;;  %v7018_v37 = vpop.f32.mrb[0].mxu1 }
  0xf2   : > { %v5363_v36 = vpop.f32.mrb[1].mxu0  ;;  %v9179_v39 = vrot.slane %v7018_v37, 7  ;;  %v5419_v40 = vpop.f32.mrb[1].mxu1  ;;  %v9180_v41 = vrot.slane %v7016_v35, 7 }
  0xf3   : > { %v531_v38 = vpop.f32.mrb[2].mxu0  ;;  %v643_v44 = vpop.f32.mrb[2].mxu1 }
  0xf4   : > { %v741_v42 = vrot.slane %v531_v38, 7  ;;  %v5364_v43 = vpop.f32.mrb[3].mxu0  ;;  %v769_v45 = vrot.slane %v643_v44, 7  ;;  %v5420_v46 = vpop.f32.mrb[3].mxu1 }
  0xf6   : > { %5634 = vmatmul.mubr.msk.bf16.gmra.mrb[108].mxu0 %vm412_vm1, %v6892_v30  ;;  %v7029_v47 = vsel %vm793_vm2, %v9180_v41, %v741_v42  ;;  %5528 = vmatmul.mubr.msk.bf16.gmra.mrb[108].mxu1 %vm412_vm1, %v6711_v5  ;;  %v7039_v48 = vsel %vm793_vm2, %v9179_v39, %v769_v45 }
  0xf7   : > { %5637 = vmatprep.mubr.msk.bf16.mxu0 %vm6604_vm0, %v9181_v1  ;;  %5531 = vmatprep.mubr.msk.bf16.mxu1 %vm6604_vm0, %v9181_v1 }
  0xf9   : > { %v536_v49 = vpop.f32.mrb[4].mxu0  ;;  %v648_v52 = vpop.f32.mrb[4].mxu1 }
  0xfa   : > { %v742_v50 = vrot.slane %v536_v49, 7  ;;  %v5367_v51 = vpop.f32.mrb[5].mxu0  ;;  %v770_v54 = vrot.slane %v648_v52, 7  ;;  %v5423_v55 = vpop.f32.mrb[5].mxu1 }
  0xfb   : > { %v539_v53 = vpop.f32.mrb[6].mxu0  ;;  %v651_v58 = vpop.f32.mrb[6].mxu1 }
  0xfc   : > { %v743_v56 = vrot.slane %v539_v53, 7  ;;  %v5368_v57 = vpop.f32.mrb[7].mxu0  ;;  %v7045_v59 = vsel %vm793_vm2, %v741_v42, %v742_v50  ;;  %v771_v60 = vrot.slane %v651_v58, 7  ;;  %v5424_v61 = vpop.f32.mrb[7].mxu1  ;;  %v7049_v62 = vsel %vm793_vm2, %v769_v45, %v770_v54 }
  0xfe   : > { %5638 = vmatmul.mubr.msk.bf16.gmra.mrb[112].mxu0 %vm412_vm1, %v6711_v5  ;;  %v7055_v63 = vsel %vm793_vm2, %v742_v50, %v743_v56  ;;  %5532 = vmatmul.mubr.msk.bf16.gmra.mrb[112].mxu1 %vm412_vm1, %v6727_v7  ;;  %v7063_v0 = vsel %vm793_vm2, %v770_v54, %v771_v60 }
  0xff   : > { %5641 = vmatprep.mubr.msk.bf16.mxu0 %vm6604_vm0, %v9181_v1  ;;  %5535 = vmatprep.mubr.msk.bf16.mxu1 %vm6604_vm0, %v9181_v1 }
 0x101   : > { %v544_v2 = vpop.f32.mrb[8].mxu0  ;;  %v656_v20 = vpop.f32.mrb[8].mxu1 }
 0x102   : > { %v744_v3 = vrot.slane %v544_v2, 7  ;;  %v5371_v5 = vpop.f32.mrb[9].mxu0  ;;  %v772_v24 = vrot.slane %v656_v20, 7  ;;  %v5427_v26 = vpop.f32.mrb[9].mxu1 }
 0x103   : > { %v547_v22 = vpop.f32.mrb[10].mxu0  ;;  %v659_v31 = vpop.f32.mrb[10].mxu1 }
 0x104   : > { %v745_v28 = vrot.slane %v547_v22, 7  ;;  %v5372_v30 = vpop.f32.mrb[11].mxu0  ;;  %v7069_v32 = vsel %vm793_vm2, %v743_v56, %v744_v3  ;;  %v773_v33 = vrot.slane %v659_v31, 7  ;;  %v5428_v36 = vpop.f32.mrb[11].mxu1  ;;  %v7073_v38 = vsel %vm793_vm2, %v771_v60, %v772_v24 }
 0x106   : > { %5642 = vmatmul.mubr.msk.bf16.gmra.mrb[116].mxu0 %vm412_vm1, %v6727_v7  ;;  %v7079_v40 = vsel %vm793_vm2, %v744_v3, %v745_v28  ;;  %5536 = vmatmul.mubr.msk.bf16.gmra.mrb[116].mxu1 %vm412_vm1, %v6741_v9  ;;  %v7087_v42 = vsel %vm793_vm2, %v772_v24, %v773_v33 }
 0x107   : > { %5645 = vmatprep.mubr.msk.bf16.mxu0 %vm6604_vm0, %v9181_v1  ;;  %5539 = vmatprep.mubr.msk.bf16.mxu1 %vm6604_vm0, %v9181_v1 }
 0x109   : > { %v552_v43 = vpop.f32.mrb[12].mxu0  ;;  %v664_v45 = vpop.f32.mrb[12].mxu1 }
 0x10a   : > { %v746_v44 = vrot.slane %v552_v43, 7  ;;  %v5375_v7 = vpop.f32.mrb[13].mxu0  ;;  %v774_v49 = vrot.slane %v664_v45, 7  ;;  %v5431_v50 = vpop.f32.mrb[13].mxu1 }
 0x10b   : > { %v555_v46 = vpop.f32.mrb[14].mxu0  ;;  %v667_v53 = vpop.f32.mrb[14].mxu1 }
 0x10c   : > { %v747_v51 = vrot.slane %v555_v46, 7  ;;  %v5376_v52 = vpop.f32.mrb[15].mxu0  ;;  %v7093_v54 = vsel %vm793_vm2, %v745_v28, %v746_v44  ;;  %v775_v55 = vrot.slane %v667_v53, 7  ;;  %v5432_v56 = vpop.f32.mrb[15].mxu1  ;;  %v7097_v57 = vsel %vm793_vm2, %v773_v33, %v774_v49 }
 0x10e   : > { %5646 = vmatmul.mubr.msk.bf16.gmra.mrb[120].mxu0 %vm412_vm1, %v6741_v9  ;;  %v7103_v58 = vsel %vm793_vm2, %v746_v44, %v747_v51  ;;  %5540 = vmatmul.mubr.msk.bf16.gmra.mrb[120].mxu1 %vm412_vm1, %v6755_v11  ;;  %v7111_v60 = vsel %vm793_vm2, %v774_v49, %v775_v55 }
 0x10f   : > { %5649 = vmatprep.mubr.msk.bf16.mxu0 %vm6604_vm0, %v9181_v1  ;;  %5543 = vmatprep.mubr.msk.bf16.mxu1 %vm6604_vm0, %v9181_v1 }
 0x111   : > { %v560_v61 = vpop.f32.mrb[16].mxu0  ;;  %v672_v3 = vpop.f32.mrb[16].mxu1 }
 0x112   : > { %v748_v2 = vrot.slane %v560_v61, 7  ;;  %v5379_v9 = vpop.f32.mrb[17].mxu0  ;;  %v776_v20 = vrot.slane %v672_v3, 7  ;;  %v5435_v22 = vpop.f32.mrb[17].mxu1 }
 0x113   : > { %v563_v5 = vpop.f32.mrb[18].mxu0  ;;  %v675_v28 = vpop.f32.mrb[18].mxu1 }
 0x114   : > { %v749_v24 = vrot.slane %v563_v5, 7  ;;  %v5380_v26 = vpop.f32.mrb[19].mxu0  ;;  %v7117_v30 = vsel %vm793_vm2, %v747_v51, %v748_v2  ;;  %v777_v31 = vrot.slane %v675_v28, 7  ;;  %v5436_v33 = vpop.f32.mrb[19].mxu1  ;;  %v7121_v36 = vsel %vm793_vm2, %v775_v55, %v776_v20 }
 0x116   : > { %5650 = vmatmul.mubr.msk.bf16.gmra.mrb[124].mxu0 %vm412_vm1, %v6755_v11  ;;  %v7127_v43 = vsel %vm793_vm2, %v748_v2, %v749_v24  ;;  %5544 = vmatmul.mubr.msk.bf16.gmra.mrb[124].mxu1 %vm412_vm1, %v6769_v13  ;;  %v7135_v44 = vsel %vm793_vm2, %v776_v20, %v777_v31 }
 0x117   : > { %5653 = vmatprep.mubr.msk.bf16.mxu0 %vm6604_vm0, %v9181_v1  ;;  %5547 = vmatprep.mubr.msk.bf16.mxu1 %vm6604_vm0, %v9181_v1 }
 0x119   : > { %v568_v7 = vpop.f32.mrb[20].mxu0  ;;  %v680_v46 = vpop.f32.mrb[20].mxu1 }
 0x11a   : > { %v750_v45 = vrot.slane %v568_v7, 7  ;;  %v5383_v11 = vpop.f32.mrb[21].mxu0  ;;  %v778_v50 = vrot.slane %v680_v46, 7  ;;  %v5439_v51 = vpop.f32.mrb[21].mxu1 }
 0x11b   : > { %v571_v49 = vpop.f32.mrb[22].mxu0  ;;  %v683_v55 = vpop.f32.mrb[22].mxu1 }
 0x11c   : > { %v751_v52 = vrot.slane %v571_v49, 7  ;;  %v5384_v53 = vpop.f32.mrb[23].mxu0  ;;  %v7141_v56 = vsel %vm793_vm2, %v749_v24, %v750_v45  ;;  %v779_v61 = vrot.slane %v683_v55, 7  ;;  %v5440_v2 = vpop.f32.mrb[23].mxu1  ;;  %v7145_v9 = vsel %vm793_vm2, %v777_v31, %v778_v50 }
 0x11e   : > { %5654 = vmatmul.mubr.msk.bf16.gmra.mrb[128].mxu0 %vm412_vm1, %v6769_v13  ;;  %v7151_v3 = vsel %vm793_vm2, %v750_v45, %v751_v52  ;;  %5548 = vmatmul.mubr.msk.bf16.gmra.mrb[128].mxu1 %vm412_vm1, %v6783_v15  ;;  %v7159_v5 = vsel %vm793_vm2, %v778_v50, %v779_v61 }
 0x11f   : > { %5657 = vmatprep.mubr.msk.bf16.mxu0 %vm6604_vm0, %v9181_v1  ;;  %5551 = vmatprep.mubr.msk.bf16.mxu1 %vm6604_vm0, %v9181_v1 }
 0x121   : > { %v576_v20 = vpop.f32.mrb[24].mxu0  ;;  %v688_v24 = vpop.f32.mrb[24].mxu1 }
 0x122   : > { %v752_v22 = vrot.slane %v576_v20, 7  ;;  %v5387_v13 = vpop.f32.mrb[25].mxu0  ;;  %v780_v28 = vrot.slane %v688_v24, 7  ;;  %v5443_v31 = vpop.f32.mrb[25].mxu1 }
 0x123   : > { %v579_v26 = vpop.f32.mrb[26].mxu0  ;;  %v691_v45 = vpop.f32.mrb[26].mxu1 }
 0x124   : > { %v753_v33 = vrot.slane %v579_v26, 7  ;;  %v5388_v7 = vpop.f32.mrb[27].mxu0  ;;  %v7165_v11 = vsel %vm793_vm2, %v751_v52, %v752_v22  ;;  %v781_v46 = vrot.slane %v691_v45, 7  ;;  %v5444_v49 = vpop.f32.mrb[27].mxu1  ;;  %v7169_v50 = vsel %vm793_vm2, %v779_v61, %v780_v28 }
 0x125   : > { %9185 = vst [vmem:[#allocation5_spill] sm:$0xff] %v7169_v50 }
 0x126   : > { %5658 = vmatmul.mubr.msk.bf16.gmra.mrb[132].mxu0 %vm412_vm1, %v6783_v15  ;;  %v7175_v51 = vsel %vm793_vm2, %v752_v22, %v753_v33  ;;  %5552 = vmatmul.mubr.msk.bf16.gmra.mrb[132].mxu1 %vm412_vm1, %v6797_v17  ;;  %v7183_v52 = vsel %vm793_vm2, %v780_v28, %v781_v46 }
 0x127   : > { %5661 = vmatprep.mubr.msk.bf16.mxu0 %vm6604_vm0, %v9181_v1  ;;  %9186 = vst [vmem:[#allocation6_spill] sm:$0xff] %v7183_v52  ;;  %5555 = vmatprep.mubr.msk.bf16.mxu1 %vm6604_vm0, %v9181_v1 }
 0x129   : > { %v584_v53 = vpop.f32.mrb[28].mxu0  ;;  %v696_v61 = vpop.f32.mrb[28].mxu1 }
 0x12a   : > { %v754_v55 = vrot.slane %v584_v53, 7  ;;  %v5391_v15 = vpop.f32.mrb[29].mxu0  ;;  %v782_v20 = vrot.slane %v696_v61, 7  ;;  %v5447_v22 = vpop.f32.mrb[29].mxu1 }
 0x12b   : > { %v587_v2 = vpop.f32.mrb[30].mxu0  ;;  %v699_v26 = vpop.f32.mrb[30].mxu1 }
 0x12c   : > { %v755_v13 = vrot.slane %v587_v2, 7  ;;  %v5392_v24 = vpop.f32.mrb[31].mxu0  ;;  %v7189_v31 = vsel %vm793_vm2, %v753_v33, %v754_v55  ;;  %v783_v7 = vrot.slane %v699_v26, 7  ;;  %v5448_v28 = vpop.f32.mrb[31].mxu1  ;;  %v7193_v45 = vsel %vm793_vm2, %v781_v46, %v782_v20 }
 0x12d   : > { %9187 = vst [vmem:[#allocation7_spill] sm:$0xff] %v7193_v45 }
 0x12e   : > { %5662 = vmatmul.mubr.msk.bf16.gmra.mrb[136].mxu0 %vm412_vm1, %v6797_v17  ;;  %v7199_v49 = vsel %vm793_vm2, %v754_v55, %v755_v13  ;;  %5556 = vmatmul.mubr.msk.bf16.gmra.mrb[136].mxu1 %vm412_vm1, %v6811_v19  ;;  %v7207_v33 = vsel %vm793_vm2, %v782_v20, %v783_v7 }
 0x12f   : > { %5665 = vmatprep.mubr.msk.bf16.mxu0 %vm6604_vm0, %v9181_v1  ;;  %9188 = vst [vmem:[#allocation8_spill] sm:$0xff] %v7207_v33  ;;  %5559 = vmatprep.mubr.msk.bf16.mxu1 %vm6604_vm0, %v9181_v1 }
 0x131   : > { %v592_v46 = vpop.f32.mrb[32].mxu0  ;;  %v704_v15 = vpop.f32.mrb[32].mxu1 }
 0x132   : > { %v756_v53 = vrot.slane %v592_v46, 7  ;;  %v5395_v17 = vpop.f32.mrb[33].mxu0  ;;  %v784_v55 = vrot.slane %v704_v15, 7  ;;  %v5451_v2 = vpop.f32.mrb[33].mxu1 }
 0x133   : > { %v595_v61 = vpop.f32.mrb[34].mxu0  ;;  %v707_v26 = vpop.f32.mrb[34].mxu1 }
 0x134   : > { %v757_v22 = vrot.slane %v595_v61, 7  ;;  %v5396_v24 = vpop.f32.mrb[35].mxu0  ;;  %v7213_v28 = vsel %vm793_vm2, %v755_v13, %v756_v53  ;;  %v785_v39 = vrot.slane %v707_v26, 7  ;;  %v5452_v20 = vpop.f32.mrb[35].mxu1  ;;  %v7217_v41 = vsel %vm793_vm2, %v783_v7, %v784_v55 }
 0x135   : > { %9189 = vst [vmem:[#allocation9_spill] sm:$0xff] %v7217_v41 }
 0x136   : > { %5666 = vmatmul.mubr.msk.bf16.gmra.mrb[140].mxu0 %vm412_vm1, %v6811_v19  ;;  %v7223_v46 = vsel %vm793_vm2, %v756_v53, %v757_v22  ;;  %5560 = vmatmul.mubr.msk.bf16.gmra.mrb[140].mxu1 %vm412_vm1, %v6825_v21  ;;  %v7231_v13 = vsel %vm793_vm2, %v784_v55, %v785_v39 }
 0x137   : > { %5669 = vmatprep.mubr.msk.bf16.mxu0 %vm6604_vm0, %v9181_v1  ;;  %9190 = vst [vmem:[#allocation10_spill] sm:$0xff] %v7231_v13  ;;  %5563 = vmatprep.mubr.msk.bf16.mxu1 %vm6604_vm0, %v9181_v1 }
 0x139   : > { %v600_v7 = vpop.f32.mrb[36].mxu0  ;;  %v712_v15 = vpop.f32.mrb[36].mxu1 }
 0x13a   : > { %v758_v17 = vrot.slane %v600_v7, 7  ;;  %v5399_v19 = vpop.f32.mrb[37].mxu0  ;;  %v786_v53 = vrot.slane %v712_v15, 7  ;;  %v5455_v2 = vpop.f32.mrb[37].mxu1 }
 0x13b   : > { %v603_v61 = vpop.f32.mrb[38].mxu0  ;;  %v715_v20 = vpop.f32.mrb[38].mxu1 }
 0x13c   : > { %v759_v24 = vrot.slane %v603_v61, 7  ;;  %v5400_v26 = vpop.f32.mrb[39].mxu0  ;;  %v7237_v41 = vsel %vm793_vm2, %v757_v22, %v758_v17  ;;  %v787_v33 = vrot.slane %v715_v20, 7  ;;  %v5456_v55 = vpop.f32.mrb[39].mxu1  ;;  %v7241_v13 = vsel %vm793_vm2, %v785_v39, %v786_v53 }
 0x13d   : > { %9191 = vst [vmem:[#allocation11_spill] sm:$0xff] %v7241_v13 }
 0x13e   : > { %5670 = vmatmul.mubr.msk.bf16.gmra.mrb[144].mxu0 %vm412_vm1, %v6825_v21  ;;  %v7247_v7 = vsel %vm793_vm2, %v758_v17, %v759_v24  ;;  %5564 = vmatmul.mubr.msk.bf16.gmra.mrb[144].mxu1 %vm412_vm1, %v6839_v23  ;;  %v7255_v22 = vsel %vm793_vm2, %v786_v53, %v787_v33 }
 0x13f   : > { %5673 = vmatprep.mubr.msk.bf16.mxu0 %vm6604_vm0, %v9181_v1  ;;  %9192 = vst [vmem:[#allocation12_spill] sm:$0xff] %v7255_v22  ;;  %5567 = vmatprep.mubr.msk.bf16.mxu1 %vm6604_vm0, %v9181_v1 }
 0x141   : > { %v608_v39 = vpop.f32.mrb[40].mxu0  ;;  %v720_v15 = vpop.f32.mrb[40].mxu1 }
 0x142   : > { %v760_v19 = vrot.slane %v608_v39, 7  ;;  %v5403_v21 = vpop.f32.mrb[41].mxu0  ;;  %v5459_v17 = vpop.f32.mrb[41].mxu1 }
 0x143   : > { %v611_v61 = vpop.f32.mrb[42].mxu0  ;;  %v723_v20 = vpop.f32.mrb[42].mxu1 }
 0x144   : > { %v761_v2 = vrot.slane %v611_v61, 7  ;;  %v5404_v26 = vpop.f32.mrb[43].mxu0  ;;  %v7261_v55 = vsel %vm793_vm2, %v759_v24, %v760_v19  ;;  %v5460_v13 = vpop.f32.mrb[43].mxu1 }
 0x146   : > { %5674 = vmatmul.mubr.msk.bf16.gmra.mrb[148].mxu0 %vm412_vm1, %v6839_v23  ;;  %v7267_v33 = vsel %vm793_vm2, %v760_v19, %v761_v2  ;;  %5568 = vmatmul.mubr.msk.bf16.gmra.mrb[148].mxu1 %vm412_vm1, %v6853_v25 }
 0x147   : > { %5677 = vmatprep.mubr.msk.bf16.mxu0 %vm6604_vm0, %v9181_v1  ;;  %5571 = vmatprep.mubr.msk.bf16.mxu1 %vm6604_vm0, %v9181_v1 }
 0x149   : > { %v616_v53 = vpop.f32.mrb[44].mxu0  ;;  %v727_v13 = vpop.f32.mrb[44].mxu1 }
 0x14a   : > { %v762_v24 = vrot.slane %v616_v53, 7  ;;  %v5407_v39 = vpop.f32.mrb[45].mxu0  ;;  %v5463_v15 = vpop.f32.mrb[45].mxu1 }
 0x14b   : > { %v619_v21 = vpop.f32.mrb[46].mxu0  ;;  %v729_v17 = vpop.f32.mrb[46].mxu1 }
 0x14c   : > { %v763_v23 = vrot.slane %v619_v21, 7  ;;  %v5408_v61 = vpop.f32.mrb[47].mxu0  ;;  %v7277_v19 = vsel %vm793_vm2, %v761_v2, %v762_v24  ;;  %v5464_v26 = vpop.f32.mrb[47].mxu1 }
 0x14e   : > { %5678 = vmatmul.mubr.msk.bf16.gmra.mrb[152].mxu0 %vm412_vm1, %v6853_v25  ;;  %v7283_v20 = vsel %vm793_vm2, %v762_v24, %v763_v23  ;;  %5572 = vmatmul.mubr.msk.bf16.gmra.mrb[152].mxu1 %vm412_vm1, %v6867_v27 }
 0x14f   : > { %5681 = vmatprep.mubr.msk.bf16.mxu0 %vm6604_vm0, %v9181_v1  ;;  %5575 = vmatprep.mubr.msk.bf16.mxu1 %vm6604_vm0, %v9181_v1 }
 0x151   : > { %v624_v53 = vpop.f32.mrb[48].mxu0  ;;  %v733_v39 = vpop.f32.mrb[48].mxu1 }
 0x152   : > { %v764_v2 = vrot.slane %v624_v53, 7  ;;  %v5411_v13 = vpop.f32.mrb[49].mxu0  ;;  %v5467_v21 = vpop.f32.mrb[49].mxu1  ;;  %v9193_v53 = vrot.slane %v7016_v35, 7  ;;  %v6444_v35 = vld [vmem:[%s9176_s1 + $0x28] sm:$0xff]  }
 0x153   : > { %v627_v15 = vpop.f32.mrb[50].mxu0  ;;  %v736_v61 = vpop.f32.mrb[50].mxu1  ;;  %v9194_v13 = vmov 0.0  }
 0x154   : > { %v765_v25 = vrot.slane %v627_v15, 7  ;;  %v5412_v17 = vpop.f32.mrb[51].mxu0  ;;  %v7293_v24 = vsel %vm793_vm2, %v763_v23, %v764_v2  ;;  %v790_v26 = vrot.slane %v736_v61, 7  ;;  %v5468_v22 = vpop.f32.mrb[51].mxu1 }
 0x156   : > { %5682 = vmatmul.mubr.msk.bf16.gmra.mrb[156].mxu0 %vm412_vm1, %v6867_v27  ;;  %v7299_v1 = vsel %vm793_vm2, %v764_v2, %v765_v25  ;;  %5576 = vmatmul.mubr.msk.bf16.gmra.mrb[156].mxu1 %vm412_vm1, %v6881_v29  ;;  %v843_v39 = vsel %vm793_vm2, %v790_v26, %v9193_v53 }
 0x157   : > { %5685 = vmatprep.mubr.msk.bf16.mxu0 %vm6604_vm0, %v9194_v13  ;;  %5691 = vmatprep.mubr.msk.bf16.mxu1 %vm6604_vm0, %v9194_v13 }
 0x159   : > { %v632_v22 = vpop.f32.mrb[52].mxu0  ;;  %v937_v23 = vpop.f32.mrb[52].mxu1 }
 0x15a   : > { %v766_v27 = vrot.slane %v632_v22, 7  ;;  %v5415_v21 = vpop.f32.mrb[53].mxu0  ;;  %v1149_v2 = vadd.f32 %v937_v23, %v843_v39  ;;  %v5473_v15 = vpop.f32.mrb[53].mxu1 }
 0x15b   : > { %v635_v61 = vpop.f32.mrb[54].mxu0  ;;  %v940_v45 = vpop.f32.mrb[54].mxu1 }
 0x15c   : > { %v767_v17 = vrot.slane %v635_v61, 7  ;;  %v5416_v52 = vpop.f32.mrb[55].mxu0  ;;  %v7316_v26 = vsel %vm793_vm2, %v765_v25, %v766_v27  ;;  %v1150_v53 = vadd.f32 %v940_v45, %v7029_v47  ;;  %v5474_v50 = vpop.f32.mrb[55].mxu1 }
 0x15d   : > { %v9195_v52 = vrot.slane %v7018_v37, 7 }
 0x15e   : > { %5686 = vmatmul.mubr.msk.bf16.gmra.mrb[160].mxu0 %vm412_vm1, %v6881_v29  ;;  %v7323_v39 = vsel %vm793_vm2, %v766_v27, %v767_v17  ;;  %5692 = vmatmul.mubr.msk.bf16.vlgmr.msra.gmra.mrb[160].mxu1 %vm412_vm1, %v6708_v4  ;;  %v6443_v27 = vld [vmem:[%s9176_s1 + $0x30] sm:$0xff]  }
 0x15f   : > { %v7329_v22 = vsel %vm793_vm2, %v767_v17, %v9195_v52  ;;  %5801 = vmatprep.mubr.msk.bf16.mxu0 %vm6604_vm0, %v9194_v13  ;;  %5695 = vmatprep.mubr.msk.bf16.mxu1 %vm6604_vm0, %v9194_v13 }
 0x160   : > { %5910 = vmatpush3.bf16.msra.mxu1 %v6444_v35 }
 0x161   : > { %v1241_v29 = vpop.f32.mrb[56].mxu0  ;;  %6129 = vmatprep.subr.bf16.mxu1 %v9194_v13  ;;  %v945_v47 = vpop.f32.mrb[56].mxu1 }
 0x162   : > { %v5583_v50 = vpop.f32.mrb[57].mxu0  ;;  %v1151_v37 = vadd.f32 %v945_v47, %v7045_v59  ;;  %v5477_v45 = vpop.f32.mrb[57].mxu1  ;;  %v1453_v23 = vrot.slane %v1241_v29, 1 }
 0x163   : > { %v1244_v25 = vpop.f32.mrb[58].mxu0  ;;  %v948_v21 = vpop.f32.mrb[58].mxu1 }
 0x164   : > { %v1454_v15 = vrot.slane %v1244_v25, 1  ;;  %v5584_v61 = vpop.f32.mrb[59].mxu0  ;;  %v1152_v17 = vadd.f32 %v948_v21, %v7055_v63  ;;  %v5478_v35 = vpop.f32.mrb[59].mxu1 }
 0x166   : > { %v1553_v52 = vsel %vm1504_vm3, %v1453_v23, %v1454_v15  ;;  %5802 = vmatmul.mubr.msk.bf16.vlgmr.msra.gmra.mrb[164].mxu0 %vm412_vm1, %v6708_v4  ;;  %5696 = vmatmul.mubr.msk.bf16.gmra.mrb[164].mxu1 %vm412_vm1, %v6723_v6 }
 0x167   : > { %6020 = vmatpush3.bf16.msra.mxu0 %v6443_v27  ;;  %v7350_v59 = vadd.f32 %v1553_v52, %v1149_v2  ;;  %5699 = vmatprep.mubr.msk.bf16.mxu1 %vm6604_vm0, %v9194_v13 }
 0x168   : > { %5805 = vmatprep.mubr.msk.bf16.mxu0 %vm6604_vm0, %v9194_v13  ;;  %6239 = vmatprep.subr.bf16.mxu0 %v9194_v13 }
 0x169   : > { %9196 = vst [vmem:[#allocation13_spill] sm:$0xff] %v7350_v59  ;;  %v1249_v63 = vpop.f32.mrb[60].mxu0  ;;  %v953_v29 = vpop.f32.mrb[60].mxu1 }
 0x16a   : > { %v1455_v47 = vrot.slane %v1249_v63, 1  ;;  %v5587_v50 = vpop.f32.mrb[61].mxu0  ;;  %v1153_v4 = vadd.f32 %v953_v29, %v7069_v32  ;;  %v5481_v45 = vpop.f32.mrb[61].mxu1 }
 0x16b   : > { %v1252_v25 = vpop.f32.mrb[62].mxu0  ;;  %v956_v27 = vpop.f32.mrb[62].mxu1 }
 0x16c   : > { %v1552_v2 = vsel %vm1504_vm3, %v1454_v15, %v1455_v47  ;;  %v1456_v23 = vrot.slane %v1252_v25, 1  ;;  %v5588_v21 = vpop.f32.mrb[63].mxu0  ;;  %v1154_v61 = vadd.f32 %v956_v27, %v7079_v40  ;;  %v5482_v35 = vpop.f32.mrb[63].mxu1 }
 0x16d   : > { %v7361_v52 = vadd.f32 %v1552_v2, %v1150_v53 }
 0x16e   : > { %v1551_v59 = vsel %vm1504_vm3, %v1455_v47, %v1456_v23  ;;  %5806 = vmatmul.mubr.msk.bf16.gmra.mrb[168].mxu0 %vm412_vm1, %v6723_v6  ;;  %5700 = vmatmul.mubr.msk.bf16.gmra.mrb[168].mxu1 %vm412_vm1, %v6738_v8 }
 0x16f   : > { %5809 = vmatprep.mubr.msk.bf16.mxu0 %vm6604_vm0, %v9194_v13  ;;  %v7371_v32 = vadd.f32 %v1551_v59, %v1151_v37  ;;  %5703 = vmatprep.mubr.msk.bf16.mxu1 %vm6604_vm0, %v9194_v13 }
 0x171   : > { %v1257_v40 = vpop.f32.mrb[64].mxu0  ;;  %v961_v53 = vpop.f32.mrb[64].mxu1 }
 0x172   : > { %v1457_v15 = vrot.slane %v1257_v40, 1  ;;  %v5591_v63 = vpop.f32.mrb[65].mxu0  ;;  %v1155_v29 = vadd.f32 %v961_v53, %v7093_v54  ;;  %v5485_v47 = vpop.f32.mrb[65].mxu1 }
 0x173   : > { %v1260_v50 = vpop.f32.mrb[66].mxu0  ;;  %v964_v45 = vpop.f32.mrb[66].mxu1 }
 0x174   : > { %v1550_v6 = vsel %vm1504_vm3, %v1456_v23, %v1457_v15  ;;  %v1458_v25 = vrot.slane %v1260_v50, 1  ;;  %v5592_v2 = vpop.f32.mrb[67].mxu0  ;;  %v1156_v37 = vadd.f32 %v964_v45, %v7103_v58  ;;  %v5486_v59 = vpop.f32.mrb[67].mxu1 }
 0x175   : > { %v7379_v27 = vadd.f32 %v1550_v6, %v1152_v17 }
 0x176   : > { %v1549_v21 = vsel %vm1504_vm3, %v1457_v15, %v1458_v25  ;;  %5810 = vmatmul.mubr.msk.bf16.gmra.mrb[172].mxu0 %vm412_vm1, %v6738_v8  ;;  %5704 = vmatmul.mubr.msk.bf16.gmra.mrb[172].mxu1 %vm412_vm1, %v6752_v10 }
 0x177   : > { %5813 = vmatprep.mubr.msk.bf16.mxu0 %vm6604_vm0, %v9194_v13  ;;  %v7389_v54 = vadd.f32 %v1549_v21, %v1153_v4  ;;  %5707 = vmatprep.mubr.msk.bf16.mxu1 %vm6604_vm0, %v9194_v13 }
 0x179   : > { %v1265_v58 = vpop.f32.mrb[68].mxu0  ;;  %v969_v17 = vpop.f32.mrb[68].mxu1 }
 0x17a   : > { %v1459_v23 = vrot.slane %v1265_v58, 1  ;;  %v5595_v35 = vpop.f32.mrb[69].mxu0  ;;  %v1157_v40 = vadd.f32 %v969_v17, %v7117_v30  ;;  %v5489_v53 = vpop.f32.mrb[69].mxu1 }
 0x17b   : > { %v1268_v15 = vpop.f32.mrb[70].mxu0  ;;  %v972_v63 = vpop.f32.mrb[70].mxu1 }
 0x17c   : > { %v1548_v8 = vsel %vm1504_vm3, %v1458_v25, %v1459_v23  ;;  %v1460_v47 = vrot.slane %v1268_v15, 1  ;;  %v5596_v50 = vpop.f32.mrb[71].mxu0  ;;  %v1158_v4 = vadd.f32 %v972_v63, %v7127_v43  ;;  %v5490_v6 = vpop.f32.mrb[71].mxu1 }
 0x17d   : > { %v7397_v45 = vadd.f32 %v1548_v8, %v1154_v61 }
 0x17e   : > { %v1547_v2 = vsel %vm1504_vm3, %v1459_v23, %v1460_v47  ;;  %5814 = vmatmul.mubr.msk.bf16.gmra.mrb[176].mxu0 %vm412_vm1, %v6752_v10  ;;  %5708 = vmatmul.mubr.msk.bf16.gmra.mrb[176].mxu1 %vm412_vm1, %v6766_v12 }
 0x17f   : > { %5817 = vmatprep.mubr.msk.bf16.mxu0 %vm6604_vm0, %v9194_v13  ;;  %v7407_v30 = vadd.f32 %v1547_v2, %v1155_v29  ;;  %5711 = vmatprep.mubr.msk.bf16.mxu1 %vm6604_vm0, %v9194_v13 }
 0x181   : > { %v1273_v43 = vpop.f32.mrb[72].mxu0  ;;  %v977_v61 = vpop.f32.mrb[72].mxu1 }
 0x182   : > { %v1461_v25 = vrot.slane %v1273_v43, 1  ;;  %v5599_v59 = vpop.f32.mrb[73].mxu0  ;;  %v1159_v21 = vadd.f32 %v977_v61, %v7141_v56  ;;  %v5493_v58 = vpop.f32.mrb[73].mxu1 }
 0x183   : > { %v1276_v17 = vpop.f32.mrb[74].mxu0  ;;  %v980_v23 = vpop.f32.mrb[74].mxu1 }
 0x184   : > { %v1546_v10 = vsel %vm1504_vm3, %v1460_v47, %v1461_v25  ;;  %v1462_v35 = vrot.slane %v1276_v17, 1  ;;  %v5600_v53 = vpop.f32.mrb[75].mxu0  ;;  %v1160_v29 = vadd.f32 %v980_v23, %v7151_v3  ;;  %v5494_v15 = vpop.f32.mrb[75].mxu1 }
 0x185   : > { %v7415_v8 = vadd.f32 %v1546_v10, %v1156_v37 }
 0x186   : > { %v1545_v63 = vsel %vm1504_vm3, %v1461_v25, %v1462_v35  ;;  %5818 = vmatmul.mubr.msk.bf16.gmra.mrb[180].mxu0 %vm412_vm1, %v6766_v12  ;;  %5712 = vmatmul.mubr.msk.bf16.gmra.mrb[180].mxu1 %vm412_vm1, %v6780_v14 }
 0x187   : > { %5821 = vmatprep.mubr.msk.bf16.mxu0 %vm6604_vm0, %v9194_v13  ;;  %v7425_v56 = vadd.f32 %v1545_v63, %v1157_v40  ;;  %5715 = vmatprep.mubr.msk.bf16.mxu1 %vm6604_vm0, %v9194_v13 }
 0x189   : > { %v1281_v3 = vpop.f32.mrb[76].mxu0  ;;  %v985_v37 = vpop.f32.mrb[76].mxu1 }
 0x18a   : > { %v1463_v47 = vrot.slane %v1281_v3, 1  ;;  %v5603_v50 = vpop.f32.mrb[77].mxu0  ;;  %v1161_v6 = vadd.f32 %v985_v37, %v7165_v11  ;;  %v5497_v2 = vpop.f32.mrb[77].mxu1 }
 0x18b   : > { %v1284_v43 = vpop.f32.mrb[78].mxu0  ;;  %v988_v61 = vpop.f32.mrb[78].mxu1 }
 0x18c   : > { %v1544_v12 = vsel %vm1504_vm3, %v1462_v35, %v1463_v47  ;;  %v1464_v25 = vrot.slane %v1284_v43, 1  ;;  %v5604_v59 = vpop.f32.mrb[79].mxu0  ;;  %v1162_v40 = vadd.f32 %v988_v61, %v7175_v51  ;;  %v5498_v58 = vpop.f32.mrb[79].mxu1  ;;  %v7456_v43 = vld [vmem:[%s6702_s7 + $0x30] sm:$0xff]  }
 0x18d   : > { %v7433_v17 = vadd.f32 %v1544_v12, %v1158_v4 }
 0x18e   : > { %v1543_v10 = vsel %vm1504_vm3, %v1463_v47, %v1464_v25  ;;  %5822 = vmatmul.mubr.msk.bf16.gmra.mrb[184].mxu0 %vm412_vm1, %v6780_v14  ;;  %5716 = vmatmul.mubr.msk.bf16.gmra.mrb[184].mxu1 %vm412_vm1, %v6794_v16 }
 0x18f   : > { %5825 = vmatprep.mubr.msk.bf16.mxu0 %vm6604_vm0, %v9194_v13  ;;  %v7443_v11 = vadd.f32 %v1543_v10, %v1159_v21  ;;  %5719 = vmatprep.mubr.msk.bf16.mxu1 %vm6604_vm0, %v9194_v13 }
 0x191   : > { %v1289_v51 = vpop.f32.mrb[80].mxu0  ;;  %v993_v4 = vpop.f32.mrb[80].mxu1 }
 0x192   : > { %v1465_v23 = vrot.slane %v1289_v51, 1  ;;  %v5607_v35 = vpop.f32.mrb[81].mxu0  ;;  %v1163_v53 = vadd.f32 %v993_v4, %v7189_v31  ;;  %v5501_v15 = vpop.f32.mrb[81].mxu1 }
 0x193   : > { %v1292_v14 = vpop.f32.mrb[82].mxu0  ;;  %v996_v63 = vpop.f32.mrb[82].mxu1 }
 0x194   : > { %v1542_v16 = vsel %vm1504_vm3, %v1464_v25, %v1465_v23  ;;  %v1466_v3 = vrot.slane %v1292_v14, 1  ;;  %v5608_v37 = vpop.f32.mrb[83].mxu0  ;;  %v1164_v21 = vadd.f32 %v996_v63, %v7199_v49  ;;  %v5502_v47 = vpop.f32.mrb[83].mxu1  ;;  %v7477_v14 = vld [vmem:[%s6702_s7 + $0x38] sm:$0xff]  }
 0x195   : > { %v7451_v50 = vadd.f32 %v1542_v16, %v1160_v29 }
 0x196   : > { %v1541_v2 = vsel %vm1504_vm3, %v1465_v23, %v1466_v3  ;;  %5826 = vmatmul.mubr.msk.bf16.gmra.mrb[188].mxu0 %vm412_vm1, %v7456_v43  ;;  %5720 = vmatmul.mubr.msk.bf16.gmra.mrb[188].mxu1 %vm412_vm1, %v6808_v18 }
 0x197   : > { %5829 = vmatprep.mubr.msk.bf16.mxu0 %vm6604_vm0, %v9194_v13  ;;  %v7464_v31 = vadd.f32 %v1541_v2, %v1161_v6  ;;  %5723 = vmatprep.mubr.msk.bf16.mxu1 %vm6604_vm0, %v9194_v13 }
 0x199   : > { %v1297_v49 = vpop.f32.mrb[84].mxu0  ;;  %v1001_v29 = vpop.f32.mrb[84].mxu1 }
 0x19a   : > { %v1467_v12 = vrot.slane %v1297_v49, 1  ;;  %v5611_v61 = vpop.f32.mrb[85].mxu0  ;;  %v1165_v25 = vadd.f32 %v1001_v29, %v7213_v28  ;;  %v5505_v59 = vpop.f32.mrb[85].mxu1  ;;  %v6449_v28 = vld [vmem:[%s6702_s7 + $0x40] sm:$0xff]  }
 0x19b   : > { %v1300_v58 = vpop.f32.mrb[86].mxu0  ;;  %v1004_v10 = vpop.f32.mrb[86].mxu1 }
 0x19c   : > { %v1540_v18 = vsel %vm1504_vm3, %v1466_v3, %v1467_v12  ;;  %v1468_v51 = vrot.slane %v1300_v58, 1  ;;  %v5612_v6 = vpop.f32.mrb[87].mxu0  ;;  %v1166_v4 = vadd.f32 %v1004_v10, %v7223_v46  ;;  %v5506_v23 = vpop.f32.mrb[87].mxu1  ;;  %v6450_v10 = vld [vmem:[%s6702_s7 + $0x48] sm:$0xff]  }
 0x19d   : > { %v7472_v35 = vadd.f32 %v1540_v18, %v1162_v40 }
 0x19e   : > { %v1539_v15 = vsel %vm1504_vm3, %v1467_v12, %v1468_v51  ;;  %5830 = vmatmul.mubr.msk.bf16.gmra.mrb[192].mxu0 %vm412_vm1, %v7477_v14  ;;  %5724 = vmatmul.mubr.msk.bf16.gmra.mrb[192].mxu1 %vm412_vm1, %v6449_v28 }
 0x19f   : > { %5833 = vmatprep.mubr.msk.bf16.mxu0 %vm6604_vm0, %v9194_v13  ;;  %v7485_v16 = vadd.f32 %v1539_v15, %v1163_v53  ;;  %5727 = vmatprep.mubr.msk.bf16.mxu1 %vm6604_vm0, %v9194_v13 }
 0x1a1   : > { %v1305_v46 = vpop.f32.mrb[88].mxu0  ;;  %v1009_v40 = vpop.f32.mrb[88].mxu1 }
 0x1a2   : > { %v1469_v63 = vrot.slane %v1305_v46, 1  ;;  %v5615_v3 = vpop.f32.mrb[89].mxu0  ;;  %v1167_v37 = vadd.f32 %v1009_v40, %v7237_v41  ;;  %v5509_v47 = vpop.f32.mrb[89].mxu1 }
 0x1a3   : > { %v1308_v2 = vpop.f32.mrb[90].mxu0  ;;  %v1012_v29 = vpop.f32.mrb[90].mxu1 }
 0x1a4   : > { %v1538_v49 = vsel %vm1504_vm3, %v1468_v51, %v1469_v63  ;;  %v1470_v12 = vrot.slane %v1308_v2, 1  ;;  %v5616_v61 = vpop.f32.mrb[91].mxu0  ;;  %v1168_v53 = vadd.f32 %v1012_v29, %v7247_v7  ;;  %v5510_v59 = vpop.f32.mrb[91].mxu1  ;;  %v6451_v29 = vld [vmem:[%s6702_s7 + $0x50] sm:$0xff]  }
 0x1a5   : > { %v7493_v58 = vadd.f32 %v1538_v49, %v1164_v21 }
 0x1a6   : > { %v1537_v18 = vsel %vm1504_vm3, %v1469_v63, %v1470_v12  ;;  %5834 = vmatmul.mubr.msk.bf16.gmra.mrb[196].mxu0 %vm412_vm1, %v6449_v28  ;;  %5728 = vmatmul.mubr.msk.bf16.gmra.mrb[196].mxu1 %vm412_vm1, %v6450_v10 }
 0x1a7   : > { %5837 = vmatprep.mubr.msk.bf16.mxu0 %vm6604_vm0, %v9194_v13  ;;  %v7502_v41 = vadd.f32 %v1537_v18, %v1165_v25  ;;  %5731 = vmatprep.mubr.msk.bf16.mxu1 %vm6604_vm0, %v9194_v13 }
 0x1a9   : > { %v1313_v7 = vpop.f32.mrb[92].mxu0  ;;  %v1017_v21 = vpop.f32.mrb[92].mxu1 }
 0x1aa   : > { %v1471_v51 = vrot.slane %v1313_v7, 1  ;;  %v5619_v6 = vpop.f32.mrb[93].mxu0  ;;  %v1169_v23 = vadd.f32 %v1017_v21, %v7261_v55  ;;  %v5513_v15 = vpop.f32.mrb[93].mxu1 }
 0x1ab   : > { %v1316_v28 = vpop.f32.mrb[94].mxu0  ;;  %v1020_v40 = vpop.f32.mrb[94].mxu1 }
 0x1ac   : > { %v1536_v46 = vsel %vm1504_vm3, %v1470_v12, %v1471_v51  ;;  %v1472_v63 = vrot.slane %v1316_v28, 1  ;;  %v5620_v3 = vpop.f32.mrb[95].mxu0  ;;  %v1170_v25 = vadd.f32 %v1020_v40, %v7267_v33  ;;  %v5514_v47 = vpop.f32.mrb[95].mxu1  ;;  %v6452_v40 = vld [vmem:[%s6702_s7 + $0x58] sm:$0xff]  }
 0x1ad   : > { %v7510_v2 = vadd.f32 %v1536_v46, %v1166_v4 }
 0x1ae   : > { %v1535_v49 = vsel %vm1504_vm3, %v1471_v51, %v1472_v63  ;;  %5838 = vmatmul.mubr.msk.bf16.gmra.mrb[200].mxu0 %vm412_vm1, %v6450_v10  ;;  %5732 = vmatmul.mubr.msk.bf16.gmra.mrb[200].mxu1 %vm412_vm1, %v6451_v29 }
 0x1af   : > { %5841 = vmatprep.mubr.msk.bf16.mxu0 %vm6604_vm0, %v9194_v13  ;;  %v7519_v55 = vadd.f32 %v1535_v49, %v1167_v37  ;;  %5735 = vmatprep.mubr.msk.bf16.mxu1 %vm6604_vm0, %v9194_v13 }
 0x1b1   : > { %v1321_v33 = vpop.f32.mrb[96].mxu0  ;;  %v1025_v4 = vpop.f32.mrb[96].mxu1 }
 0x1b2   : > { %v1473_v12 = vrot.slane %v1321_v33, 1  ;;  %v5623_v61 = vpop.f32.mrb[97].mxu0  ;;  %v1171_v59 = vadd.f32 %v1025_v4, %v7277_v19  ;;  %v5517_v18 = vpop.f32.mrb[97].mxu1 }
 0x1b3   : > { %v1324_v10 = vpop.f32.mrb[98].mxu0  ;;  %v1028_v21 = vpop.f32.mrb[98].mxu1 }
 0x1b4   : > { %v1534_v7 = vsel %vm1504_vm3, %v1472_v63, %v1473_v12  ;;  %v1474_v51 = vrot.slane %v1324_v10, 1  ;;  %v5624_v6 = vpop.f32.mrb[99].mxu0  ;;  %v1172_v37 = vadd.f32 %v1028_v21, %v7283_v20  ;;  %v5518_v15 = vpop.f32.mrb[99].mxu1  ;;  %v6453_v21 = vld [vmem:[%s6702_s7 + $0x60] sm:$0xff]  }
 0x1b5   : > { %v7527_v28 = vadd.f32 %v1534_v7, %v1168_v53 }
 0x1b6   : > { %v1533_v46 = vsel %vm1504_vm3, %v1473_v12, %v1474_v51  ;;  %5842 = vmatmul.mubr.msk.bf16.gmra.mrb[204].mxu0 %vm412_vm1, %v6451_v29  ;;  %5736 = vmatmul.mubr.msk.bf16.gmra.mrb[204].mxu1 %vm412_vm1, %v6452_v40 }
 0x1b7   : > { %5845 = vmatprep.mubr.msk.bf16.mxu0 %vm6604_vm0, %v9194_v13  ;;  %v7536_v19 = vadd.f32 %v1533_v46, %v1169_v23  ;;  %5739 = vmatprep.mubr.msk.bf16.mxu1 %vm6604_vm0, %v9194_v13 }
 0x1b9   : > { %v1329_v20 = vpop.f32.mrb[100].mxu0  ;;  %v1033_v53 = vpop.f32.mrb[100].mxu1 }
 0x1ba   : > { %v1475_v63 = vrot.slane %v1329_v20, 1  ;;  %v5627_v3 = vpop.f32.mrb[101].mxu0  ;;  %v1173_v47 = vadd.f32 %v1033_v53, %v7293_v24  ;;  %v5521_v49 = vpop.f32.mrb[101].mxu1 }
 0x1bb   : > { %v1332_v29 = vpop.f32.mrb[102].mxu0  ;;  %v1036_v4 = vpop.f32.mrb[102].mxu1 }
 0x1bc   : > { %v1532_v33 = vsel %vm1504_vm3, %v1474_v51, %v1475_v63  ;;  %v1476_v12 = vrot.slane %v1332_v29, 1  ;;  %v5628_v61 = vpop.f32.mrb[103].mxu0  ;;  %v1174_v23 = vadd.f32 %v1036_v4, %v7299_v1  ;;  %v5522_v18 = vpop.f32.mrb[103].mxu1  ;;  %v6454_v4 = vld [vmem:[%s6702_s7 + $0x68] sm:$0xff]  }
 0x1bd   : > { %v7544_v10 = vadd.f32 %v1532_v33, %v1170_v25 }
 0x1be   : > { %v1531_v7 = vsel %vm1504_vm3, %v1475_v63, %v1476_v12  ;;  %5846 = vmatmul.mubr.msk.bf16.gmra.mrb[208].mxu0 %vm412_vm1, %v6452_v40  ;;  %5740 = vmatmul.mubr.msk.bf16.gmra.mrb[208].mxu1 %vm412_vm1, %v6453_v21 }
 0x1bf   : > { %5849 = vmatprep.mubr.msk.bf16.mxu0 %vm6604_vm0, %v9194_v13  ;;  %v7553_v24 = vadd.f32 %v1531_v7, %v1171_v59  ;;  %5743 = vmatprep.mubr.msk.bf16.mxu1 %vm6604_vm0, %v9194_v13 }
 0x1c1   : > { %v1337_v1 = vpop.f32.mrb[104].mxu0  ;;  %v1041_v25 = vpop.f32.mrb[104].mxu1 }
 0x1c2   : > { %v1477_v51 = vrot.slane %v1337_v1, 1  ;;  %v5631_v6 = vpop.f32.mrb[105].mxu0  ;;  %v1175_v15 = vadd.f32 %v1041_v25, %v7316_v26  ;;  %v5525_v46 = vpop.f32.mrb[105].mxu1 }
 0x1c3   : > { %v1340_v40 = vpop.f32.mrb[106].mxu0  ;;  %v1044_v53 = vpop.f32.mrb[106].mxu1 }
 0x1c4   : > { %v1530_v20 = vsel %vm1504_vm3, %v1476_v12, %v1477_v51  ;;  %v1478_v63 = vrot.slane %v1340_v40, 1  ;;  %v5632_v3 = vpop.f32.mrb[107].mxu0  ;;  %v1176_v59 = vadd.f32 %v1044_v53, %v7323_v39  ;;  %v5526_v49 = vpop.f32.mrb[107].mxu1  ;;  %v6455_v53 = vld [vmem:[%s6702_s7 + $0x70] sm:$0xff]  }
 0x1c5   : > { %v7561_v29 = vadd.f32 %v1530_v20, %v1172_v37 }
 0x1c6   : > { %v1529_v33 = vsel %vm1504_vm3, %v1477_v51, %v1478_v63  ;;  %5850 = vmatmul.mubr.msk.bf16.gmra.mrb[212].mxu0 %vm412_vm1, %v6453_v21  ;;  %5744 = vmatmul.mubr.msk.bf16.gmra.mrb[212].mxu1 %vm412_vm1, %v6454_v4 }
 0x1c7   : > { %5853 = vmatprep.mubr.msk.bf16.mxu0 %vm6604_vm0, %v9194_v13  ;;  %v7570_v26 = vadd.f32 %v1529_v33, %v1173_v47  ;;  %5747 = vmatprep.mubr.msk.bf16.mxu1 %vm6604_vm0, %v9194_v13 }
 0x1c9   : > { %v1345_v39 = vpop.f32.mrb[108].mxu0  ;;  %v1049_v37 = vpop.f32.mrb[108].mxu1 }
 0x1ca   : > { %v1479_v12 = vrot.slane %v1345_v39, 1  ;;  %v5635_v61 = vpop.f32.mrb[109].mxu0  ;;  %v1177_v18 = vadd.f32 %v1049_v37, %v7329_v22  ;;  %v5529_v7 = vpop.f32.mrb[109].mxu1 }
 0x1cb   : > { %v1348_v21 = vpop.f32.mrb[110].mxu0  ;;  %v1052_v25 = vpop.f32.mrb[110].mxu1 }
 0x1cc   : > { %v1528_v1 = vsel %vm1504_vm3, %v1478_v63, %v1479_v12  ;;  %v1480_v51 = vrot.slane %v1348_v21, 1  ;;  %v5636_v6 = vpop.f32.mrb[111].mxu0  ;;  %v1178_v47 = vadd.f32 %v1052_v25, %v7039_v48  ;;  %v5530_v46 = vpop.f32.mrb[111].mxu1  ;;  %v6456_v25 = vld [vmem:[%s6702_s7 + $0x78] sm:$0xff]  }
 0x1cd   : > { %v7578_v40 = vadd.f32 %v1528_v1, %v1174_v23 }
 0x1ce   : > { %v1527_v20 = vsel %vm1504_vm3, %v1479_v12, %v1480_v51  ;;  %5854 = vmatmul.mubr.msk.bf16.gmra.mrb[216].mxu0 %vm412_vm1, %v6454_v4  ;;  %5748 = vmatmul.mubr.msk.bf16.gmra.mrb[216].mxu1 %vm412_vm1, %v6455_v53 }
 0x1cf   : > { %5857 = vmatprep.mubr.msk.bf16.mxu0 %vm6604_vm0, %v9194_v13  ;;  %v7587_v22 = vadd.f32 %v1527_v20, %v1175_v15  ;;  %5751 = vmatprep.mubr.msk.bf16.mxu1 %vm6604_vm0, %v9194_v13 }
 0x1d1   : > { %v1353_v48 = vpop.f32.mrb[112].mxu0  ;;  %v1057_v23 = vpop.f32.mrb[112].mxu1 }
 0x1d2   : > { %v1481_v63 = vrot.slane %v1353_v48, 1  ;;  %v5639_v3 = vpop.f32.mrb[113].mxu0  ;;  %v1179_v49 = vadd.f32 %v1057_v23, %v7049_v62  ;;  %v5533_v33 = vpop.f32.mrb[113].mxu1 }
 0x1d3   : > { %v1356_v4 = vpop.f32.mrb[114].mxu0  ;;  %v1060_v37 = vpop.f32.mrb[114].mxu1 }
 0x1d4   : > { %v1526_v39 = vsel %vm1504_vm3, %v1480_v51, %v1481_v63  ;;  %v1482_v12 = vrot.slane %v1356_v4, 1  ;;  %v5640_v61 = vpop.f32.mrb[115].mxu0  ;;  %v1180_v15 = vadd.f32 %v1060_v37, %v7063_v0  ;;  %v5534_v7 = vpop.f32.mrb[115].mxu1  ;;  %v6457_v37 = vld [vmem:[%s6702_s7 + $0x80] sm:$0xff]  }
 0x1d5   : > { %v7595_v21 = vadd.f32 %v1526_v39, %v1176_v59 }
 0x1d6   : > { %v1525_v1 = vsel %vm1504_vm3, %v1481_v63, %v1482_v12  ;;  %5858 = vmatmul.mubr.msk.bf16.gmra.mrb[220].mxu0 %vm412_vm1, %v6455_v53  ;;  %5752 = vmatmul.mubr.msk.bf16.gmra.mrb[220].mxu1 %vm412_vm1, %v6456_v25 }
 0x1d7   : > { %5861 = vmatprep.mubr.msk.bf16.mxu0 %vm6604_vm0, %v9194_v13  ;;  %v7604_v62 = vadd.f32 %v1525_v1, %v1177_v18  ;;  %5755 = vmatprep.mubr.msk.bf16.mxu1 %vm6604_vm0, %v9194_v13 }
 0x1d9   : > { %v1361_v0 = vpop.f32.mrb[116].mxu0  ;;  %v1065_v59 = vpop.f32.mrb[116].mxu1 }
 0x1da   : > { %v1483_v51 = vrot.slane %v1361_v0, 1  ;;  %v5643_v6 = vpop.f32.mrb[117].mxu0  ;;  %v1181_v46 = vadd.f32 %v1065_v59, %v7073_v38  ;;  %v5537_v20 = vpop.f32.mrb[117].mxu1 }
 0x1db   : > { %v1364_v53 = vpop.f32.mrb[118].mxu0  ;;  %v1068_v23 = vpop.f32.mrb[118].mxu1 }
 0x1dc   : > { %v1524_v48 = vsel %vm1504_vm3, %v1482_v12, %v1483_v51  ;;  %v1484_v63 = vrot.slane %v1364_v53, 1  ;;  %v5644_v3 = vpop.f32.mrb[119].mxu0  ;;  %v1182_v18 = vadd.f32 %v1068_v23, %v7087_v42  ;;  %v5538_v33 = vpop.f32.mrb[119].mxu1  ;;  %v6458_v23 = vld [vmem:[%s6702_s7 + $0x88] sm:$0xff]  }
 0x1dd   : > { %v7612_v4 = vadd.f32 %v1524_v48, %v1178_v47 }
 0x1de   : > { %v1523_v39 = vsel %vm1504_vm3, %v1483_v51, %v1484_v63  ;;  %5862 = vmatmul.mubr.msk.bf16.gmra.mrb[224].mxu0 %vm412_vm1, %v6456_v25  ;;  %5756 = vmatmul.mubr.msk.bf16.gmra.mrb[224].mxu1 %vm412_vm1, %v6457_v37 }
 0x1df   : > { %5865 = vmatprep.mubr.msk.bf16.mxu0 %vm6604_vm0, %v9194_v13  ;;  %v7621_v38 = vadd.f32 %v1523_v39, %v1179_v49  ;;  %5759 = vmatprep.mubr.msk.bf16.mxu1 %vm6604_vm0, %v9194_v13 }
 0x1e1   : > { %v1369_v42 = vpop.f32.mrb[120].mxu0  ;;  %v1073_v47 = vpop.f32.mrb[120].mxu1 }
 0x1e2   : > { %v1485_v12 = vrot.slane %v1369_v42, 1  ;;  %v5647_v61 = vpop.f32.mrb[121].mxu0  ;;  %v1183_v7 = vadd.f32 %v1073_v47, %v7097_v57  ;;  %v5541_v1 = vpop.f32.mrb[121].mxu1 }
 0x1e3   : > { %v1372_v25 = vpop.f32.mrb[122].mxu0  ;;  %v1076_v0 = vpop.f32.mrb[122].mxu1 }
 0x1e4   : > { %v1486_v59 = vrot.slane %v1372_v25, 1  ;;  %v5648_v51 = vpop.f32.mrb[123].mxu0  ;;  %v1522_v6 = vsel %vm1504_vm3, %v1484_v63, %v1485_v12  ;;  %v1184_v49 = vadd.f32 %v1076_v0, %v7111_v60  ;;  %v5542_v20 = vpop.f32.mrb[123].mxu1 }
 0x1e5   : > { %v7629_v53 = vadd.f32 %v1522_v6, %v1180_v15  ;;  %v6459_v51 = vld [vmem:[%s6702_s7 + $0x90] sm:$0xff]  }
 0x1e6   : > { %5866 = vmatmul.mubr.msk.bf16.gmra.mrb[228].mxu0 %vm412_vm1, %v6457_v37  ;;  %v1521_v48 = vsel %vm1504_vm3, %v1485_v12, %v1486_v59  ;;  %5760 = vmatmul.mubr.msk.bf16.gmra.mrb[228].mxu1 %vm412_vm1, %v6458_v23 }
 0x1e7   : > { %5869 = vmatprep.mubr.msk.bf16.mxu0 %vm6604_vm0, %v9194_v13  ;;  %v7638_v57 = vadd.f32 %v1521_v48, %v1181_v46  ;;  %5763 = vmatprep.mubr.msk.bf16.mxu1 %vm6604_vm0, %v9194_v13 }
 0x1e9   : > { %v1377_v60 = vpop.f32.mrb[124].mxu0  ;;  %v1081_v15 = vpop.f32.mrb[124].mxu1 }
 0x1ea   : > { %v1487_v63 = vrot.slane %v1377_v60, 1  ;;  %v5651_v3 = vpop.f32.mrb[125].mxu0  ;;  %v1185_v33 = vadd.f32 %v1081_v15, %v7121_v36  ;;  %v5545_v39 = vpop.f32.mrb[125].mxu1 }
 0x1eb   : > { %v1380_v37 = vpop.f32.mrb[126].mxu0  ;;  %v1084_v42 = vpop.f32.mrb[126].mxu1 }
 0x1ec   : > { %v1488_v47 = vrot.slane %v1380_v37, 1  ;;  %v5652_v12 = vpop.f32.mrb[127].mxu0  ;;  %v1520_v61 = vsel %vm1504_vm3, %v1486_v59, %v1487_v63  ;;  %v1186_v46 = vadd.f32 %v1084_v42, %v7135_v44  ;;  %v5546_v1 = vpop.f32.mrb[127].mxu1 }
 0x1ed   : > { %v7646_v25 = vadd.f32 %v1520_v61, %v1182_v18  ;;  %v6460_v12 = vld [vmem:[%s6702_s7 + $0x98] sm:$0xff]  }
 0x1ee   : > { %5870 = vmatmul.mubr.msk.bf16.gmra.mrb[232].mxu0 %vm412_vm1, %v6458_v23  ;;  %v1519_v0 = vsel %vm1504_vm3, %v1487_v63, %v1488_v47  ;;  %5764 = vmatmul.mubr.msk.bf16.gmra.mrb[232].mxu1 %vm412_vm1, %v6459_v51  ;;  %v9197_v1 = vld [vmem:[#allocation5_spill] sm:$0xff] }
 0x1ef   : > { %5873 = vmatprep.mubr.msk.bf16.mxu0 %vm6604_vm0, %v9194_v13  ;;  %v7655_v36 = vadd.f32 %v1519_v0, %v1183_v7  ;;  %5767 = vmatprep.mubr.msk.bf16.mxu1 %vm6604_vm0, %v9194_v13 }
 0x1f1   : > { %v1385_v44 = vpop.f32.mrb[128].mxu0  ;;  %v1089_v18 = vpop.f32.mrb[128].mxu1 }
 0x1f2   : > { %v1489_v59 = vrot.slane %v1385_v44, 1  ;;  %v5655_v6 = vpop.f32.mrb[129].mxu0  ;;  %v1187_v20 = vadd.f32 %v1089_v18, %v7145_v9  ;;  %v5549_v48 = vpop.f32.mrb[129].mxu1 }
 0x1f3   : > { %v1388_v23 = vpop.f32.mrb[130].mxu0  ;;  %v1092_v60 = vpop.f32.mrb[130].mxu1 }
 0x1f4   : > { %v1490_v15 = vrot.slane %v1388_v23, 1  ;;  %v5656_v63 = vpop.f32.mrb[131].mxu0  ;;  %v1518_v3 = vsel %vm1504_vm3, %v1488_v47, %v1489_v59  ;;  %v1188_v7 = vadd.f32 %v1092_v60, %v7159_v5  ;;  %v5550_v39 = vpop.f32.mrb[131].mxu1 }
 0x1f5   : > { %v7663_v37 = vadd.f32 %v1518_v3, %v1184_v49  ;;  %v6461_v39 = vld [vmem:[%s6702_s7 + $0xa0] sm:$0xff]  }
 0x1f6   : > { %5874 = vmatmul.mubr.msk.bf16.gmra.mrb[236].mxu0 %vm412_vm1, %v6459_v51  ;;  %v1517_v42 = vsel %vm1504_vm3, %v1489_v59, %v1490_v15  ;;  %5768 = vmatmul.mubr.msk.bf16.gmra.mrb[236].mxu1 %vm412_vm1, %v6460_v12 }
 0x1f7   : > { %5877 = vmatprep.mubr.msk.bf16.mxu0 %vm6604_vm0, %v9194_v13  ;;  %v7672_v9 = vadd.f32 %v1517_v42, %v1185_v33  ;;  %5771 = vmatprep.mubr.msk.bf16.mxu1 %vm6604_vm0, %v9194_v13  ;;  %v9198_v33 = vld [vmem:[#allocation6_spill] sm:$0xff] }
 0x1f9   : > { %v1393_v5 = vpop.f32.mrb[132].mxu0  ;;  %v1097_v49 = vpop.f32.mrb[132].mxu1 }
 0x1fa   : > { %v1491_v47 = vrot.slane %v1393_v5, 1  ;;  %v5659_v61 = vpop.f32.mrb[133].mxu0  ;;  %v1189_v0 = vadd.f32 %v1097_v49, %v9197_v1  ;;  %v5553_v51 = vpop.f32.mrb[133].mxu1 }
 0x1fb   : > { %v1396_v44 = vpop.f32.mrb[134].mxu0  ;;  %v1100_v18 = vpop.f32.mrb[134].mxu1 }
 0x1fc   : > { %v1492_v59 = vrot.slane %v1396_v44, 1  ;;  %v5660_v6 = vpop.f32.mrb[135].mxu0  ;;  %v1516_v48 = vsel %vm1504_vm3, %v1490_v15, %v1491_v47  ;;  %v1190_v23 = vadd.f32 %v1100_v18, %v9198_v33  ;;  %v5554_v60 = vpop.f32.mrb[135].mxu1 }
 0x1fd   : > { %v7680_v63 = vadd.f32 %v1516_v48, %v1186_v46 }
 0x1fe   : > { %5878 = vmatmul.mubr.msk.bf16.gmra.mrb[240].mxu0 %vm412_vm1, %v6460_v12  ;;  %v1515_v3 = vsel %vm1504_vm3, %v1491_v47, %v1492_v59  ;;  %5772 = vmatmul.mubr.msk.bf16.gmra.mrb[240].mxu1 %vm412_vm1, %v6461_v39  ;;  %v9199_v12 = vld [vmem:[#allocation7_spill] sm:$0xff] }
 0x1ff   : > { %5881 = vmatprep.mubr.msk.bf16.mxu0 %vm6604_vm0, %v9194_v13  ;;  %v7689_v42 = vadd.f32 %v1515_v3, %v1187_v20  ;;  %5775 = vmatprep.mubr.msk.bf16.mxu1 %vm6604_vm0, %v9194_v13  ;;  %v9200_v20 = vld [vmem:[#allocation8_spill] sm:$0xff] }
 0x201   : > { %v1401_v15 = vpop.f32.mrb[136].mxu0  ;;  %v1105_v46 = vpop.f32.mrb[136].mxu1 }
 0x202   : > { %v1493_v5 = vrot.slane %v1401_v15, 1  ;;  %v5663_v49 = vpop.f32.mrb[137].mxu0  ;;  %v1191_v61 = vadd.f32 %v1105_v46, %v9199_v12  ;;  %v5557_v1 = vpop.f32.mrb[137].mxu1  ;;  %v6462_v15 = vld [vmem:[%s6702_s7 + $0xa8] sm:$0xff]  }
 0x203   : > { %v1404_v47 = vpop.f32.mrb[138].mxu0  ;;  %v1108_v51 = vpop.f32.mrb[138].mxu1 }
 0x204   : > { %v1494_v44 = vrot.slane %v1404_v47, 1  ;;  %v5664_v18 = vpop.f32.mrb[139].mxu0  ;;  %v1514_v6 = vsel %vm1504_vm3, %v1492_v59, %v1493_v5  ;;  %v1192_v48 = vadd.f32 %v1108_v51, %v9200_v20  ;;  %v5558_v33 = vpop.f32.mrb[139].mxu1 }
 0x205   : > { %v7697_v60 = vadd.f32 %v1514_v6, %v1188_v7 }
 0x206   : > { %5882 = vmatmul.mubr.msk.bf16.gmra.mrb[244].mxu0 %vm412_vm1, %v6461_v39  ;;  %v1513_v3 = vsel %vm1504_vm3, %v1493_v5, %v1494_v44  ;;  %5776 = vmatmul.mubr.msk.bf16.gmra.mrb[244].mxu1 %vm412_vm1, %v6462_v15  ;;  %v9202_v39 = vld [vmem:[#allocation9_spill] sm:$0xff] }
 0x207   : > { %5885 = vmatprep.mubr.msk.bf16.mxu0 %vm6604_vm0, %v9194_v13  ;;  %v7706_v46 = vadd.f32 %v1513_v3, %v1189_v0  ;;  %5779 = vmatprep.mubr.msk.bf16.mxu1 %vm6604_vm0, %v9194_v13  ;;  %v9203_v0 = vld [vmem:[#allocation10_spill] sm:$0xff] }
 0x209   : > { %9201 = vst [vmem:[#allocation5_spill] sm:$0xff] %v7706_v46  ;;  %v1409_v59 = vpop.f32.mrb[140].mxu0  ;;  %v1113_v7 = vpop.f32.mrb[140].mxu1 }
 0x20a   : > { %v1495_v49 = vrot.slane %v1409_v59, 1  ;;  %v5667_v12 = vpop.f32.mrb[141].mxu0  ;;  %v1193_v1 = vadd.f32 %v1113_v7, %v9202_v39  ;;  %v5561_v47 = vpop.f32.mrb[141].mxu1 }
 0x20b   : > { %v1412_v5 = vpop.f32.mrb[142].mxu0  ;;  %v1116_v51 = vpop.f32.mrb[142].mxu1  ;;  %v6463_v12 = vld [vmem:[%s6702_s7 + $0xb0] sm:$0xff]  }
 0x20c   : > { %v1496_v18 = vrot.slane %v1412_v5, 1  ;;  %v5668_v6 = vpop.f32.mrb[143].mxu0  ;;  %v1512_v20 = vsel %vm1504_vm3, %v1494_v44, %v1495_v49  ;;  %v1194_v33 = vadd.f32 %v1116_v51, %v9203_v0  ;;  %v5562_v3 = vpop.f32.mrb[143].mxu1 }
 0x20d   : > { %v7714_v46 = vadd.f32 %v1512_v20, %v1190_v23 }
 0x20e   : > { %5886 = vmatmul.mubr.msk.bf16.gmra.mrb[248].mxu0 %vm412_vm1, %v6462_v15  ;;  %v1511_v59 = vsel %vm1504_vm3, %v1495_v49, %v1496_v18  ;;  %5780 = vmatmul.mubr.msk.bf16.gmra.mrb[248].mxu1 %vm412_vm1, %v6463_v12  ;;  %v9206_v15 = vld [vmem:[#allocation11_spill] sm:$0xff] }
 0x20f   : > { %9204 = vst [vmem:[#allocation6_spill] sm:$0xff] %v7714_v46  ;;  %5889 = vmatprep.mubr.msk.bf16.mxu0 %vm6604_vm0, %v9194_v13  ;;  %v7723_v7 = vadd.f32 %v1511_v59, %v1191_v61  ;;  %5783 = vmatprep.mubr.msk.bf16.mxu1 %vm6604_vm0, %v9194_v13  ;;  %v9207_v61 = vld [vmem:[#allocation12_spill] sm:$0xff] }
 0x211   : > { %9205 = vst [vmem:[#allocation7_spill] sm:$0xff] %v7723_v7  ;;  %v1417_v44 = vpop.f32.mrb[144].mxu0  ;;  %v1121_v23 = vpop.f32.mrb[144].mxu1 }
 0x212   : > { %v1497_v39 = vrot.slane %v1417_v44, 1  ;;  %v5671_v47 = vpop.f32.mrb[145].mxu0  ;;  %v1195_v5 = vadd.f32 %v1121_v23, %v9206_v15  ;;  %v5565_v51 = vpop.f32.mrb[145].mxu1 }
 0x213   : > { %v1420_v49 = vpop.f32.mrb[146].mxu0  ;;  %v1124_v6 = vpop.f32.mrb[146].mxu1  ;;  %v6464_v47 = vld [vmem:[%s6702_s7 + $0xb8] sm:$0xff]  }
 0x214   : > { %v1498_v20 = vrot.slane %v1420_v49, 1  ;;  %v5672_v0 = vpop.f32.mrb[147].mxu0  ;;  %v1510_v3 = vsel %vm1504_vm3, %v1496_v18, %v1497_v39  ;;  %v1196_v59 = vadd.f32 %v1124_v6, %v9207_v61  ;;  %v5566_v7 = vpop.f32.mrb[147].mxu1 }
 0x215   : > { %v7731_v46 = vadd.f32 %v1510_v3, %v1192_v48 }
 0x216   : > { %5890 = vmatmul.mubr.msk.bf16.gmra.mrb[252].mxu0 %vm412_vm1, %v6463_v12  ;;  %v1509_v44 = vsel %vm1504_vm3, %v1497_v39, %v1498_v20  ;;  %5784 = vmatmul.mubr.msk.bf16.gmra.mrb[252].mxu1 %vm412_vm1, %v6464_v47 }
 0x217   : > { %5893 = vmatprep.mubr.msk.bf16.mxu0 %vm6604_vm0, %v9194_v13  ;;  %v7740_v23 = vadd.f32 %v1509_v44, %v1193_v1  ;;  %5787 = vmatprep.mubr.msk.bf16.mxu1 %vm6604_vm0, %v9194_v13  ;;  %v6465_v44 = vld [vmem:[%s6702_s7 + $0xc0] sm:$0xff]  }
 0x219   : > { %v1425_v18 = vpop.f32.mrb[148].mxu0  ;;  %v1129_v15 = vpop.f32.mrb[148].mxu1 }
 0x21a   : > { %v1499_v48 = vrot.slane %v1425_v18, 1  ;;  %v5675_v7 = vpop.f32.mrb[149].mxu0  ;;  %v5569_v51 = vpop.f32.mrb[149].mxu1 }
 0x21b   : > { %v1428_v12 = vpop.f32.mrb[150].mxu0  ;;  %v1132_v6 = vpop.f32.mrb[150].mxu1 }
 0x21c   : > { %v1500_v49 = vrot.slane %v1428_v12, 1  ;;  %v5676_v39 = vpop.f32.mrb[151].mxu0  ;;  %v1508_v0 = vsel %vm1504_vm3, %v1498_v20, %v1499_v48  ;;  %v5570_v3 = vpop.f32.mrb[151].mxu1 }
 0x21d   : > { %v7746_v61 = vadd.f32 %v1508_v0, %v1194_v33 }
 0x21e   : > { %5894 = vmatmul.mubr.msk.bf16.gmra.mrb[0].mxu0 %vm412_vm1, %v6464_v47  ;;  %v1507_v1 = vsel %vm1504_vm3, %v1499_v48, %v1500_v49  ;;  %5788 = vmatmul.mubr.msk.bf16.gmra.mrb[0].mxu1 %vm412_vm1, %v6465_v44 }
 0x21f   : > { %5897 = vmatprep.mubr.msk.bf16.mxu0 %vm6604_vm0, %v9194_v13  ;;  %v7755_v18 = vadd.f32 %v1507_v1, %v1195_v5  ;;  %5791 = vmatprep.mubr.msk.bf16.mxu1 %vm6604_vm0, %v9194_v13  ;;  %v6466_v5 = vld [vmem:[%s6702_s7 + $0xc8] sm:$0xff]  }
 0x221   : > { %v1433_v20 = vpop.f32.mrb[152].mxu0  ;;  %v1136_v15 = vpop.f32.mrb[152].mxu1 }
 0x222   : > { %v1501_v33 = vrot.slane %v1433_v20, 1  ;;  %v5679_v7 = vpop.f32.mrb[153].mxu0  ;;  %v5573_v12 = vpop.f32.mrb[153].mxu1 }
 0x223   : > { %v1436_v47 = vpop.f32.mrb[154].mxu0  ;;  %v1138_v48 = vpop.f32.mrb[154].mxu1 }
 0x224   : > { %v5680_v51 = vpop.f32.mrb[155].mxu0  ;;  %v1506_v39 = vsel %vm1504_vm3, %v1500_v49, %v1501_v33  ;;  %v5574_v6 = vpop.f32.mrb[155].mxu1 }
 0x225   : > { %v7761_v0 = vadd.f32 %v1506_v39, %v1196_v59 }
 0x226   : > { %5898 = vmatmul.mubr.msk.bf16.gmra.mrb[4].mxu0 %vm412_vm1, %v6465_v44  ;;  %5792 = vmatmul.mubr.msk.bf16.gmra.mrb[4].mxu1 %vm412_vm1, %v6466_v5  ;;  %v6467_v44 = vld [vmem:[%s6702_s7 + $0xd0] sm:$0xff]  }
 0x227   : > { %9208 = vst [vmem:[#allocation8_spill] sm:$0xff] %v7761_v0  ;;  %5901 = vmatprep.mubr.msk.bf16.mxu0 %vm6604_vm0, %v9194_v13  ;;  %5795 = vmatprep.mubr.msk.bf16.mxu1 %vm6604_vm0, %v9194_v13  ;;  %v6470_v0 = vld [vmem:[%s6702_s7 + $0x10] sm:$0xff]  }
 0x229   : > { %v1441_v3 = vpop.f32.mrb[156].mxu0  ;;  %v1142_v20 = vpop.f32.mrb[156].mxu1 }
 0x22a   : > { %v5683_v1 = vpop.f32.mrb[157].mxu0  ;;  %v5577_v49 = vpop.f32.mrb[157].mxu1  ;;  %v6468_v20 = vld [vmem:[%s6702_s7] sm:$0xff]  }
 0x22b   : > { %v1443_v7 = vpop.f32.mrb[158].mxu0  ;;  %v1144_v15 = vpop.f32.mrb[158].mxu1 }
 0x22c   : > { %v5684_v33 = vpop.f32.mrb[159].mxu0  ;;  %v5578_v59 = vpop.f32.mrb[159].mxu1 }
 0x22e   : > { %5902 = vmatmul.mubr.msk.bf16.gmra.mrb[8].mxu0 %vm412_vm1, %v6466_v5  ;;  %5796 = vmatmul.mubr.msk.bf16.gmra.mrb[8].mxu1 %vm412_vm1, %v6467_v44  ;;  %v6446_v5 = vld [vmem:[%s9176_s1 + $0x38] sm:$0xff]  }
 0x22f   : > { %5905 = vmatprep.mubr.msk.bf16.mxu0 %vm6604_vm0, %v9194_v13  ;;  %5911 = vmatprep.mubr.msk.bf16.mxu1 %vm6604_vm0, %v9194_v13 }
 0x231   : > { %v1447_v47 = vpop.f32.mrb[160].mxu0  ;;  %v1648_v51 = vpop.f32.mrb[160].mxu1 }
 0x232   : > { %v5687_v12 = vpop.f32.mrb[161].mxu0  ;;  %v5693_v39 = vpop.f32.mrb[161].mxu1 }
 0x233   : > { %v1449_v48 = vpop.f32.mrb[162].mxu0  ;;  %v1650_v3 = vpop.f32.mrb[162].mxu1 }
 0x234   : > { %v5688_v6 = vpop.f32.mrb[163].mxu0  ;;  %v5694_v1 = vpop.f32.mrb[163].mxu1 }
 0x235   : > { %v6469_v6 = vld [vmem:[%s6702_s7 + $0x8] sm:$0xff]  }
 0x236   : > { %5906 = vmatmul.mubr.msk.bf16.gmra.mrb[12].mxu0 %vm412_vm1, %v6467_v44  ;;  %5912 = vmatmul.mubr.msk.bf16.vlgmr.msra.gmra.mrb[12].mxu1 %vm412_vm1, %v6468_v20  ;;  %v6445_v44 = vld [vmem:[%s9176_s1 + $0x40] sm:$0xff]  }
 0x237   : > { %6021 = vmatprep.mubr.msk.bf16.mxu0 %vm6604_vm0, %v9194_v13  ;;  %5915 = vmatprep.mubr.msk.bf16.mxu1 %vm6604_vm0, %v9194_v13 }
 0x238   : > { %6130 = vmatpush3.bf16.msra.mxu1 %v6446_v5  ;;  %v9209_v5 = vld [vmem:[#allocation13_spill] sm:$0xff] }
 0x239   : > { %v2054_v7 = vpop.f32.mrb[164].mxu0  ;;  %v1655_v49 = vpop.f32.mrb[164].mxu1 }
 0x23a   : > { %v5803_v33 = vpop.f32.mrb[165].mxu0  ;;  %v1861_v15 = vrot.slane %v1655_v49, 7  ;;  %v5697_v59 = vpop.f32.mrb[165].mxu1 }
 0x23b   : > { %v2056_v47 = vpop.f32.mrb[166].mxu0  ;;  %v1658_v12 = vpop.f32.mrb[166].mxu1 }
 0x23c   : > { %v5804_v51 = vpop.f32.mrb[167].mxu0  ;;  %v1862_v48 = vrot.slane %v1658_v12, 7  ;;  %v5698_v39 = vpop.f32.mrb[167].mxu1 }
 0x23e   : > { %6022 = vmatmul.mubr.msk.bf16.vlgmr.msra.gmra.mrb[16].mxu0 %vm412_vm1, %v6468_v20  ;;  %5916 = vmatmul.mubr.msk.bf16.gmra.mrb[16].mxu1 %vm412_vm1, %v6469_v6  ;;  %v1959_v3 = vsel %vm793_vm2, %v1861_v15, %v1862_v48 }
 0x23f   : > { %6240 = vmatpush3.bf16.msra.mxu0 %v6445_v44  ;;  %v1962_v1 = vadd.f32 %v1959_v3, %v9209_v5  ;;  %5919 = vmatprep.mubr.msk.bf16.mxu1 %vm6604_vm0, %v9194_v13 }
 0x240   : > { %6025 = vmatprep.mubr.msk.bf16.mxu0 %vm6604_vm0, %v9194_v13 }
 0x241   : > { %v2060_v7 = vpop.f32.mrb[168].mxu0  ;;  %v1663_v49 = vpop.f32.mrb[168].mxu1 }
 0x242   : > { %v5807_v33 = vpop.f32.mrb[169].mxu0  ;;  %v1863_v20 = vrot.slane %v1663_v49, 7  ;;  %v5701_v59 = vpop.f32.mrb[169].mxu1 }
 0x243   : > { %v2063_v47 = vpop.f32.mrb[170].mxu0  ;;  %v1666_v12 = vpop.f32.mrb[170].mxu1 }
 0x244   : > { %v7800_v44 = vadd.f32 %v2063_v47, %v1962_v1  ;;  %v5808_v51 = vpop.f32.mrb[171].mxu0  ;;  %v1864_v15 = vrot.slane %v1666_v12, 7  ;;  %v5702_v39 = vpop.f32.mrb[171].mxu1  ;;  %v1958_v3 = vsel %vm793_vm2, %v1862_v48, %v1863_v20 }
 0x245   : > { %v1963_v5 = vadd.f32 %v1958_v3, %v7361_v52 }
 0x246   : > { %9210 = vst [vmem:[#allocation9_spill] sm:$0xff] %v7800_v44  ;;  %6026 = vmatmul.mubr.msk.bf16.gmra.mrb[20].mxu0 %vm412_vm1, %v6469_v6  ;;  %5920 = vmatmul.mubr.msk.bf16.gmra.mrb[20].mxu1 %vm412_vm1, %v6470_v0  ;;  %v1957_v7 = vsel %vm793_vm2, %v1863_v20, %v1864_v15  ;;  %v6471_v44 = vld [vmem:[%s6702_s7 + $0x18] sm:$0xff]  }
 0x247   : > { %6029 = vmatprep.mubr.msk.bf16.mxu0 %vm6604_vm0, %v9194_v13  ;;  %v1964_v1 = vadd.f32 %v1957_v7, %v7371_v32  ;;  %5923 = vmatprep.mubr.msk.bf16.mxu1 %vm6604_vm0, %v9194_v13 }
 0x249   : > { %v2068_v48 = vpop.f32.mrb[172].mxu0  ;;  %v1671_v49 = vpop.f32.mrb[172].mxu1 }
 0x24a   : > { %v7815_v6 = vadd.f32 %v2068_v48, %v1963_v5  ;;  %v5811_v52 = vpop.f32.mrb[173].mxu0  ;;  %v1865_v33 = vrot.slane %v1671_v49, 7  ;;  %v5705_v59 = vpop.f32.mrb[173].mxu1 }
 0x24b   : > { %v2071_v47 = vpop.f32.mrb[174].mxu0  ;;  %v1674_v12 = vpop.f32.mrb[174].mxu1 }
 0x24c   : > { %v7817_v51 = vadd.f32 %v2071_v47, %v1964_v1  ;;  %v5812_v20 = vpop.f32.mrb[175].mxu0  ;;  %v1866_v39 = vrot.slane %v1674_v12, 7  ;;  %v5706_v3 = vpop.f32.mrb[175].mxu1  ;;  %v1956_v32 = vsel %vm793_vm2, %v1864_v15, %v1865_v33 }
 0x24d   : > { %v1965_v7 = vadd.f32 %v1956_v32, %v7379_v27 }
 0x24e   : > { %6030 = vmatmul.mubr.msk.bf16.gmra.mrb[24].mxu0 %vm412_vm1, %v6470_v0  ;;  %5924 = vmatmul.mubr.msk.bf16.gmra.mrb[24].mxu1 %vm412_vm1, %v6471_v44  ;;  %v1955_v5 = vsel %vm793_vm2, %v1865_v33, %v1866_v39 }
 0x24f   : > { %6033 = vmatprep.mubr.msk.bf16.mxu0 %vm6604_vm0, %v9194_v13  ;;  %v1966_v1 = vadd.f32 %v1955_v5, %v7389_v54  ;;  %5927 = vmatprep.mubr.msk.bf16.mxu1 %vm6604_vm0, %v9194_v13  ;;  %v6472_v5 = vld [vmem:[%s6702_s7 + $0x20] sm:$0xff]  }
 0x251   : > { %v2076_v15 = vpop.f32.mrb[176].mxu0  ;;  %v1679_v48 = vpop.f32.mrb[176].mxu1 }
 0x252   : > { %v7832_v0 = vadd.f32 %v2076_v15, %v1965_v7  ;;  %v5815_v27 = vpop.f32.mrb[177].mxu0  ;;  %v1867_v49 = vrot.slane %v1679_v48, 7  ;;  %v5709_v52 = vpop.f32.mrb[177].mxu1 }
 0x253   : > { %v2079_v59 = vpop.f32.mrb[178].mxu0  ;;  %v1682_v47 = vpop.f32.mrb[178].mxu1 }
 0x254   : > { %v7834_v12 = vadd.f32 %v2079_v59, %v1966_v1  ;;  %v5816_v33 = vpop.f32.mrb[179].mxu0  ;;  %v1868_v20 = vrot.slane %v1682_v47, 7  ;;  %v5710_v3 = vpop.f32.mrb[179].mxu1  ;;  %v1954_v54 = vsel %vm793_vm2, %v1866_v39, %v1867_v49 }
 0x255   : > { %v1967_v32 = vadd.f32 %v1954_v54, %v7397_v45 }
 0x256   : > { %6034 = vmatmul.mubr.msk.bf16.gmra.mrb[28].mxu0 %vm412_vm1, %v6471_v44  ;;  %5928 = vmatmul.mubr.msk.bf16.gmra.mrb[28].mxu1 %vm412_vm1, %v6472_v5  ;;  %v1953_v7 = vsel %vm793_vm2, %v1867_v49, %v1868_v20 }
 0x257   : > { %6037 = vmatprep.mubr.msk.bf16.mxu0 %vm6604_vm0, %v9194_v13  ;;  %v1968_v1 = vadd.f32 %v1953_v7, %v7407_v30  ;;  %5931 = vmatprep.mubr.msk.bf16.mxu1 %vm6604_vm0, %v9194_v13  ;;  %v6473_v7 = vld [vmem:[%s6702_s7 + $0x28] sm:$0xff]  }
 0x259   : > { %v2084_v39 = vpop.f32.mrb[180].mxu0  ;;  %v1687_v15 = vpop.f32.mrb[180].mxu1 }
 0x25a   : > { %v7849_v44 = vadd.f32 %v2084_v39, %v1967_v32  ;;  %v5819_v45 = vpop.f32.mrb[181].mxu0  ;;  %v1869_v48 = vrot.slane %v1687_v15, 7  ;;  %v5713_v27 = vpop.f32.mrb[181].mxu1 }
 0x25b   : > { %v2087_v52 = vpop.f32.mrb[182].mxu0  ;;  %v1690_v59 = vpop.f32.mrb[182].mxu1 }
 0x25c   : > { %v7851_v47 = vadd.f32 %v2087_v52, %v1968_v1  ;;  %v5820_v49 = vpop.f32.mrb[183].mxu0  ;;  %v1870_v33 = vrot.slane %v1690_v59, 7  ;;  %v5714_v3 = vpop.f32.mrb[183].mxu1  ;;  %v1952_v30 = vsel %vm793_vm2, %v1868_v20, %v1869_v48 }
 0x25d   : > { %v1969_v54 = vadd.f32 %v1952_v30, %v7415_v8 }
 0x25e   : > { %6038 = vmatmul.mubr.msk.bf16.gmra.mrb[32].mxu0 %vm412_vm1, %v6472_v5  ;;  %5932 = vmatmul.mubr.msk.bf16.gmra.mrb[32].mxu1 %vm412_vm1, %v6473_v7  ;;  %v1951_v32 = vsel %vm793_vm2, %v1869_v48, %v1870_v33 }
 0x25f   : > { %6041 = vmatprep.mubr.msk.bf16.mxu0 %vm6604_vm0, %v9194_v13  ;;  %v1970_v1 = vadd.f32 %v1951_v32, %v7425_v56  ;;  %5935 = vmatprep.mubr.msk.bf16.mxu1 %vm6604_vm0, %v9194_v13 }
 0x261   : > { %v2092_v39 = vpop.f32.mrb[184].mxu0  ;;  %v1695_v20 = vpop.f32.mrb[184].mxu1 }
 0x262   : > { %v7866_v15 = vadd.f32 %v2092_v39, %v1969_v54  ;;  %v5823_v5 = vpop.f32.mrb[185].mxu0  ;;  %v1871_v8 = vrot.slane %v1695_v20, 7  ;;  %v5717_v45 = vpop.f32.mrb[185].mxu1 }
 0x263   : > { %v2095_v27 = vpop.f32.mrb[186].mxu0  ;;  %v1698_v52 = vpop.f32.mrb[186].mxu1 }
 0x264   : > { %v7868_v59 = vadd.f32 %v2095_v27, %v1970_v1  ;;  %v5824_v48 = vpop.f32.mrb[187].mxu0  ;;  %v1872_v49 = vrot.slane %v1698_v52, 7  ;;  %v5718_v3 = vpop.f32.mrb[187].mxu1  ;;  %v1950_v56 = vsel %vm793_vm2, %v1870_v33, %v1871_v8 }
 0x265   : > { %v1971_v30 = vadd.f32 %v1950_v56, %v7433_v17  ;;  %v7890_v48 = vld [vmem:[%s6702_s7 + $0x30] sm:$0xff]  }
 0x266   : > { %6042 = vmatmul.mubr.msk.bf16.gmra.mrb[36].mxu0 %vm412_vm1, %v6473_v7  ;;  %5936 = vmatmul.mubr.msk.bf16.gmra.mrb[36].mxu1 %vm412_vm1, %v7456_v43  ;;  %v1949_v54 = vsel %vm793_vm2, %v1871_v8, %v1872_v49 }
 0x267   : > { %6045 = vmatprep.mubr.msk.bf16.mxu0 %vm6604_vm0, %v9194_v13  ;;  %v1972_v32 = vadd.f32 %v1949_v54, %v7443_v11  ;;  %5939 = vmatprep.mubr.msk.bf16.mxu1 %vm6604_vm0, %v9194_v13 }
 0x269   : > { %v2100_v33 = vpop.f32.mrb[188].mxu0  ;;  %v1703_v1 = vpop.f32.mrb[188].mxu1 }
 0x26a   : > { %v7883_v7 = vadd.f32 %v2100_v33, %v1971_v30  ;;  %v5827_v17 = vpop.f32.mrb[189].mxu0  ;;  %v1873_v39 = vrot.slane %v1703_v1, 7  ;;  %v5721_v20 = vpop.f32.mrb[189].mxu1 }
 0x26b   : > { %v2103_v43 = vpop.f32.mrb[190].mxu0  ;;  %v1706_v5 = vpop.f32.mrb[190].mxu1 }
 0x26c   : > { %v7885_v45 = vadd.f32 %v2103_v43, %v1972_v32  ;;  %v5828_v8 = vpop.f32.mrb[191].mxu0  ;;  %v1874_v27 = vrot.slane %v1706_v5, 7  ;;  %v5722_v52 = vpop.f32.mrb[191].mxu1  ;;  %v1948_v11 = vsel %vm793_vm2, %v1872_v49, %v1873_v39 }
 0x26d   : > { %v1973_v3 = vadd.f32 %v1948_v11, %v7451_v50  ;;  %v7911_v8 = vld [vmem:[%s6702_s7 + $0x38] sm:$0xff]   ;;  %v6476_v11 = vld [vmem:[%s6702_s7 + $0x40] sm:$0xff]  }
 0x26e   : > { %6046 = vmatmul.mubr.msk.bf16.gmra.mrb[40].mxu0 %vm412_vm1, %v7890_v48  ;;  %5940 = vmatmul.mubr.msk.bf16.gmra.mrb[40].mxu1 %vm412_vm1, %v7477_v14  ;;  %v1947_v56 = vsel %vm793_vm2, %v1873_v39, %v1874_v27 }
 0x26f   : > { %6049 = vmatprep.mubr.msk.bf16.mxu0 %vm6604_vm0, %v9194_v13  ;;  %v1974_v30 = vadd.f32 %v1947_v56, %v7464_v31  ;;  %5943 = vmatprep.mubr.msk.bf16.mxu1 %vm6604_vm0, %v9194_v13 }
 0x271   : > { %v2108_v49 = vpop.f32.mrb[192].mxu0  ;;  %v1711_v54 = vpop.f32.mrb[192].mxu1 }
 0x272   : > { %v7904_v32 = vadd.f32 %v2108_v49, %v1973_v3  ;;  %v5831_v50 = vpop.f32.mrb[193].mxu0  ;;  %v1875_v33 = vrot.slane %v1711_v54, 7  ;;  %v5725_v14 = vpop.f32.mrb[193].mxu1 }
 0x273   : > { %v2111_v1 = vpop.f32.mrb[194].mxu0  ;;  %v1714_v17 = vpop.f32.mrb[194].mxu1 }
 0x274   : > { %v7906_v39 = vadd.f32 %v2111_v1, %v1974_v30  ;;  %v5832_v20 = vpop.f32.mrb[195].mxu0  ;;  %v1876_v43 = vrot.slane %v1714_v17, 7  ;;  %v5726_v5 = vpop.f32.mrb[195].mxu1  ;;  %v1946_v31 = vsel %vm793_vm2, %v1874_v27, %v1875_v33 }
 0x275   : > { %v1975_v52 = vadd.f32 %v1946_v31, %v7472_v35 }
 0x276   : > { %6050 = vmatmul.mubr.msk.bf16.gmra.mrb[44].mxu0 %vm412_vm1, %v7911_v8  ;;  %5944 = vmatmul.mubr.msk.bf16.gmra.mrb[44].mxu1 %vm412_vm1, %v6476_v11  ;;  %v1945_v3 = vsel %vm793_vm2, %v1875_v33, %v1876_v43 }
 0x277   : > { %6053 = vmatprep.mubr.msk.bf16.mxu0 %vm6604_vm0, %v9194_v13  ;;  %v1976_v56 = vadd.f32 %v1945_v3, %v7485_v16  ;;  %5947 = vmatprep.mubr.msk.bf16.mxu1 %vm6604_vm0, %v9194_v13  ;;  %v6477_v3 = vld [vmem:[%s6702_s7 + $0x48] sm:$0xff]  }
 0x279   : > { %v2116_v27 = vpop.f32.mrb[196].mxu0  ;;  %v1719_v30 = vpop.f32.mrb[196].mxu1 }
 0x27a   : > { %v7925_v49 = vadd.f32 %v2116_v27, %v1975_v52  ;;  %v5835_v35 = vpop.f32.mrb[197].mxu0  ;;  %v1877_v54 = vrot.slane %v1719_v30, 7  ;;  %v5729_v50 = vpop.f32.mrb[197].mxu1 }
 0x27b   : > { %v2119_v14 = vpop.f32.mrb[198].mxu0  ;;  %v1722_v1 = vpop.f32.mrb[198].mxu1 }
 0x27c   : > { %v7927_v17 = vadd.f32 %v2119_v14, %v1976_v56  ;;  %v5836_v33 = vpop.f32.mrb[199].mxu0  ;;  %v1878_v20 = vrot.slane %v1722_v1, 7  ;;  %v5730_v5 = vpop.f32.mrb[199].mxu1  ;;  %v1944_v16 = vsel %vm793_vm2, %v1876_v43, %v1877_v54 }
 0x27d   : > { %v1977_v31 = vadd.f32 %v1944_v16, %v7493_v58 }
 0x27e   : > { %6054 = vmatmul.mubr.msk.bf16.gmra.mrb[48].mxu0 %vm412_vm1, %v6476_v11  ;;  %5948 = vmatmul.mubr.msk.bf16.gmra.mrb[48].mxu1 %vm412_vm1, %v6477_v3  ;;  %v1943_v52 = vsel %vm793_vm2, %v1877_v54, %v1878_v20 }
 0x27f   : > { %6057 = vmatprep.mubr.msk.bf16.mxu0 %vm6604_vm0, %v9194_v13  ;;  %v1978_v56 = vadd.f32 %v1943_v52, %v7502_v41  ;;  %5951 = vmatprep.mubr.msk.bf16.mxu1 %vm6604_vm0, %v9194_v13  ;;  %v6478_v52 = vld [vmem:[%s6702_s7 + $0x50] sm:$0xff]  }
 0x281   : > { %v2124_v43 = vpop.f32.mrb[200].mxu0  ;;  %v1727_v27 = vpop.f32.mrb[200].mxu1 }
 0x282   : > { %v7942_v11 = vadd.f32 %v2124_v43, %v1977_v31  ;;  %v5839_v58 = vpop.f32.mrb[201].mxu0  ;;  %v1879_v30 = vrot.slane %v1727_v27, 7  ;;  %v5733_v35 = vpop.f32.mrb[201].mxu1 }
 0x283   : > { %v2127_v50 = vpop.f32.mrb[202].mxu0  ;;  %v1730_v14 = vpop.f32.mrb[202].mxu1 }
 0x284   : > { %v7944_v1 = vadd.f32 %v2127_v50, %v1978_v56  ;;  %v5840_v54 = vpop.f32.mrb[203].mxu0  ;;  %v1880_v33 = vrot.slane %v1730_v14, 7  ;;  %v5734_v5 = vpop.f32.mrb[203].mxu1  ;;  %v1942_v41 = vsel %vm793_vm2, %v1878_v20, %v1879_v30 }
 0x285   : > { %v1979_v16 = vadd.f32 %v1942_v41, %v7510_v2 }
 0x286   : > { %6058 = vmatmul.mubr.msk.bf16.gmra.mrb[52].mxu0 %vm412_vm1, %v6477_v3  ;;  %5952 = vmatmul.mubr.msk.bf16.gmra.mrb[52].mxu1 %vm412_vm1, %v6478_v52  ;;  %v1941_v31 = vsel %vm793_vm2, %v1879_v30, %v1880_v33 }
 0x287   : > { %6061 = vmatprep.mubr.msk.bf16.mxu0 %vm6604_vm0, %v9194_v13  ;;  %v1980_v56 = vadd.f32 %v1941_v31, %v7519_v55  ;;  %5955 = vmatprep.mubr.msk.bf16.mxu1 %vm6604_vm0, %v9194_v13  ;;  %v6479_v31 = vld [vmem:[%s6702_s7 + $0x58] sm:$0xff]  }
 0x289   : > { %v2132_v20 = vpop.f32.mrb[204].mxu0  ;;  %v1735_v43 = vpop.f32.mrb[204].mxu1 }
 0x28a   : > { %v7959_v3 = vadd.f32 %v2132_v20, %v1979_v16  ;;  %v5843_v2 = vpop.f32.mrb[205].mxu0  ;;  %v1881_v27 = vrot.slane %v1735_v43, 7  ;;  %v5737_v58 = vpop.f32.mrb[205].mxu1 }
 0x28b   : > { %v2135_v35 = vpop.f32.mrb[206].mxu0  ;;  %v1738_v50 = vpop.f32.mrb[206].mxu1 }
 0x28c   : > { %v7961_v14 = vadd.f32 %v2135_v35, %v1980_v56  ;;  %v5844_v30 = vpop.f32.mrb[207].mxu0  ;;  %v1882_v54 = vrot.slane %v1738_v50, 7  ;;  %v5738_v5 = vpop.f32.mrb[207].mxu1  ;;  %v1940_v55 = vsel %vm793_vm2, %v1880_v33, %v1881_v27 }
 0x28d   : > { %v1981_v41 = vadd.f32 %v1940_v55, %v7527_v28 }
 0x28e   : > { %6062 = vmatmul.mubr.msk.bf16.gmra.mrb[56].mxu0 %vm412_vm1, %v6478_v52  ;;  %5956 = vmatmul.mubr.msk.bf16.gmra.mrb[56].mxu1 %vm412_vm1, %v6479_v31  ;;  %v1939_v16 = vsel %vm793_vm2, %v1881_v27, %v1882_v54 }
 0x28f   : > { %6065 = vmatprep.mubr.msk.bf16.mxu0 %vm6604_vm0, %v9194_v13  ;;  %v1982_v56 = vadd.f32 %v1939_v16, %v7536_v19  ;;  %5959 = vmatprep.mubr.msk.bf16.mxu1 %vm6604_vm0, %v9194_v13  ;;  %v6480_v16 = vld [vmem:[%s6702_s7 + $0x60] sm:$0xff]  }
 0x291   : > { %v2140_v33 = vpop.f32.mrb[208].mxu0  ;;  %v1743_v20 = vpop.f32.mrb[208].mxu1 }
 0x292   : > { %v7976_v52 = vadd.f32 %v2140_v33, %v1981_v41  ;;  %v5847_v28 = vpop.f32.mrb[209].mxu0  ;;  %v1883_v43 = vrot.slane %v1743_v20, 7  ;;  %v5741_v2 = vpop.f32.mrb[209].mxu1 }
 0x293   : > { %v2143_v58 = vpop.f32.mrb[210].mxu0  ;;  %v1746_v35 = vpop.f32.mrb[210].mxu1 }
 0x294   : > { %v7978_v50 = vadd.f32 %v2143_v58, %v1982_v56  ;;  %v5848_v27 = vpop.f32.mrb[211].mxu0  ;;  %v1884_v30 = vrot.slane %v1746_v35, 7  ;;  %v5742_v5 = vpop.f32.mrb[211].mxu1  ;;  %v1938_v19 = vsel %vm793_vm2, %v1882_v54, %v1883_v43 }
 0x295   : > { %v1983_v55 = vadd.f32 %v1938_v19, %v7544_v10 }
 0x296   : > { %6066 = vmatmul.mubr.msk.bf16.gmra.mrb[60].mxu0 %vm412_vm1, %v6479_v31  ;;  %5960 = vmatmul.mubr.msk.bf16.gmra.mrb[60].mxu1 %vm412_vm1, %v6480_v16  ;;  %v1937_v41 = vsel %vm793_vm2, %v1883_v43, %v1884_v30 }
 0x297   : > { %6069 = vmatprep.mubr.msk.bf16.mxu0 %vm6604_vm0, %v9194_v13  ;;  %v1984_v56 = vadd.f32 %v1937_v41, %v7553_v24  ;;  %5963 = vmatprep.mubr.msk.bf16.mxu1 %vm6604_vm0, %v9194_v13  ;;  %v6481_v41 = vld [vmem:[%s6702_s7 + $0x68] sm:$0xff]  }
 0x299   : > { %v2148_v54 = vpop.f32.mrb[212].mxu0  ;;  %v1751_v33 = vpop.f32.mrb[212].mxu1 }
 0x29a   : > { %v7993_v31 = vadd.f32 %v2148_v54, %v1983_v55  ;;  %v5851_v10 = vpop.f32.mrb[213].mxu0  ;;  %v1885_v20 = vrot.slane %v1751_v33, 7  ;;  %v5745_v28 = vpop.f32.mrb[213].mxu1 }
 0x29b   : > { %v2151_v2 = vpop.f32.mrb[214].mxu0  ;;  %v1754_v58 = vpop.f32.mrb[214].mxu1 }
 0x29c   : > { %v7995_v35 = vadd.f32 %v2151_v2, %v1984_v56  ;;  %v5852_v43 = vpop.f32.mrb[215].mxu0  ;;  %v1886_v27 = vrot.slane %v1754_v58, 7  ;;  %v5746_v5 = vpop.f32.mrb[215].mxu1  ;;  %v1936_v24 = vsel %vm793_vm2, %v1884_v30, %v1885_v20 }
 0x29d   : > { %v1985_v19 = vadd.f32 %v1936_v24, %v7561_v29 }
 0x29e   : > { %6070 = vmatmul.mubr.msk.bf16.gmra.mrb[64].mxu0 %vm412_vm1, %v6480_v16  ;;  %5964 = vmatmul.mubr.msk.bf16.gmra.mrb[64].mxu1 %vm412_vm1, %v6481_v41  ;;  %v1935_v55 = vsel %vm793_vm2, %v1885_v20, %v1886_v27 }
 0x29f   : > { %6073 = vmatprep.mubr.msk.bf16.mxu0 %vm6604_vm0, %v9194_v13  ;;  %v1986_v56 = vadd.f32 %v1935_v55, %v7570_v26  ;;  %5967 = vmatprep.mubr.msk.bf16.mxu1 %vm6604_vm0, %v9194_v13  ;;  %v6482_v55 = vld [vmem:[%s6702_s7 + $0x70] sm:$0xff]  }
 0x2a1   : > { %v2156_v30 = vpop.f32.mrb[216].mxu0  ;;  %v1759_v54 = vpop.f32.mrb[216].mxu1 }
 0x2a2   : > { %v8010_v16 = vadd.f32 %v2156_v30, %v1985_v19  ;;  %v5855_v29 = vpop.f32.mrb[217].mxu0  ;;  %v1887_v33 = vrot.slane %v1759_v54, 7  ;;  %v5749_v10 = vpop.f32.mrb[217].mxu1 }
 0x2a3   : > { %v2159_v28 = vpop.f32.mrb[218].mxu0  ;;  %v1762_v2 = vpop.f32.mrb[218].mxu1 }
 0x2a4   : > { %v8012_v58 = vadd.f32 %v2159_v28, %v1986_v56  ;;  %v5856_v20 = vpop.f32.mrb[219].mxu0  ;;  %v1888_v43 = vrot.slane %v1762_v2, 7  ;;  %v5750_v5 = vpop.f32.mrb[219].mxu1  ;;  %v1934_v26 = vsel %vm793_vm2, %v1886_v27, %v1887_v33 }
 0x2a5   : > { %v1987_v24 = vadd.f32 %v1934_v26, %v7578_v40 }
 0x2a6   : > { %6074 = vmatmul.mubr.msk.bf16.gmra.mrb[68].mxu0 %vm412_vm1, %v6481_v41  ;;  %5968 = vmatmul.mubr.msk.bf16.gmra.mrb[68].mxu1 %vm412_vm1, %v6482_v55  ;;  %v1933_v19 = vsel %vm793_vm2, %v1887_v33, %v1888_v43 }
 0x2a7   : > { %6077 = vmatprep.mubr.msk.bf16.mxu0 %vm6604_vm0, %v9194_v13  ;;  %v1988_v56 = vadd.f32 %v1933_v19, %v7587_v22  ;;  %5971 = vmatprep.mubr.msk.bf16.mxu1 %vm6604_vm0, %v9194_v13  ;;  %v6483_v19 = vld [vmem:[%s6702_s7 + $0x78] sm:$0xff]  }
 0x2a9   : > { %v2164_v27 = vpop.f32.mrb[220].mxu0  ;;  %v1767_v30 = vpop.f32.mrb[220].mxu1 }
 0x2aa   : > { %v8027_v41 = vadd.f32 %v2164_v27, %v1987_v24  ;;  %v5859_v40 = vpop.f32.mrb[221].mxu0  ;;  %v1889_v54 = vrot.slane %v1767_v30, 7  ;;  %v5753_v29 = vpop.f32.mrb[221].mxu1 }
 0x2ab   : > { %v2167_v10 = vpop.f32.mrb[222].mxu0  ;;  %v1770_v28 = vpop.f32.mrb[222].mxu1 }
 0x2ac   : > { %v8029_v2 = vadd.f32 %v2167_v10, %v1988_v56  ;;  %v5860_v33 = vpop.f32.mrb[223].mxu0  ;;  %v1890_v20 = vrot.slane %v1770_v28, 7  ;;  %v5754_v5 = vpop.f32.mrb[223].mxu1  ;;  %v1932_v22 = vsel %vm793_vm2, %v1888_v43, %v1889_v54 }
 0x2ad   : > { %v1989_v26 = vadd.f32 %v1932_v22, %v7595_v21 }
 0x2ae   : > { %6078 = vmatmul.mubr.msk.bf16.gmra.mrb[72].mxu0 %vm412_vm1, %v6482_v55  ;;  %5972 = vmatmul.mubr.msk.bf16.gmra.mrb[72].mxu1 %vm412_vm1, %v6483_v19  ;;  %v1931_v24 = vsel %vm793_vm2, %v1889_v54, %v1890_v20 }
 0x2af   : > { %6081 = vmatprep.mubr.msk.bf16.mxu0 %vm6604_vm0, %v9194_v13  ;;  %v1990_v56 = vadd.f32 %v1931_v24, %v7604_v62  ;;  %5975 = vmatprep.mubr.msk.bf16.mxu1 %vm6604_vm0, %v9194_v13  ;;  %v6484_v24 = vld [vmem:[%s6702_s7 + $0x80] sm:$0xff]  }
 0x2b1   : > { %v2172_v43 = vpop.f32.mrb[224].mxu0  ;;  %v1775_v27 = vpop.f32.mrb[224].mxu1 }
 0x2b2   : > { %v8044_v55 = vadd.f32 %v2172_v43, %v1989_v26  ;;  %v5863_v21 = vpop.f32.mrb[225].mxu0  ;;  %v1891_v30 = vrot.slane %v1775_v27, 7  ;;  %v5757_v40 = vpop.f32.mrb[225].mxu1 }
 0x2b3   : > { %v2175_v29 = vpop.f32.mrb[226].mxu0  ;;  %v1778_v10 = vpop.f32.mrb[226].mxu1 }
 0x2b4   : > { %v8046_v28 = vadd.f32 %v2175_v29, %v1990_v56  ;;  %v5864_v54 = vpop.f32.mrb[227].mxu0  ;;  %v1892_v33 = vrot.slane %v1778_v10, 7  ;;  %v5758_v5 = vpop.f32.mrb[227].mxu1  ;;  %v1930_v62 = vsel %vm793_vm2, %v1890_v20, %v1891_v30 }
 0x2b5   : > { %v1991_v22 = vadd.f32 %v1930_v62, %v7612_v4 }
 0x2b6   : > { %6082 = vmatmul.mubr.msk.bf16.gmra.mrb[76].mxu0 %vm412_vm1, %v6483_v19  ;;  %5976 = vmatmul.mubr.msk.bf16.gmra.mrb[76].mxu1 %vm412_vm1, %v6484_v24  ;;  %v1929_v26 = vsel %vm793_vm2, %v1891_v30, %v1892_v33 }
 0x2b7   : > { %6085 = vmatprep.mubr.msk.bf16.mxu0 %vm6604_vm0, %v9194_v13  ;;  %v1992_v56 = vadd.f32 %v1929_v26, %v7621_v38  ;;  %5979 = vmatprep.mubr.msk.bf16.mxu1 %vm6604_vm0, %v9194_v13  ;;  %v6485_v26 = vld [vmem:[%s6702_s7 + $0x88] sm:$0xff]  }
 0x2b9   : > { %v2180_v20 = vpop.f32.mrb[228].mxu0  ;;  %v1783_v43 = vpop.f32.mrb[228].mxu1 }
 0x2ba   : > { %v8061_v19 = vadd.f32 %v2180_v20, %v1991_v22  ;;  %v5867_v4 = vpop.f32.mrb[229].mxu0  ;;  %v1893_v27 = vrot.slane %v1783_v43, 7  ;;  %v5761_v21 = vpop.f32.mrb[229].mxu1 }
 0x2bb   : > { %v2183_v40 = vpop.f32.mrb[230].mxu0  ;;  %v1786_v29 = vpop.f32.mrb[230].mxu1 }
 0x2bc   : > { %v8063_v10 = vadd.f32 %v2183_v40, %v1992_v56  ;;  %v5868_v30 = vpop.f32.mrb[231].mxu0  ;;  %v1894_v54 = vrot.slane %v1786_v29, 7  ;;  %v5762_v5 = vpop.f32.mrb[231].mxu1  ;;  %v1928_v38 = vsel %vm793_vm2, %v1892_v33, %v1893_v27 }
 0x2bd   : > { %v1993_v62 = vadd.f32 %v1928_v38, %v7629_v53 }
 0x2be   : > { %6086 = vmatmul.mubr.msk.bf16.gmra.mrb[80].mxu0 %vm412_vm1, %v6484_v24  ;;  %5980 = vmatmul.mubr.msk.bf16.gmra.mrb[80].mxu1 %vm412_vm1, %v6485_v26  ;;  %v1927_v22 = vsel %vm793_vm2, %v1893_v27, %v1894_v54 }
 0x2bf   : > { %6089 = vmatprep.mubr.msk.bf16.mxu0 %vm6604_vm0, %v9194_v13  ;;  %v1994_v56 = vadd.f32 %v1927_v22, %v7638_v57  ;;  %5983 = vmatprep.mubr.msk.bf16.mxu1 %vm6604_vm0, %v9194_v13  ;;  %v6486_v22 = vld [vmem:[%s6702_s7 + $0x90] sm:$0xff]  }
 0x2c1   : > { %v2188_v33 = vpop.f32.mrb[232].mxu0  ;;  %v1791_v20 = vpop.f32.mrb[232].mxu1 }
 0x2c2   : > { %v8078_v24 = vadd.f32 %v2188_v33, %v1993_v62  ;;  %v5871_v53 = vpop.f32.mrb[233].mxu0  ;;  %v1895_v43 = vrot.slane %v1791_v20, 7  ;;  %v5765_v4 = vpop.f32.mrb[233].mxu1 }
 0x2c3   : > { %v2191_v21 = vpop.f32.mrb[234].mxu0  ;;  %v1794_v40 = vpop.f32.mrb[234].mxu1 }
 0x2c4   : > { %v8080_v29 = vadd.f32 %v2191_v21, %v1994_v56  ;;  %v5872_v27 = vpop.f32.mrb[235].mxu0  ;;  %v1896_v30 = vrot.slane %v1794_v40, 7  ;;  %v5766_v5 = vpop.f32.mrb[235].mxu1  ;;  %v1926_v57 = vsel %vm793_vm2, %v1894_v54, %v1895_v43 }
 0x2c5   : > { %v1995_v38 = vadd.f32 %v1926_v57, %v7646_v25 }
 0x2c6   : > { %6090 = vmatmul.mubr.msk.bf16.gmra.mrb[84].mxu0 %vm412_vm1, %v6485_v26  ;;  %5984 = vmatmul.mubr.msk.bf16.gmra.mrb[84].mxu1 %vm412_vm1, %v6486_v22  ;;  %v1925_v62 = vsel %vm793_vm2, %v1895_v43, %v1896_v30 }
 0x2c7   : > { %6093 = vmatprep.mubr.msk.bf16.mxu0 %vm6604_vm0, %v9194_v13  ;;  %v1996_v56 = vadd.f32 %v1925_v62, %v7655_v36  ;;  %5987 = vmatprep.mubr.msk.bf16.mxu1 %vm6604_vm0, %v9194_v13  ;;  %v6487_v62 = vld [vmem:[%s6702_s7 + $0x98] sm:$0xff]  }
 0x2c9   : > { %v2196_v54 = vpop.f32.mrb[236].mxu0  ;;  %v1799_v33 = vpop.f32.mrb[236].mxu1 }
 0x2ca   : > { %v8095_v26 = vadd.f32 %v2196_v54, %v1995_v38  ;;  %v5875_v25 = vpop.f32.mrb[237].mxu0  ;;  %v1897_v20 = vrot.slane %v1799_v33, 7  ;;  %v5769_v53 = vpop.f32.mrb[237].mxu1 }
 0x2cb   : > { %v2199_v4 = vpop.f32.mrb[238].mxu0  ;;  %v1802_v21 = vpop.f32.mrb[238].mxu1 }
 0x2cc   : > { %v8097_v40 = vadd.f32 %v2199_v4, %v1996_v56  ;;  %v5876_v43 = vpop.f32.mrb[239].mxu0  ;;  %v1898_v27 = vrot.slane %v1802_v21, 7  ;;  %v5770_v5 = vpop.f32.mrb[239].mxu1  ;;  %v1924_v36 = vsel %vm793_vm2, %v1896_v30, %v1897_v20 }
 0x2cd   : > { %v1997_v57 = vadd.f32 %v1924_v36, %v7663_v37 }
 0x2ce   : > { %6094 = vmatmul.mubr.msk.bf16.gmra.mrb[88].mxu0 %vm412_vm1, %v6486_v22  ;;  %5988 = vmatmul.mubr.msk.bf16.gmra.mrb[88].mxu1 %vm412_vm1, %v6487_v62  ;;  %v1923_v38 = vsel %vm793_vm2, %v1897_v20, %v1898_v27 }
 0x2cf   : > { %6097 = vmatprep.mubr.msk.bf16.mxu0 %vm6604_vm0, %v9194_v13  ;;  %v1998_v56 = vadd.f32 %v1923_v38, %v7672_v9  ;;  %5991 = vmatprep.mubr.msk.bf16.mxu1 %vm6604_vm0, %v9194_v13  ;;  %v6488_v38 = vld [vmem:[%s6702_s7 + $0xa0] sm:$0xff]  }
 0x2d1   : > { %v2204_v30 = vpop.f32.mrb[240].mxu0  ;;  %v1807_v54 = vpop.f32.mrb[240].mxu1 }
 0x2d2   : > { %v8112_v22 = vadd.f32 %v2204_v30, %v1997_v57  ;;  %v5879_v37 = vpop.f32.mrb[241].mxu0  ;;  %v1899_v33 = vrot.slane %v1807_v54, 7  ;;  %v5773_v25 = vpop.f32.mrb[241].mxu1 }
 0x2d3   : > { %v2207_v53 = vpop.f32.mrb[242].mxu0  ;;  %v1810_v4 = vpop.f32.mrb[242].mxu1 }
 0x2d4   : > { %v8114_v21 = vadd.f32 %v2207_v53, %v1998_v56  ;;  %v5880_v20 = vpop.f32.mrb[243].mxu0  ;;  %v1900_v43 = vrot.slane %v1810_v4, 7  ;;  %v5774_v5 = vpop.f32.mrb[243].mxu1  ;;  %v1922_v9 = vsel %vm793_vm2, %v1898_v27, %v1899_v33 }
 0x2d5   : > { %v1999_v36 = vadd.f32 %v1922_v9, %v7680_v63 }
 0x2d6   : > { %6098 = vmatmul.mubr.msk.bf16.gmra.mrb[92].mxu0 %vm412_vm1, %v6487_v62  ;;  %5992 = vmatmul.mubr.msk.bf16.gmra.mrb[92].mxu1 %vm412_vm1, %v6488_v38  ;;  %v1921_v57 = vsel %vm793_vm2, %v1899_v33, %v1900_v43 }
 0x2d7   : > { %6101 = vmatprep.mubr.msk.bf16.mxu0 %vm6604_vm0, %v9194_v13  ;;  %v2000_v56 = vadd.f32 %v1921_v57, %v7689_v42  ;;  %5995 = vmatprep.mubr.msk.bf16.mxu1 %vm6604_vm0, %v9194_v13  ;;  %v6489_v57 = vld [vmem:[%s6702_s7 + $0xa8] sm:$0xff]  }
 0x2d9   : > { %v2212_v27 = vpop.f32.mrb[244].mxu0  ;;  %v1815_v30 = vpop.f32.mrb[244].mxu1 }
 0x2da   : > { %v8129_v62 = vadd.f32 %v2212_v27, %v1999_v36  ;;  %v5883_v63 = vpop.f32.mrb[245].mxu0  ;;  %v1901_v54 = vrot.slane %v1815_v30, 7  ;;  %v5777_v37 = vpop.f32.mrb[245].mxu1 }
 0x2db   : > { %v2215_v25 = vpop.f32.mrb[246].mxu0  ;;  %v1818_v53 = vpop.f32.mrb[246].mxu1 }
 0x2dc   : > { %9211 = vst [vmem:[#allocation10_spill] sm:$0xff] %v8129_v62  ;;  %v8131_v4 = vadd.f32 %v2215_v25, %v2000_v56  ;;  %v5884_v33 = vpop.f32.mrb[247].mxu0  ;;  %v1902_v20 = vrot.slane %v1818_v53, 7  ;;  %v5778_v5 = vpop.f32.mrb[247].mxu1  ;;  %v1920_v42 = vsel %vm793_vm2, %v1900_v43, %v1901_v54  ;;  %v9213_v56 = vld [vmem:[#allocation5_spill] sm:$0xff]  ;;  %v6490_v62 = vld [vmem:[%s6702_s7 + $0xb0] sm:$0xff]  }
 0x2dd   : > { %v2001_v9 = vadd.f32 %v1920_v42, %v7697_v60 }
 0x2de   : > { %9212 = vst [vmem:[#allocation11_spill] sm:$0xff] %v8131_v4  ;;  %6102 = vmatmul.mubr.msk.bf16.gmra.mrb[96].mxu0 %vm412_vm1, %v6488_v38  ;;  %5996 = vmatmul.mubr.msk.bf16.gmra.mrb[96].mxu1 %vm412_vm1, %v6489_v57  ;;  %v1919_v36 = vsel %vm793_vm2, %v1901_v54, %v1902_v20 }
 0x2df   : > { %6105 = vmatprep.mubr.msk.bf16.mxu0 %vm6604_vm0, %v9194_v13  ;;  %v2002_v27 = vadd.f32 %v1919_v36, %v9213_v56  ;;  %5999 = vmatprep.mubr.msk.bf16.mxu1 %vm6604_vm0, %v9194_v13  ;;  %v9215_v56 = vld [vmem:[#allocation6_spill] sm:$0xff] }
 0x2e1   : > { %v2220_v43 = vpop.f32.mrb[248].mxu0  ;;  %v1823_v30 = vpop.f32.mrb[248].mxu1 }
 0x2e2   : > { %v8146_v38 = vadd.f32 %v2220_v43, %v2001_v9  ;;  %v5887_v60 = vpop.f32.mrb[249].mxu0  ;;  %v1903_v63 = vrot.slane %v1823_v30, 7  ;;  %v5781_v37 = vpop.f32.mrb[249].mxu1 }
 0x2e3   : > { %v2223_v25 = vpop.f32.mrb[250].mxu0  ;;  %v1826_v53 = vpop.f32.mrb[250].mxu1 }
 0x2e4   : > { %v8148_v33 = vadd.f32 %v2223_v25, %v2002_v27  ;;  %v5888_v54 = vpop.f32.mrb[251].mxu0  ;;  %v1904_v5 = vrot.slane %v1826_v53, 7  ;;  %v5782_v42 = vpop.f32.mrb[251].mxu1  ;;  %v1918_v36 = vsel %vm793_vm2, %v1902_v20, %v1903_v63  ;;  %v9216_v27 = vld [vmem:[#allocation7_spill] sm:$0xff] }
 0x2e5   : > { %v2003_v4 = vadd.f32 %v1918_v36, %v9215_v56 }
 0x2e6   : > { %9214 = vst [vmem:[#allocation12_spill] sm:$0xff] %v8148_v33  ;;  %6106 = vmatmul.mubr.msk.bf16.gmra.mrb[100].mxu0 %vm412_vm1, %v6489_v57  ;;  %6000 = vmatmul.mubr.msk.bf16.gmra.mrb[100].mxu1 %vm412_vm1, %v6490_v62  ;;  %v1917_v9 = vsel %vm793_vm2, %v1903_v63, %v1904_v5  ;;  %v6491_v33 = vld [vmem:[%s6702_s7 + $0xb8] sm:$0xff]  }
 0x2e7   : > { %6109 = vmatprep.mubr.msk.bf16.mxu0 %vm6604_vm0, %v9194_v13  ;;  %v2004_v43 = vadd.f32 %v1917_v9, %v9216_v27  ;;  %6003 = vmatprep.mubr.msk.bf16.mxu1 %vm6604_vm0, %v9194_v13 }
 0x2e9   : > { %v2228_v20 = vpop.f32.mrb[252].mxu0  ;;  %v1831_v30 = vpop.f32.mrb[252].mxu1 }
 0x2ea   : > { %v8163_v57 = vadd.f32 %v2228_v20, %v2003_v4  ;;  %v5891_v60 = vpop.f32.mrb[253].mxu0  ;;  %v1905_v37 = vrot.slane %v1831_v30, 7  ;;  %v5785_v25 = vpop.f32.mrb[253].mxu1 }
 0x2eb   : > { %v2231_v53 = vpop.f32.mrb[254].mxu0  ;;  %v1834_v54 = vpop.f32.mrb[254].mxu1 }
 0x2ec   : > { %v8165_v42 = vadd.f32 %v2231_v53, %v2004_v43  ;;  %v5892_v63 = vpop.f32.mrb[255].mxu0  ;;  %v1906_v36 = vrot.slane %v1834_v54, 7  ;;  %v5786_v56 = vpop.f32.mrb[255].mxu1  ;;  %v1916_v9 = vsel %vm793_vm2, %v1904_v5, %v1905_v37 }
 0x2ed   : > { %v2005_v27 = vadd.f32 %v1916_v9, %v7731_v46 }
 0x2ee   : > { %6110 = vmatmul.mubr.msk.bf16.gmra.mrb[104].mxu0 %vm412_vm1, %v6490_v62  ;;  %6004 = vmatmul.mubr.msk.bf16.gmra.mrb[104].mxu1 %vm412_vm1, %v6491_v33  ;;  %v1915_v4 = vsel %vm793_vm2, %v1905_v37, %v1906_v36 }
 0x2ef   : > { %6113 = vmatprep.mubr.msk.bf16.mxu0 %vm6604_vm0, %v9194_v13  ;;  %v2006_v43 = vadd.f32 %v1915_v4, %v7740_v23  ;;  %6007 = vmatprep.mubr.msk.bf16.mxu1 %vm6604_vm0, %v9194_v13  ;;  %v6492_v4 = vld [vmem:[%s6702_s7 + $0xc0] sm:$0xff]  }
 0x2f1   : > { %v2236_v5 = vpop.f32.mrb[0].mxu0  ;;  %v1839_v20 = vpop.f32.mrb[0].mxu1 }
 0x2f2   : > { %v8180_v62 = vadd.f32 %v2236_v5, %v2005_v27  ;;  %v5895_v46 = vpop.f32.mrb[1].mxu0  ;;  %v1907_v30 = vrot.slane %v1839_v20, 7  ;;  %v5789_v60 = vpop.f32.mrb[1].mxu1 }
 0x2f3   : > { %v2239_v25 = vpop.f32.mrb[2].mxu0  ;;  %v1842_v53 = vpop.f32.mrb[2].mxu1 }
 0x2f4   : > { %v8182_v54 = vadd.f32 %v2239_v25, %v2006_v43  ;;  %v5896_v37 = vpop.f32.mrb[3].mxu0  ;;  %v1908_v63 = vrot.slane %v1842_v53, 7  ;;  %v5790_v56 = vpop.f32.mrb[3].mxu1  ;;  %v1914_v23 = vsel %vm793_vm2, %v1906_v36, %v1907_v30 }
 0x2f5   : > { %v2007_v9 = vadd.f32 %v1914_v23, %v7746_v61  ;;  %v9220_v56 = vld [vmem:[#allocation8_spill] sm:$0xff] }
 0x2f6   : > { %9217 = vst [vmem:[#allocation13_spill] sm:$0xff] %v8182_v54  ;;  %6114 = vmatmul.mubr.msk.bf16.gmra.mrb[108].mxu0 %vm412_vm1, %v6491_v33  ;;  %6008 = vmatmul.mubr.msk.bf16.gmra.mrb[108].mxu1 %vm412_vm1, %v6492_v4  ;;  %v1913_v27 = vsel %vm793_vm2, %v1907_v30, %v1908_v63 }
 0x2f7   : > { %6117 = vmatprep.mubr.msk.bf16.mxu0 %vm6604_vm0, %v9194_v13  ;;  %v2008_v43 = vadd.f32 %v1913_v27, %v7755_v18  ;;  %6011 = vmatprep.mubr.msk.bf16.mxu1 %vm6604_vm0, %v9194_v13  ;;  %v6493_v27 = vld [vmem:[%s6702_s7 + $0xc8] sm:$0xff]  }
 0x2f9   : > { %v2244_v36 = vpop.f32.mrb[4].mxu0  ;;  %v1847_v5 = vpop.f32.mrb[4].mxu1 }
 0x2fa   : > { %v8197_v33 = vadd.f32 %v2244_v36, %v2007_v9  ;;  %v5899_v61 = vpop.f32.mrb[5].mxu0  ;;  %v1909_v20 = vrot.slane %v1847_v5, 7  ;;  %v5793_v60 = vpop.f32.mrb[5].mxu1 }
 0x2fb   : > { %v2247_v46 = vpop.f32.mrb[6].mxu0  ;;  %v1850_v53 = vpop.f32.mrb[6].mxu1  ;;  %v6494_v60 = vld [vmem:[%s6702_s7 + $0xd0] sm:$0xff]  }
 0x2fc   : > { %9218 = vst [vmem:[#allocation5_spill] sm:$0xff] %v8197_v33  ;;  %v8199_v25 = vadd.f32 %v2247_v46, %v2008_v43  ;;  %v5900_v30 = vpop.f32.mrb[7].mxu0  ;;  %v1912_v37 = vsel %vm793_vm2, %v1908_v63, %v1909_v20  ;;  %v5794_v18 = vpop.f32.mrb[7].mxu1 }
 0x2fd   : > { %v2009_v23 = vadd.f32 %v1912_v37, %v9220_v56 }
 0x2fe   : > { %9219 = vst [vmem:[#allocation6_spill] sm:$0xff] %v8199_v25  ;;  %6118 = vmatmul.mubr.msk.bf16.gmra.mrb[112].mxu0 %vm412_vm1, %v6492_v4  ;;  %6012 = vmatmul.mubr.msk.bf16.gmra.mrb[112].mxu1 %vm412_vm1, %v6493_v27 }
 0x2ff   : > { %6121 = vmatprep.mubr.msk.bf16.mxu0 %vm6604_vm0, %v9194_v13  ;;  %6015 = vmatprep.mubr.msk.bf16.mxu1 %vm6604_vm0, %v9194_v13 }
 0x301   : > { %v2252_v9 = vpop.f32.mrb[8].mxu0  ;;  %v1855_v63 = vpop.f32.mrb[8].mxu1 }
 0x302   : > { %v8211_v43 = vadd.f32 %v2252_v9, %v2009_v23  ;;  %v5903_v36 = vpop.f32.mrb[9].mxu0  ;;  %v5797_v61 = vpop.f32.mrb[9].mxu1 }
 0x303   : > { %v2255_v5 = vpop.f32.mrb[10].mxu0  ;;  %v1857_v20 = vpop.f32.mrb[10].mxu1 }
 0x304   : > { %9221 = vst [vmem:[#allocation7_spill] sm:$0xff] %v8211_v43  ;;  %v5904_v4 = vpop.f32.mrb[11].mxu0  ;;  %v5798_v46 = vpop.f32.mrb[11].mxu1 }
 0x306   : > { %6122 = vmatmul.mubr.msk.bf16.gmra.mrb[116].mxu0 %vm412_vm1, %v6493_v27  ;;  %6016 = vmatmul.mubr.msk.bf16.gmra.mrb[116].mxu1 %vm412_vm1, %v6494_v60  ;;  %v6495_v27 = vld [vmem:[%s6702_s7] sm:$0xff]  }
 0x307   : > { %6125 = vmatprep.mubr.msk.bf16.mxu0 %vm6604_vm0, %v9194_v13  ;;  %6131 = vmatprep.mubr.msk.bf16.mxu1 %vm6604_vm0, %v9194_v13 }
 0x309   : > { %v2260_v30 = vpop.f32.mrb[12].mxu0  ;;  %v2358_v37 = vpop.f32.mrb[12].mxu1 }
 0x30a   : > { %v5907_v53 = vpop.f32.mrb[13].mxu0  ;;  %v5913_v56 = vpop.f32.mrb[13].mxu1 }
 0x30b   : > { %v2262_v18 = vpop.f32.mrb[14].mxu0  ;;  %v2360_v9 = vpop.f32.mrb[14].mxu1 }
 0x30c   : > { %v5908_v23 = vpop.f32.mrb[15].mxu0  ;;  %v5914_v36 = vpop.f32.mrb[15].mxu1 }
 0x30e   : > { %6126 = vmatmul.mubr.msk.bf16.gmra.mrb[120].mxu0 %vm412_vm1, %v6494_v60  ;;  %6132 = vmatmul.mubr.msk.bf16.vlgmr.msra.gmra.mrb[120].mxu1 %vm412_vm1, %v6495_v27  ;;  %v6496_v60 = vld [vmem:[%s6702_s7 + $0x8] sm:$0xff]  }
 0x30f   : > { %6241 = vmatprep.mubr.msk.bf16.mxu0 %vm6604_vm0, %v9194_v13  ;;  %6135 = vmatprep.mubr.msk.bf16.mxu1 %vm6604_vm0, %v9194_v13 }
 0x311   : > { %v2764_v63 = vpop.f32.mrb[16].mxu0  ;;  %v2364_v61 = vpop.f32.mrb[16].mxu1 }
 0x312   : > { %v6023_v5 = vpop.f32.mrb[17].mxu0  ;;  %v5917_v20 = vpop.f32.mrb[17].mxu1 }
 0x313   : > { %v2767_v4 = vpop.f32.mrb[18].mxu0  ;;  %v2367_v30 = vpop.f32.mrb[18].mxu1 }
 0x314   : > { %v6024_v46 = vpop.f32.mrb[19].mxu0  ;;  %v5918_v53 = vpop.f32.mrb[19].mxu1  ;;  %v2571_v37 = vrot.slane %v2367_v30, 1 }
 0x315   : > { %v9222_v46 = vld [vmem:[#allocation9_spill] sm:$0xff] }
 0x316   : > { %6242 = vmatmul.mubr.msk.bf16.vlgmr.msra.gmra.mrb[124].mxu0 %vm412_vm1, %v6495_v27  ;;  %6136 = vmatmul.mubr.msk.bf16.gmra.mrb[124].mxu1 %vm412_vm1, %v6496_v60 }
 0x317   : > { %6245 = vmatprep.mubr.msk.bf16.mxu0 %vm6604_vm0, %v9194_v13  ;;  %6139 = vmatprep.mubr.msk.bf16.mxu1 %vm6604_vm0, %v9194_v13 }
 0x319   : > { %v2771_v18 = vpop.f32.mrb[20].mxu0  ;;  %v2372_v56 = vpop.f32.mrb[20].mxu1 }
 0x31a   : > { %v6027_v23 = vpop.f32.mrb[21].mxu0  ;;  %v2572_v9 = vrot.slane %v2372_v56, 1  ;;  %v5921_v36 = vpop.f32.mrb[21].mxu1  ;;  %v6497_v18 = vld [vmem:[%s6702_s7 + $0x10] sm:$0xff]  }
 0x31b   : > { %v2773_v63 = vpop.f32.mrb[22].mxu0  ;;  %v2375_v5 = vpop.f32.mrb[22].mxu1 }
 0x31c   : > { %v6028_v61 = vpop.f32.mrb[23].mxu0  ;;  %v2669_v27 = vsel %vm1504_vm3, %v2571_v37, %v2572_v9  ;;  %v2573_v4 = vrot.slane %v2375_v5, 1  ;;  %v5922_v20 = vpop.f32.mrb[23].mxu1 }
 0x31d   : > { %v2672_v53 = vadd.f32 %v2669_v27, %v9222_v46 }
 0x31e   : > { %6246 = vmatmul.mubr.msk.bf16.gmra.mrb[128].mxu0 %vm412_vm1, %v6496_v60  ;;  %v2668_v30 = vsel %vm1504_vm3, %v2572_v9, %v2573_v4  ;;  %6140 = vmatmul.mubr.msk.bf16.gmra.mrb[128].mxu1 %vm412_vm1, %v6497_v18 }
 0x31f   : > { %6249 = vmatprep.mubr.msk.bf16.mxu0 %vm6604_vm0, %v9194_v13  ;;  %6143 = vmatprep.mubr.msk.bf16.mxu1 %vm6604_vm0, %v9194_v13  ;;  %v2673_v37 = vadd.f32 %v2668_v30, %v7815_v6  ;;  %v6498_v30 = vld [vmem:[%s6702_s7 + $0x18] sm:$0xff]  }
 0x321   : > { %v2777_v56 = vpop.f32.mrb[24].mxu0  ;;  %v2380_v23 = vpop.f32.mrb[24].mxu1 }
 0x322   : > { %v6031_v60 = vpop.f32.mrb[25].mxu0  ;;  %v2574_v36 = vrot.slane %v2380_v23, 1  ;;  %v5925_v63 = vpop.f32.mrb[25].mxu1 }
 0x323   : > { %v2780_v5 = vpop.f32.mrb[26].mxu0  ;;  %v2383_v61 = vpop.f32.mrb[26].mxu1 }
 0x324   : > { %v6032_v9 = vpop.f32.mrb[27].mxu0  ;;  %v2667_v27 = vsel %vm1504_vm3, %v2573_v4, %v2574_v36  ;;  %v2575_v20 = vrot.slane %v2383_v61, 1  ;;  %v5926_v46 = vpop.f32.mrb[27].mxu1  ;;  %v2978_v23 = vrot.slane %v2780_v5, 7 }
 0x325   : > { %v2674_v43 = vadd.f32 %v2667_v27, %v7817_v51 }
 0x326   : > { %6250 = vmatmul.mubr.msk.bf16.gmra.mrb[132].mxu0 %vm412_vm1, %v6497_v18  ;;  %v2666_v6 = vsel %vm1504_vm3, %v2574_v36, %v2575_v20  ;;  %6144 = vmatmul.mubr.msk.bf16.gmra.mrb[132].mxu1 %vm412_vm1, %v6498_v30 }
 0x327   : > { %6253 = vmatprep.mubr.msk.bf16.mxu0 %vm6604_vm0, %v9194_v13  ;;  %6147 = vmatprep.mubr.msk.bf16.mxu1 %vm6604_vm0, %v9194_v13  ;;  %v2675_v4 = vadd.f32 %v2666_v6, %v7832_v0 }
 0x329   : > { %v2785_v56 = vpop.f32.mrb[28].mxu0  ;;  %v2388_v60 = vpop.f32.mrb[28].mxu1 }
 0x32a   : > { %v2979_v18 = vrot.slane %v2785_v56, 7  ;;  %v6035_v63 = vpop.f32.mrb[29].mxu0  ;;  %v2576_v51 = vrot.slane %v2388_v60, 1  ;;  %v5929_v61 = vpop.f32.mrb[29].mxu1 }
 0x32b   : > { %v2788_v36 = vpop.f32.mrb[30].mxu0  ;;  %v2391_v9 = vpop.f32.mrb[30].mxu1  ;;  %v6499_v63 = vld [vmem:[%s6702_s7 + $0x20] sm:$0xff]  }
 0x32c   : > { %v2980_v27 = vrot.slane %v2788_v36, 7  ;;  %v6036_v46 = vpop.f32.mrb[31].mxu0  ;;  %v3074_v25 = vsel %vm793_vm2, %v2978_v23, %v2979_v18  ;;  %v2665_v33 = vsel %vm1504_vm3, %v2575_v20, %v2576_v51  ;;  %v2577_v54 = vrot.slane %v2391_v9, 1  ;;  %v5930_v0 = vpop.f32.mrb[31].mxu1 }
 0x32d   : > { %v8264_v6 = vadd.f32 %v3074_v25, %v2672_v53  ;;  %v2676_v56 = vadd.f32 %v2665_v33, %v7834_v12 }
 0x32e   : > { %6254 = vmatmul.mubr.msk.bf16.gmra.mrb[136].mxu0 %vm412_vm1, %v6498_v30  ;;  %v3073_v5 = vsel %vm793_vm2, %v2979_v18, %v2980_v27  ;;  %v2664_v60 = vsel %vm1504_vm3, %v2576_v51, %v2577_v54  ;;  %6148 = vmatmul.mubr.msk.bf16.gmra.mrb[136].mxu1 %vm412_vm1, %v6499_v63 }
 0x32f   : > { %6257 = vmatprep.mubr.msk.bf16.mxu0 %vm6604_vm0, %v9194_v13  ;;  %v8276_v20 = vadd.f32 %v3073_v5, %v2673_v37  ;;  %6151 = vmatprep.mubr.msk.bf16.mxu1 %vm6604_vm0, %v9194_v13  ;;  %v2677_v25 = vadd.f32 %v2664_v60, %v7849_v44 }
 0x331   : > { %v2793_v53 = vpop.f32.mrb[32].mxu0  ;;  %v2396_v30 = vpop.f32.mrb[32].mxu1 }
 0x332   : > { %v2981_v23 = vrot.slane %v2793_v53, 7  ;;  %v6039_v12 = vpop.f32.mrb[33].mxu0  ;;  %v2578_v33 = vrot.slane %v2396_v30, 1  ;;  %v5933_v18 = vpop.f32.mrb[33].mxu1 }
 0x333   : > { %v2796_v51 = vpop.f32.mrb[34].mxu0  ;;  %v2399_v61 = vpop.f32.mrb[34].mxu1  ;;  %v6500_v12 = vld [vmem:[%s6702_s7 + $0x28] sm:$0xff]  }
 0x334   : > { %v2982_v36 = vrot.slane %v2796_v51, 7  ;;  %v6040_v9 = vpop.f32.mrb[35].mxu0  ;;  %v3072_v37 = vsel %vm793_vm2, %v2980_v27, %v2981_v23  ;;  %v2663_v46 = vsel %vm1504_vm3, %v2577_v54, %v2578_v33  ;;  %v2579_v0 = vrot.slane %v2399_v61, 1  ;;  %v5934_v5 = vpop.f32.mrb[35].mxu1 }
 0x335   : > { %v8285_v44 = vadd.f32 %v3072_v37, %v2674_v43  ;;  %v2678_v53 = vadd.f32 %v2663_v46, %v7851_v47 }
 0x336   : > { %6258 = vmatmul.mubr.msk.bf16.gmra.mrb[140].mxu0 %vm412_vm1, %v6499_v63  ;;  %v3071_v60 = vsel %vm793_vm2, %v2981_v23, %v2982_v36  ;;  %v2662_v30 = vsel %vm1504_vm3, %v2578_v33, %v2579_v0  ;;  %6152 = vmatmul.mubr.msk.bf16.gmra.mrb[140].mxu1 %vm412_vm1, %v6500_v12 }
 0x337   : > { %6261 = vmatprep.mubr.msk.bf16.mxu0 %vm6604_vm0, %v9194_v13  ;;  %v8297_v54 = vadd.f32 %v3071_v60, %v2675_v4  ;;  %6155 = vmatprep.mubr.msk.bf16.mxu1 %vm6604_vm0, %v9194_v13  ;;  %v2679_v43 = vadd.f32 %v2662_v30, %v7866_v15 }
 0x339   : > { %9223 = vst [vmem:[#allocation8_spill] sm:$0xff] %v8297_v54  ;;  %v2801_v27 = vpop.f32.mrb[36].mxu0  ;;  %v2404_v63 = vpop.f32.mrb[36].mxu1 }
 0x33a   : > { %v2983_v23 = vrot.slane %v2801_v27, 7  ;;  %v6043_v47 = vpop.f32.mrb[37].mxu0  ;;  %v2580_v18 = vrot.slane %v2404_v63, 1  ;;  %v5937_v51 = vpop.f32.mrb[37].mxu1 }
 0x33b   : > { %v2804_v33 = vpop.f32.mrb[38].mxu0  ;;  %v2407_v61 = vpop.f32.mrb[38].mxu1 }
 0x33c   : > { %v2984_v9 = vrot.slane %v2804_v33, 7  ;;  %v6044_v37 = vpop.f32.mrb[39].mxu0  ;;  %v3070_v46 = vsel %vm793_vm2, %v2982_v36, %v2983_v23  ;;  %v2661_v4 = vsel %vm1504_vm3, %v2579_v0, %v2580_v18  ;;  %v2581_v5 = vrot.slane %v2407_v61, 1  ;;  %v5938_v60 = vpop.f32.mrb[39].mxu1 }
 0x33d   : > { %v8306_v54 = vadd.f32 %v3070_v46, %v2676_v56  ;;  %v2680_v30 = vadd.f32 %v2661_v4, %v7868_v59  ;;  %v6501_v4 = vld [vmem:[%s6702_s7 + $0x30] sm:$0xff]  }
 0x33e   : > { %6262 = vmatmul.mubr.msk.bf16.gmra.mrb[144].mxu0 %vm412_vm1, %v6500_v12  ;;  %v3069_v15 = vsel %vm793_vm2, %v2983_v23, %v2984_v9  ;;  %v2660_v27 = vsel %vm1504_vm3, %v2580_v18, %v2581_v5  ;;  %6156 = vmatmul.mubr.msk.bf16.gmra.mrb[144].mxu1 %vm412_vm1, %v7890_v48 }
 0x33f   : > { %6265 = vmatprep.mubr.msk.bf16.mxu0 %vm6604_vm0, %v9194_v13  ;;  %v8318_v36 = vadd.f32 %v3069_v15, %v2677_v25  ;;  %6159 = vmatprep.mubr.msk.bf16.mxu1 %vm6604_vm0, %v9194_v13  ;;  %v2681_v56 = vadd.f32 %v2660_v27, %v7883_v7 }
 0x341   : > { %v2809_v0 = vpop.f32.mrb[40].mxu0  ;;  %v2412_v12 = vpop.f32.mrb[40].mxu1 }
 0x342   : > { %v2985_v59 = vrot.slane %v2809_v0, 7  ;;  %v6047_v63 = vpop.f32.mrb[41].mxu0  ;;  %v2582_v23 = vrot.slane %v2412_v12, 1  ;;  %v5941_v47 = vpop.f32.mrb[41].mxu1 }
 0x343   : > { %v2812_v18 = vpop.f32.mrb[42].mxu0  ;;  %v2415_v51 = vpop.f32.mrb[42].mxu1 }
 0x344   : > { %v2986_v48 = vrot.slane %v2812_v18, 7  ;;  %v6048_v33 = vpop.f32.mrb[43].mxu0  ;;  %v3068_v25 = vsel %vm793_vm2, %v2984_v9, %v2985_v59  ;;  %v2659_v61 = vsel %vm1504_vm3, %v2581_v5, %v2582_v23  ;;  %v2583_v37 = vrot.slane %v2415_v51, 1  ;;  %v5942_v46 = vpop.f32.mrb[43].mxu1 }
 0x345   : > { %v8327_v7 = vadd.f32 %v3068_v25, %v2678_v53  ;;  %v2682_v15 = vadd.f32 %v2659_v61, %v7885_v45  ;;  %v6502_v61 = vld [vmem:[%s6702_s7 + $0x38] sm:$0xff]  }
 0x346   : > { %6266 = vmatmul.mubr.msk.bf16.gmra.mrb[148].mxu0 %vm412_vm1, %v6501_v4  ;;  %v3067_v60 = vsel %vm793_vm2, %v2985_v59, %v2986_v48  ;;  %v2658_v27 = vsel %vm1504_vm3, %v2582_v23, %v2583_v37  ;;  %6160 = vmatmul.mubr.msk.bf16.gmra.mrb[148].mxu1 %vm412_vm1, %v7911_v8 }
 0x347   : > { %6269 = vmatprep.mubr.msk.bf16.mxu0 %vm6604_vm0, %v9194_v13  ;;  %v8340_v9 = vadd.f32 %v3067_v60, %v2679_v43  ;;  %6163 = vmatprep.mubr.msk.bf16.mxu1 %vm6604_vm0, %v9194_v13  ;;  %v2683_v53 = vadd.f32 %v2658_v27, %v7904_v32  ;;  %v6503_v27 = vld [vmem:[%s6702_s7 + $0x40] sm:$0xff]  }
 0x349   : > { %v2817_v5 = vpop.f32.mrb[44].mxu0  ;;  %v2420_v0 = vpop.f32.mrb[44].mxu1 }
 0x34a   : > { %v2987_v45 = vrot.slane %v2817_v5, 7  ;;  %v6051_v12 = vpop.f32.mrb[45].mxu0  ;;  %v2584_v59 = vrot.slane %v2420_v0, 1  ;;  %v5945_v63 = vpop.f32.mrb[45].mxu1 }
 0x34b   : > { %v2820_v23 = vpop.f32.mrb[46].mxu0  ;;  %v2423_v8 = vpop.f32.mrb[46].mxu1 }
 0x34c   : > { %v2988_v47 = vrot.slane %v2820_v23, 7  ;;  %v6052_v18 = vpop.f32.mrb[47].mxu0  ;;  %v3066_v43 = vsel %vm793_vm2, %v2986_v48, %v2987_v45  ;;  %v2657_v51 = vsel %vm1504_vm3, %v2583_v37, %v2584_v59  ;;  %v2585_v33 = vrot.slane %v2423_v8, 1  ;;  %v5946_v32 = vpop.f32.mrb[47].mxu1 }
 0x34d   : > { %v8349_v25 = vadd.f32 %v3066_v43, %v2680_v30  ;;  %v2684_v4 = vadd.f32 %v2657_v51, %v7906_v39 }
 0x34e   : > { %6270 = vmatmul.mubr.msk.bf16.gmra.mrb[152].mxu0 %vm412_vm1, %v6502_v61  ;;  %v3065_v46 = vsel %vm793_vm2, %v2987_v45, %v2988_v47  ;;  %v2656_v60 = vsel %vm1504_vm3, %v2584_v59, %v2585_v33  ;;  %6164 = vmatmul.mubr.msk.bf16.gmra.mrb[152].mxu1 %vm412_vm1, %v6503_v27 }
 0x34f   : > { %6273 = vmatprep.mubr.msk.bf16.mxu0 %vm6604_vm0, %v9194_v13  ;;  %v8362_v48 = vadd.f32 %v3065_v46, %v2681_v56  ;;  %6167 = vmatprep.mubr.msk.bf16.mxu1 %vm6604_vm0, %v9194_v13  ;;  %v2685_v30 = vadd.f32 %v2656_v60, %v7925_v49  ;;  %v6504_v60 = vld [vmem:[%s6702_s7 + $0x48] sm:$0xff]  }
 0x351   : > { %v2825_v37 = vpop.f32.mrb[48].mxu0  ;;  %v2428_v5 = vpop.f32.mrb[48].mxu1 }
 0x352   : > { %v2989_v0 = vrot.slane %v2825_v37, 7  ;;  %v6055_v39 = vpop.f32.mrb[49].mxu0  ;;  %v2586_v45 = vrot.slane %v2428_v5, 1  ;;  %v5949_v12 = vpop.f32.mrb[49].mxu1 }
 0x353   : > { %v2828_v59 = vpop.f32.mrb[50].mxu0  ;;  %v2431_v63 = vpop.f32.mrb[50].mxu1 }
 0x354   : > { %v2990_v23 = vrot.slane %v2828_v59, 7  ;;  %v6056_v8 = vpop.f32.mrb[51].mxu0  ;;  %v3064_v56 = vsel %vm793_vm2, %v2988_v47, %v2989_v0  ;;  %v2655_v18 = vsel %vm1504_vm3, %v2585_v33, %v2586_v45  ;;  %v2587_v43 = vrot.slane %v2431_v63, 1  ;;  %v5950_v51 = vpop.f32.mrb[51].mxu1 }
 0x355   : > { %v8371_v49 = vadd.f32 %v3064_v56, %v2682_v15  ;;  %v2686_v61 = vadd.f32 %v2655_v18, %v7927_v17 }
 0x356   : > { %6274 = vmatmul.mubr.msk.bf16.gmra.mrb[156].mxu0 %vm412_vm1, %v6503_v27  ;;  %v3063_v32 = vsel %vm793_vm2, %v2989_v0, %v2990_v23  ;;  %v2654_v46 = vsel %vm1504_vm3, %v2586_v45, %v2587_v43  ;;  %6168 = vmatmul.mubr.msk.bf16.gmra.mrb[156].mxu1 %vm412_vm1, %v6504_v60 }
 0x357   : > { %6277 = vmatprep.mubr.msk.bf16.mxu0 %vm6604_vm0, %v9194_v13  ;;  %v8383_v47 = vadd.f32 %v3063_v32, %v2683_v53  ;;  %6171 = vmatprep.mubr.msk.bf16.mxu1 %vm6604_vm0, %v9194_v13  ;;  %v2687_v15 = vadd.f32 %v2654_v46, %v7942_v11  ;;  %v6505_v46 = vld [vmem:[%s6702_s7 + $0x50] sm:$0xff]  }
 0x359   : > { %v2833_v33 = vpop.f32.mrb[52].mxu0  ;;  %v2436_v27 = vpop.f32.mrb[52].mxu1 }
 0x35a   : > { %v2991_v37 = vrot.slane %v2833_v33, 7  ;;  %v6059_v17 = vpop.f32.mrb[53].mxu0  ;;  %v2588_v5 = vrot.slane %v2436_v27, 1  ;;  %v5953_v0 = vpop.f32.mrb[53].mxu1 }
 0x35b   : > { %v2836_v39 = vpop.f32.mrb[54].mxu0  ;;  %v2439_v45 = vpop.f32.mrb[54].mxu1 }
 0x35c   : > { %v2992_v12 = vrot.slane %v2836_v39, 7  ;;  %v6060_v59 = vpop.f32.mrb[55].mxu0  ;;  %v3062_v53 = vsel %vm793_vm2, %v2990_v23, %v2991_v37  ;;  %v2653_v63 = vsel %vm1504_vm3, %v2587_v43, %v2588_v5  ;;  %v2589_v8 = vrot.slane %v2439_v45, 1  ;;  %v5954_v56 = vpop.f32.mrb[55].mxu1 }
 0x35d   : > { %v8392_v11 = vadd.f32 %v3062_v53, %v2684_v4  ;;  %v2688_v51 = vadd.f32 %v2653_v63, %v7944_v1 }
 0x35e   : > { %6278 = vmatmul.mubr.msk.bf16.gmra.mrb[160].mxu0 %vm412_vm1, %v6504_v60  ;;  %v3061_v18 = vsel %vm793_vm2, %v2991_v37, %v2992_v12  ;;  %v2652_v32 = vsel %vm1504_vm3, %v2588_v5, %v2589_v8  ;;  %6172 = vmatmul.mubr.msk.bf16.gmra.mrb[160].mxu1 %vm412_vm1, %v6505_v46 }
 0x35f   : > { %6281 = vmatprep.mubr.msk.bf16.mxu0 %vm6604_vm0, %v9194_v13  ;;  %v8404_v23 = vadd.f32 %v3061_v18, %v2685_v30  ;;  %6175 = vmatprep.mubr.msk.bf16.mxu1 %vm6604_vm0, %v9194_v13  ;;  %v2689_v4 = vadd.f32 %v2652_v32, %v7959_v3  ;;  %v6506_v32 = vld [vmem:[%s6702_s7 + $0x58] sm:$0xff]  }
 0x361   : > { %v2841_v43 = vpop.f32.mrb[56].mxu0  ;;  %v2444_v60 = vpop.f32.mrb[56].mxu1 }
 0x362   : > { %v2993_v33 = vrot.slane %v2841_v43, 7  ;;  %v6063_v1 = vpop.f32.mrb[57].mxu0  ;;  %v2590_v27 = vrot.slane %v2444_v60, 1  ;;  %v5957_v37 = vpop.f32.mrb[57].mxu1 }
 0x363   : > { %v2844_v17 = vpop.f32.mrb[58].mxu0  ;;  %v2447_v5 = vpop.f32.mrb[58].mxu1 }
 0x364   : > { %v2994_v0 = vrot.slane %v2844_v17, 7  ;;  %v6064_v39 = vpop.f32.mrb[59].mxu0  ;;  %v3060_v30 = vsel %vm793_vm2, %v2992_v12, %v2993_v33  ;;  %v2651_v45 = vsel %vm1504_vm3, %v2589_v8, %v2590_v27  ;;  %v2591_v59 = vrot.slane %v2447_v5, 1  ;;  %v5958_v53 = vpop.f32.mrb[59].mxu1 }
 0x365   : > { %v8413_v3 = vadd.f32 %v3060_v30, %v2686_v61  ;;  %v2690_v56 = vadd.f32 %v2651_v45, %v7961_v14 }
 0x366   : > { %6282 = vmatmul.mubr.msk.bf16.gmra.mrb[164].mxu0 %vm412_vm1, %v6505_v46  ;;  %v3059_v63 = vsel %vm793_vm2, %v2993_v33, %v2994_v0  ;;  %v2650_v18 = vsel %vm1504_vm3, %v2590_v27, %v2591_v59  ;;  %6176 = vmatmul.mubr.msk.bf16.gmra.mrb[164].mxu1 %vm412_vm1, %v6506_v32 }
 0x367   : > { %6285 = vmatprep.mubr.msk.bf16.mxu0 %vm6604_vm0, %v9194_v13  ;;  %v8425_v12 = vadd.f32 %v3059_v63, %v2687_v15  ;;  %6179 = vmatprep.mubr.msk.bf16.mxu1 %vm6604_vm0, %v9194_v13  ;;  %v2691_v61 = vadd.f32 %v2650_v18, %v7976_v52  ;;  %v6507_v18 = vld [vmem:[%s6702_s7 + $0x60] sm:$0xff]  }
 0x369   : > { %v2849_v8 = vpop.f32.mrb[60].mxu0  ;;  %v2452_v46 = vpop.f32.mrb[60].mxu1 }
 0x36a   : > { %v2995_v43 = vrot.slane %v2849_v8, 7  ;;  %v6067_v14 = vpop.f32.mrb[61].mxu0  ;;  %v2592_v60 = vrot.slane %v2452_v46, 1  ;;  %v5961_v33 = vpop.f32.mrb[61].mxu1 }
 0x36b   : > { %v2852_v1 = vpop.f32.mrb[62].mxu0  ;;  %v2455_v27 = vpop.f32.mrb[62].mxu1 }
 0x36c   : > { %v2996_v37 = vrot.slane %v2852_v1, 7  ;;  %v6068_v17 = vpop.f32.mrb[63].mxu0  ;;  %v3058_v15 = vsel %vm793_vm2, %v2994_v0, %v2995_v43  ;;  %v2649_v5 = vsel %vm1504_vm3, %v2591_v59, %v2592_v60  ;;  %v2593_v39 = vrot.slane %v2455_v27, 1  ;;  %v5962_v30 = vpop.f32.mrb[63].mxu1 }
 0x36d   : > { %v8434_v52 = vadd.f32 %v3058_v15, %v2688_v51  ;;  %v2692_v53 = vadd.f32 %v2649_v5, %v7978_v50 }
 0x36e   : > { %6286 = vmatmul.mubr.msk.bf16.gmra.mrb[168].mxu0 %vm412_vm1, %v6506_v32  ;;  %v3057_v45 = vsel %vm793_vm2, %v2995_v43, %v2996_v37  ;;  %v2648_v63 = vsel %vm1504_vm3, %v2592_v60, %v2593_v39  ;;  %6180 = vmatmul.mubr.msk.bf16.gmra.mrb[168].mxu1 %vm412_vm1, %v6507_v18 }
 0x36f   : > { %6289 = vmatprep.mubr.msk.bf16.mxu0 %vm6604_vm0, %v9194_v13  ;;  %v8446_v0 = vadd.f32 %v3057_v45, %v2689_v4  ;;  %6183 = vmatprep.mubr.msk.bf16.mxu1 %vm6604_vm0, %v9194_v13  ;;  %v2693_v51 = vadd.f32 %v2648_v63, %v7993_v31  ;;  %v6508_v63 = vld [vmem:[%s6702_s7 + $0x68] sm:$0xff]  }
 0x371   : > { %v2857_v59 = vpop.f32.mrb[64].mxu0  ;;  %v2460_v32 = vpop.f32.mrb[64].mxu1 }
 0x372   : > { %v2997_v8 = vrot.slane %v2857_v59, 7  ;;  %v6071_v50 = vpop.f32.mrb[65].mxu0  ;;  %v2594_v46 = vrot.slane %v2460_v32, 1  ;;  %v5965_v43 = vpop.f32.mrb[65].mxu1 }
 0x373   : > { %v2860_v14 = vpop.f32.mrb[66].mxu0  ;;  %v2463_v60 = vpop.f32.mrb[66].mxu1 }
 0x374   : > { %v2998_v33 = vrot.slane %v2860_v14, 7  ;;  %v6072_v1 = vpop.f32.mrb[67].mxu0  ;;  %v3056_v4 = vsel %vm793_vm2, %v2996_v37, %v2997_v8  ;;  %v2647_v27 = vsel %vm1504_vm3, %v2593_v39, %v2594_v46  ;;  %v2595_v17 = vrot.slane %v2463_v60, 1  ;;  %v5966_v15 = vpop.f32.mrb[67].mxu1 }
 0x375   : > { %v8455_v31 = vadd.f32 %v3056_v4, %v2690_v56  ;;  %v2694_v30 = vadd.f32 %v2647_v27, %v7995_v35 }
 0x376   : > { %6290 = vmatmul.mubr.msk.bf16.gmra.mrb[172].mxu0 %vm412_vm1, %v6507_v18  ;;  %v3055_v5 = vsel %vm793_vm2, %v2997_v8, %v2998_v33  ;;  %v2646_v45 = vsel %vm1504_vm3, %v2594_v46, %v2595_v17  ;;  %6184 = vmatmul.mubr.msk.bf16.gmra.mrb[172].mxu1 %vm412_vm1, %v6508_v63 }
 0x377   : > { %6293 = vmatprep.mubr.msk.bf16.mxu0 %vm6604_vm0, %v9194_v13  ;;  %v8467_v37 = vadd.f32 %v3055_v5, %v2691_v61  ;;  %6187 = vmatprep.mubr.msk.bf16.mxu1 %vm6604_vm0, %v9194_v13  ;;  %v2695_v56 = vadd.f32 %v2646_v45, %v8010_v16  ;;  %v6509_v45 = vld [vmem:[%s6702_s7 + $0x70] sm:$0xff]  }
 0x379   : > { %v2865_v39 = vpop.f32.mrb[68].mxu0  ;;  %v2468_v18 = vpop.f32.mrb[68].mxu1 }
 0x37a   : > { %v2999_v59 = vrot.slane %v2865_v39, 7  ;;  %v6075_v35 = vpop.f32.mrb[69].mxu0  ;;  %v2596_v32 = vrot.slane %v2468_v18, 1  ;;  %v5969_v8 = vpop.f32.mrb[69].mxu1 }
 0x37b   : > { %v2868_v50 = vpop.f32.mrb[70].mxu0  ;;  %v2471_v46 = vpop.f32.mrb[70].mxu1 }
 0x37c   : > { %v3000_v43 = vrot.slane %v2868_v50, 7  ;;  %v6076_v14 = vpop.f32.mrb[71].mxu0  ;;  %v3054_v61 = vsel %vm793_vm2, %v2998_v33, %v2999_v59  ;;  %v2645_v60 = vsel %vm1504_vm3, %v2595_v17, %v2596_v32  ;;  %v2597_v1 = vrot.slane %v2471_v46, 1  ;;  %v5970_v4 = vpop.f32.mrb[71].mxu1 }
 0x37d   : > { %v8476_v16 = vadd.f32 %v3054_v61, %v2692_v53  ;;  %v2696_v15 = vadd.f32 %v2645_v60, %v8012_v58 }
 0x37e   : > { %6294 = vmatmul.mubr.msk.bf16.gmra.mrb[176].mxu0 %vm412_vm1, %v6508_v63  ;;  %v3053_v27 = vsel %vm793_vm2, %v2999_v59, %v3000_v43  ;;  %v2644_v5 = vsel %vm1504_vm3, %v2596_v32, %v2597_v1  ;;  %6188 = vmatmul.mubr.msk.bf16.gmra.mrb[176].mxu1 %vm412_vm1, %v6509_v45 }
 0x37f   : > { %6297 = vmatprep.mubr.msk.bf16.mxu0 %vm6604_vm0, %v9194_v13  ;;  %v8488_v33 = vadd.f32 %v3053_v27, %v2693_v51  ;;  %6191 = vmatprep.mubr.msk.bf16.mxu1 %vm6604_vm0, %v9194_v13  ;;  %v2697_v53 = vadd.f32 %v2644_v5, %v8027_v41  ;;  %v6510_v5 = vld [vmem:[%s6702_s7 + $0x78] sm:$0xff]  }
 0x381   : > { %v2873_v17 = vpop.f32.mrb[72].mxu0  ;;  %v2476_v63 = vpop.f32.mrb[72].mxu1 }
 0x382   : > { %v3001_v39 = vrot.slane %v2873_v17, 7  ;;  %v6079_v58 = vpop.f32.mrb[73].mxu0  ;;  %v2598_v18 = vrot.slane %v2476_v63, 1  ;;  %v5973_v59 = vpop.f32.mrb[73].mxu1 }
 0x383   : > { %v2876_v35 = vpop.f32.mrb[74].mxu0  ;;  %v2479_v32 = vpop.f32.mrb[74].mxu1 }
 0x384   : > { %v3002_v8 = vrot.slane %v2876_v35, 7  ;;  %v6080_v50 = vpop.f32.mrb[75].mxu0  ;;  %v3052_v51 = vsel %vm793_vm2, %v3000_v43, %v3001_v39  ;;  %v2643_v46 = vsel %vm1504_vm3, %v2597_v1, %v2598_v18  ;;  %v2599_v14 = vrot.slane %v2479_v32, 1  ;;  %v5974_v61 = vpop.f32.mrb[75].mxu1 }
 0x385   : > { %v8497_v41 = vadd.f32 %v3052_v51, %v2694_v30  ;;  %v2698_v4 = vadd.f32 %v2643_v46, %v8029_v2 }
 0x386   : > { %6298 = vmatmul.mubr.msk.bf16.gmra.mrb[180].mxu0 %vm412_vm1, %v6509_v45  ;;  %v3051_v60 = vsel %vm793_vm2, %v3001_v39, %v3002_v8  ;;  %v2642_v27 = vsel %vm1504_vm3, %v2598_v18, %v2599_v14  ;;  %6192 = vmatmul.mubr.msk.bf16.gmra.mrb[180].mxu1 %vm412_vm1, %v6510_v5 }
 0x387   : > { %6301 = vmatprep.mubr.msk.bf16.mxu0 %vm6604_vm0, %v9194_v13  ;;  %v8509_v43 = vadd.f32 %v3051_v60, %v2695_v56  ;;  %6195 = vmatprep.mubr.msk.bf16.mxu1 %vm6604_vm0, %v9194_v13  ;;  %v2699_v30 = vadd.f32 %v2642_v27, %v8044_v55  ;;  %v6511_v27 = vld [vmem:[%s6702_s7 + $0x80] sm:$0xff]  }
 0x389   : > { %v2881_v1 = vpop.f32.mrb[76].mxu0  ;;  %v2484_v45 = vpop.f32.mrb[76].mxu1 }
 0x38a   : > { %v3003_v17 = vrot.slane %v2881_v1, 7  ;;  %v6083_v2 = vpop.f32.mrb[77].mxu0  ;;  %v2600_v63 = vrot.slane %v2484_v45, 1  ;;  %v5977_v39 = vpop.f32.mrb[77].mxu1 }
 0x38b   : > { %v2884_v58 = vpop.f32.mrb[78].mxu0  ;;  %v2487_v18 = vpop.f32.mrb[78].mxu1 }
 0x38c   : > { %v3004_v59 = vrot.slane %v2884_v58, 7  ;;  %v6084_v35 = vpop.f32.mrb[79].mxu0  ;;  %v3050_v56 = vsel %vm793_vm2, %v3002_v8, %v3003_v17  ;;  %v2641_v32 = vsel %vm1504_vm3, %v2599_v14, %v2600_v63  ;;  %v2601_v50 = vrot.slane %v2487_v18, 1  ;;  %v5978_v51 = vpop.f32.mrb[79].mxu1 }
 0x38d   : > { %v8518_v55 = vadd.f32 %v3050_v56, %v2696_v15  ;;  %v2700_v61 = vadd.f32 %v2641_v32, %v8046_v28 }
 0x38e   : > { %6302 = vmatmul.mubr.msk.bf16.gmra.mrb[184].mxu0 %vm412_vm1, %v6510_v5  ;;  %v3049_v46 = vsel %vm793_vm2, %v3003_v17, %v3004_v59  ;;  %v2640_v60 = vsel %vm1504_vm3, %v2600_v63, %v2601_v50  ;;  %6196 = vmatmul.mubr.msk.bf16.gmra.mrb[184].mxu1 %vm412_vm1, %v6511_v27 }
 0x38f   : > { %6305 = vmatprep.mubr.msk.bf16.mxu0 %vm6604_vm0, %v9194_v13  ;;  %v8530_v8 = vadd.f32 %v3049_v46, %v2697_v53  ;;  %6199 = vmatprep.mubr.msk.bf16.mxu1 %vm6604_vm0, %v9194_v13  ;;  %v2701_v15 = vadd.f32 %v2640_v60, %v8061_v19  ;;  %v6512_v60 = vld [vmem:[%s6702_s7 + $0x88] sm:$0xff]  }
 0x391   : > { %v2889_v14 = vpop.f32.mrb[80].mxu0  ;;  %v2492_v5 = vpop.f32.mrb[80].mxu1 }
 0x392   : > { %v3005_v1 = vrot.slane %v2889_v14, 7  ;;  %v6087_v28 = vpop.f32.mrb[81].mxu0  ;;  %v2602_v45 = vrot.slane %v2492_v5, 1  ;;  %v5981_v17 = vpop.f32.mrb[81].mxu1 }
 0x393   : > { %v2892_v2 = vpop.f32.mrb[82].mxu0  ;;  %v2495_v63 = vpop.f32.mrb[82].mxu1 }
 0x394   : > { %v3006_v39 = vrot.slane %v2892_v2, 7  ;;  %v6088_v58 = vpop.f32.mrb[83].mxu0  ;;  %v3048_v53 = vsel %vm793_vm2, %v3004_v59, %v3005_v1  ;;  %v2639_v18 = vsel %vm1504_vm3, %v2601_v50, %v2602_v45  ;;  %v2603_v35 = vrot.slane %v2495_v63, 1  ;;  %v5982_v56 = vpop.f32.mrb[83].mxu1 }
 0x395   : > { %v8539_v19 = vadd.f32 %v3048_v53, %v2698_v4  ;;  %v2702_v51 = vadd.f32 %v2639_v18, %v8063_v10 }
 0x396   : > { %6306 = vmatmul.mubr.msk.bf16.gmra.mrb[188].mxu0 %vm412_vm1, %v6511_v27  ;;  %v3047_v32 = vsel %vm793_vm2, %v3005_v1, %v3006_v39  ;;  %v2638_v46 = vsel %vm1504_vm3, %v2602_v45, %v2603_v35  ;;  %6200 = vmatmul.mubr.msk.bf16.gmra.mrb[188].mxu1 %vm412_vm1, %v6512_v60 }
 0x397   : > { %6309 = vmatprep.mubr.msk.bf16.mxu0 %vm6604_vm0, %v9194_v13  ;;  %v8551_v59 = vadd.f32 %v3047_v32, %v2699_v30  ;;  %6203 = vmatprep.mubr.msk.bf16.mxu1 %vm6604_vm0, %v9194_v13  ;;  %v2703_v4 = vadd.f32 %v2638_v46, %v8078_v24  ;;  %v6513_v46 = vld [vmem:[%s6702_s7 + $0x90] sm:$0xff]  }
 0x399   : > { %v2897_v50 = vpop.f32.mrb[84].mxu0  ;;  %v2500_v27 = vpop.f32.mrb[84].mxu1 }
 0x39a   : > { %v3007_v14 = vrot.slane %v2897_v50, 7  ;;  %v6091_v10 = vpop.f32.mrb[85].mxu0  ;;  %v2604_v5 = vrot.slane %v2500_v27, 1  ;;  %v5985_v1 = vpop.f32.mrb[85].mxu1 }
 0x39b   : > { %v2900_v28 = vpop.f32.mrb[86].mxu0  ;;  %v2503_v45 = vpop.f32.mrb[86].mxu1 }
 0x39c   : > { %v3008_v17 = vrot.slane %v2900_v28, 7  ;;  %v6092_v2 = vpop.f32.mrb[87].mxu0  ;;  %v3046_v30 = vsel %vm793_vm2, %v3006_v39, %v3007_v14  ;;  %v2637_v63 = vsel %vm1504_vm3, %v2603_v35, %v2604_v5  ;;  %v2605_v58 = vrot.slane %v2503_v45, 1  ;;  %v5986_v53 = vpop.f32.mrb[87].mxu1 }
 0x39d   : > { %v8560_v24 = vadd.f32 %v3046_v30, %v2700_v61  ;;  %v2704_v56 = vadd.f32 %v2637_v63, %v8080_v29 }
 0x39e   : > { %6310 = vmatmul.mubr.msk.bf16.gmra.mrb[192].mxu0 %vm412_vm1, %v6512_v60  ;;  %v3045_v18 = vsel %vm793_vm2, %v3007_v14, %v3008_v17  ;;  %v2636_v32 = vsel %vm1504_vm3, %v2604_v5, %v2605_v58  ;;  %6204 = vmatmul.mubr.msk.bf16.gmra.mrb[192].mxu1 %vm412_vm1, %v6513_v46 }
 0x39f   : > { %6313 = vmatprep.mubr.msk.bf16.mxu0 %vm6604_vm0, %v9194_v13  ;;  %v8572_v39 = vadd.f32 %v3045_v18, %v2701_v15  ;;  %6207 = vmatprep.mubr.msk.bf16.mxu1 %vm6604_vm0, %v9194_v13  ;;  %v2705_v61 = vadd.f32 %v2636_v32, %v8095_v26  ;;  %v6514_v32 = vld [vmem:[%s6702_s7 + $0x98] sm:$0xff]  }
 0x3a1   : > { %v2905_v35 = vpop.f32.mrb[88].mxu0  ;;  %v2508_v60 = vpop.f32.mrb[88].mxu1 }
 0x3a2   : > { %v3009_v50 = vrot.slane %v2905_v35, 7  ;;  %v6095_v29 = vpop.f32.mrb[89].mxu0  ;;  %v2606_v27 = vrot.slane %v2508_v60, 1  ;;  %v5989_v14 = vpop.f32.mrb[89].mxu1 }
 0x3a3   : > { %v2908_v10 = vpop.f32.mrb[90].mxu0  ;;  %v2511_v5 = vpop.f32.mrb[90].mxu1 }
 0x3a4   : > { %v3010_v1 = vrot.slane %v2908_v10, 7  ;;  %v6096_v28 = vpop.f32.mrb[91].mxu0  ;;  %v3044_v15 = vsel %vm793_vm2, %v3008_v17, %v3009_v50  ;;  %v2635_v45 = vsel %vm1504_vm3, %v2605_v58, %v2606_v27  ;;  %v2607_v2 = vrot.slane %v2511_v5, 1  ;;  %v5990_v30 = vpop.f32.mrb[91].mxu1 }
 0x3a5   : > { %v8581_v26 = vadd.f32 %v3044_v15, %v2702_v51  ;;  %v2706_v53 = vadd.f32 %v2635_v45, %v8097_v40 }
 0x3a6   : > { %6314 = vmatmul.mubr.msk.bf16.gmra.mrb[196].mxu0 %vm412_vm1, %v6513_v46  ;;  %v3043_v63 = vsel %vm793_vm2, %v3009_v50, %v3010_v1  ;;  %v2634_v18 = vsel %vm1504_vm3, %v2606_v27, %v2607_v2  ;;  %6208 = vmatmul.mubr.msk.bf16.gmra.mrb[196].mxu1 %vm412_vm1, %v6514_v32 }
 0x3a7   : > { %6317 = vmatprep.mubr.msk.bf16.mxu0 %vm6604_vm0, %v9194_v13  ;;  %v8593_v17 = vadd.f32 %v3043_v63, %v2703_v4  ;;  %6211 = vmatprep.mubr.msk.bf16.mxu1 %vm6604_vm0, %v9194_v13  ;;  %v2707_v51 = vadd.f32 %v2634_v18, %v8112_v22  ;;  %v6515_v18 = vld [vmem:[%s6702_s7 + $0xa0] sm:$0xff]  }
 0x3a9   : > { %v2913_v58 = vpop.f32.mrb[92].mxu0  ;;  %v2516_v46 = vpop.f32.mrb[92].mxu1 }
 0x3aa   : > { %v3011_v35 = vrot.slane %v2913_v58, 7  ;;  %v6099_v40 = vpop.f32.mrb[93].mxu0  ;;  %v2608_v60 = vrot.slane %v2516_v46, 1  ;;  %v5993_v50 = vpop.f32.mrb[93].mxu1 }
 0x3ab   : > { %v2916_v29 = vpop.f32.mrb[94].mxu0  ;;  %v2519_v27 = vpop.f32.mrb[94].mxu1 }
 0x3ac   : > { %v3012_v14 = vrot.slane %v2916_v29, 7  ;;  %v6100_v10 = vpop.f32.mrb[95].mxu0  ;;  %v3042_v4 = vsel %vm793_vm2, %v3010_v1, %v3011_v35  ;;  %v2633_v5 = vsel %vm1504_vm3, %v2607_v2, %v2608_v60  ;;  %v2609_v28 = vrot.slane %v2519_v27, 1  ;;  %v5994_v15 = vpop.f32.mrb[95].mxu1 }
 0x3ad   : > { %v8602_v22 = vadd.f32 %v3042_v4, %v2704_v56  ;;  %v2708_v30 = vadd.f32 %v2633_v5, %v8114_v21  ;;  %v9224_v56 = vld [vmem:[#allocation10_spill] sm:$0xff] }
 0x3ae   : > { %6318 = vmatmul.mubr.msk.bf16.gmra.mrb[200].mxu0 %vm412_vm1, %v6514_v32  ;;  %v3041_v45 = vsel %vm793_vm2, %v3011_v35, %v3012_v14  ;;  %v2632_v63 = vsel %vm1504_vm3, %v2608_v60, %v2609_v28  ;;  %6212 = vmatmul.mubr.msk.bf16.gmra.mrb[200].mxu1 %vm412_vm1, %v6515_v18 }
 0x3af   : > { %6321 = vmatprep.mubr.msk.bf16.mxu0 %vm6604_vm0, %v9194_v13  ;;  %v8614_v1 = vadd.f32 %v3041_v45, %v2705_v61  ;;  %6215 = vmatprep.mubr.msk.bf16.mxu1 %vm6604_vm0, %v9194_v13  ;;  %v2709_v2 = vadd.f32 %v2632_v63, %v9224_v56  ;;  %v9225_v63 = vld [vmem:[#allocation11_spill] sm:$0xff] }
 0x3b1   : > { %v2921_v32 = vpop.f32.mrb[96].mxu0  ;;  %v2524_v58 = vpop.f32.mrb[96].mxu1 }
 0x3b2   : > { %v3013_v46 = vrot.slane %v2921_v32, 7  ;;  %v6103_v21 = vpop.f32.mrb[97].mxu0  ;;  %v2610_v35 = vrot.slane %v2524_v58, 1  ;;  %v5997_v40 = vpop.f32.mrb[97].mxu1  ;;  %v6516_v58 = vld [vmem:[%s6702_s7 + $0xa8] sm:$0xff]  }
 0x3b3   : > { %v2924_v60 = vpop.f32.mrb[98].mxu0  ;;  %v2527_v50 = vpop.f32.mrb[98].mxu1 }
 0x3b4   : > { %v3014_v29 = vrot.slane %v2924_v60, 7  ;;  %v6104_v27 = vpop.f32.mrb[99].mxu0  ;;  %v3040_v61 = vsel %vm793_vm2, %v3012_v14, %v3013_v46  ;;  %v2631_v10 = vsel %vm1504_vm3, %v2609_v28, %v2610_v35  ;;  %v2611_v4 = vrot.slane %v2527_v50, 1  ;;  %v5998_v5 = vpop.f32.mrb[99].mxu1 }
 0x3b5   : > { %v8623_v15 = vadd.f32 %v3040_v61, %v2706_v53  ;;  %v2710_v56 = vadd.f32 %v2631_v10, %v9225_v63 }
 0x3b6   : > { %6322 = vmatmul.mubr.msk.bf16.gmra.mrb[204].mxu0 %vm412_vm1, %v6515_v18  ;;  %v3039_v45 = vsel %vm793_vm2, %v3013_v46, %v3014_v29  ;;  %v2630_v32 = vsel %vm1504_vm3, %v2610_v35, %v2611_v4  ;;  %6216 = vmatmul.mubr.msk.bf16.gmra.mrb[204].mxu1 %vm412_vm1, %v6516_v58 }
 0x3b7   : > { %6325 = vmatprep.mubr.msk.bf16.mxu0 %vm6604_vm0, %v9194_v13  ;;  %v8635_v14 = vadd.f32 %v3039_v45, %v2707_v51  ;;  %6219 = vmatprep.mubr.msk.bf16.mxu1 %vm6604_vm0, %v9194_v13  ;;  %v2711_v53 = vadd.f32 %v2630_v32, %v8146_v38  ;;  %v9226_v32 = vld [vmem:[#allocation12_spill] sm:$0xff] }
 0x3b9   : > { %v2929_v28 = vpop.f32.mrb[100].mxu0  ;;  %v2532_v18 = vpop.f32.mrb[100].mxu1 }
 0x3ba   : > { %v3015_v46 = vrot.slane %v2929_v28, 7  ;;  %v6107_v21 = vpop.f32.mrb[101].mxu0  ;;  %v2612_v40 = vrot.slane %v2532_v18, 1  ;;  %v6001_v35 = vpop.f32.mrb[101].mxu1 }
 0x3bb   : > { %v2932_v60 = vpop.f32.mrb[102].mxu0  ;;  %v2535_v50 = vpop.f32.mrb[102].mxu1  ;;  %v6517_v21 = vld [vmem:[%s6702_s7 + $0xb0] sm:$0xff]  }
 0x3bc   : > { %v3016_v27 = vrot.slane %v2932_v60, 7  ;;  %v6108_v61 = vpop.f32.mrb[103].mxu0  ;;  %v3038_v51 = vsel %vm793_vm2, %v3014_v29, %v3015_v46  ;;  %v2629_v10 = vsel %vm1504_vm3, %v2611_v4, %v2612_v40  ;;  %v2613_v5 = vrot.slane %v2535_v50, 1  ;;  %v6002_v45 = vpop.f32.mrb[103].mxu1 }
 0x3bd   : > { %v8644_v38 = vadd.f32 %v3038_v51, %v2708_v30  ;;  %v2712_v28 = vadd.f32 %v2629_v10, %v9226_v32 }
 0x3be   : > { %6326 = vmatmul.mubr.msk.bf16.gmra.mrb[208].mxu0 %vm412_vm1, %v6516_v58  ;;  %v3037_v63 = vsel %vm793_vm2, %v3015_v46, %v3016_v27  ;;  %v2628_v18 = vsel %vm1504_vm3, %v2612_v40, %v2613_v5  ;;  %6220 = vmatmul.mubr.msk.bf16.gmra.mrb[208].mxu1 %vm412_vm1, %v6517_v21 }
 0x3bf   : > { %6329 = vmatprep.mubr.msk.bf16.mxu0 %vm6604_vm0, %v9194_v13  ;;  %v8656_v29 = vadd.f32 %v3037_v63, %v2709_v2  ;;  %6223 = vmatprep.mubr.msk.bf16.mxu1 %vm6604_vm0, %v9194_v13  ;;  %v2713_v30 = vadd.f32 %v2628_v18, %v8163_v57 }
 0x3c1   : > { %v2937_v4 = vpop.f32.mrb[104].mxu0  ;;  %v2540_v58 = vpop.f32.mrb[104].mxu1 }
 0x3c2   : > { %v3017_v46 = vrot.slane %v2937_v4, 7  ;;  %v6111_v35 = vpop.f32.mrb[105].mxu0  ;;  %v2614_v60 = vrot.slane %v2540_v58, 1  ;;  %v6005_v40 = vpop.f32.mrb[105].mxu1 }
 0x3c3   : > { %v2940_v50 = vpop.f32.mrb[106].mxu0  ;;  %v2543_v61 = vpop.f32.mrb[106].mxu1  ;;  %v6518_v35 = vld [vmem:[%s6702_s7 + $0xb8] sm:$0xff]  }
 0x3c4   : > { %v3018_v51 = vrot.slane %v2940_v50, 7  ;;  %v6112_v10 = vpop.f32.mrb[107].mxu0  ;;  %v3036_v2 = vsel %vm793_vm2, %v3016_v27, %v3017_v46  ;;  %v2627_v45 = vsel %vm1504_vm3, %v2613_v5, %v2614_v60  ;;  %v2615_v63 = vrot.slane %v2543_v61, 1  ;;  %v6006_v32 = vpop.f32.mrb[107].mxu1 }
 0x3c5   : > { %v8665_v57 = vadd.f32 %v3036_v2, %v2710_v56  ;;  %v2714_v4 = vadd.f32 %v2627_v45, %v8165_v42 }
 0x3c6   : > { %6330 = vmatmul.mubr.msk.bf16.gmra.mrb[212].mxu0 %vm412_vm1, %v6517_v21  ;;  %v3035_v18 = vsel %vm793_vm2, %v3017_v46, %v3018_v51  ;;  %v2626_v58 = vsel %vm1504_vm3, %v2614_v60, %v2615_v63  ;;  %6224 = vmatmul.mubr.msk.bf16.gmra.mrb[212].mxu1 %vm412_vm1, %v6518_v35 }
 0x3c7   : > { %6333 = vmatprep.mubr.msk.bf16.mxu0 %vm6604_vm0, %v9194_v13  ;;  %v8677_v27 = vadd.f32 %v3035_v18, %v2711_v53  ;;  %6227 = vmatprep.mubr.msk.bf16.mxu1 %vm6604_vm0, %v9194_v13  ;;  %v2715_v56 = vadd.f32 %v2626_v58, %v8180_v62 }
 0x3c9   : > { %v2945_v5 = vpop.f32.mrb[108].mxu0  ;;  %v2548_v21 = vpop.f32.mrb[108].mxu1 }
 0x3ca   : > { %v3019_v46 = vrot.slane %v2945_v5, 7  ;;  %v6115_v42 = vpop.f32.mrb[109].mxu0  ;;  %v2616_v40 = vrot.slane %v2548_v21, 1  ;;  %v6009_v60 = vpop.f32.mrb[109].mxu1  ;;  %v9228_v5 = vld [vmem:[#allocation13_spill] sm:$0xff] }
 0x3cb   : > { %v2948_v50 = vpop.f32.mrb[110].mxu0  ;;  %v2551_v61 = vpop.f32.mrb[110].mxu1  ;;  %v6519_v60 = vld [vmem:[%s6702_s7 + $0xc0] sm:$0xff]  }
 0x3cc   : > { %v3020_v10 = vrot.slane %v2948_v50, 7  ;;  %v6116_v2 = vpop.f32.mrb[111].mxu0  ;;  %v3034_v53 = vsel %vm793_vm2, %v3018_v51, %v3019_v46  ;;  %v2625_v45 = vsel %vm1504_vm3, %v2615_v63, %v2616_v40  ;;  %v2617_v32 = vrot.slane %v2551_v61, 1  ;;  %v6010_v18 = vpop.f32.mrb[111].mxu1 }
 0x3cd   : > { %v8686_v62 = vadd.f32 %v3034_v53, %v2712_v28  ;;  %v2716_v21 = vadd.f32 %v2625_v45, %v9228_v5  ;;  %v9230_v28 = vld [vmem:[#allocation5_spill] sm:$0xff] }
 0x3ce   : > { %6334 = vmatmul.mubr.msk.bf16.gmra.mrb[216].mxu0 %vm412_vm1, %v6518_v35  ;;  %v3033_v58 = vsel %vm793_vm2, %v3019_v46, %v3020_v10  ;;  %v2624_v42 = vsel %vm1504_vm3, %v2616_v40, %v2617_v32  ;;  %6228 = vmatmul.mubr.msk.bf16.gmra.mrb[216].mxu1 %vm412_vm1, %v6519_v60 }
 0x3cf   : > { %9227 = vst [vmem:[#allocation9_spill] sm:$0xff] %v8686_v62  ;;  %6337 = vmatprep.mubr.msk.bf16.mxu0 %vm6604_vm0, %v9194_v13  ;;  %v8698_v51 = vadd.f32 %v3033_v58, %v2713_v30  ;;  %6231 = vmatprep.mubr.msk.bf16.mxu1 %vm6604_vm0, %v9194_v13  ;;  %v2717_v63 = vadd.f32 %v2624_v42, %v9230_v28 }
 0x3d1   : > { %9229 = vst [vmem:[#allocation10_spill] sm:$0xff] %v8698_v51  ;;  %v2953_v35 = vpop.f32.mrb[112].mxu0  ;;  %v2556_v46 = vpop.f32.mrb[112].mxu1 }
 0x3d2   : > { %v3021_v50 = vrot.slane %v2953_v35, 7  ;;  %v6119_v61 = vpop.f32.mrb[113].mxu0  ;;  %v2618_v2 = vrot.slane %v2556_v46, 1  ;;  %v6013_v40 = vpop.f32.mrb[113].mxu1  ;;  %v9231_v35 = vld [vmem:[#allocation6_spill] sm:$0xff] }
 0x3d3   : > { %v2956_v53 = vpop.f32.mrb[114].mxu0  ;;  %v2559_v45 = vpop.f32.mrb[114].mxu1  ;;  %v6520_v40 = vld [vmem:[%s6702_s7 + $0xc8] sm:$0xff]  }
 0x3d4   : > { %v3022_v18 = vrot.slane %v2956_v53, 7  ;;  %v6120_v5 = vpop.f32.mrb[115].mxu0  ;;  %v3032_v30 = vsel %vm793_vm2, %v3020_v10, %v3021_v50  ;;  %v2623_v58 = vsel %vm1504_vm3, %v2617_v32, %v2618_v2  ;;  %v2619_v51 = vrot.slane %v2559_v45, 1  ;;  %v6014_v62 = vpop.f32.mrb[115].mxu1 }
 0x3d5   : > { %v8707_v42 = vadd.f32 %v3032_v30, %v2714_v4  ;;  %v2718_v46 = vadd.f32 %v2623_v58, %v9231_v35  ;;  %v9232_v4 = vld [vmem:[#allocation7_spill] sm:$0xff] }
 0x3d6   : > { %6338 = vmatmul.mubr.msk.bf16.gmra.mrb[220].mxu0 %vm412_vm1, %v6519_v60  ;;  %v3031_v28 = vsel %vm793_vm2, %v3021_v50, %v3022_v18  ;;  %v2622_v61 = vsel %vm1504_vm3, %v2618_v2, %v2619_v51  ;;  %6232 = vmatmul.mubr.msk.bf16.gmra.mrb[220].mxu1 %vm412_vm1, %v6520_v40 }
 0x3d7   : > { %6341 = vmatprep.mubr.msk.bf16.mxu0 %vm6604_vm0, %v9194_v13  ;;  %v8719_v10 = vadd.f32 %v3031_v28, %v2715_v56  ;;  %6235 = vmatprep.mubr.msk.bf16.mxu1 %vm6604_vm0, %v9194_v13  ;;  %v2719_v32 = vadd.f32 %v2622_v61, %v9232_v4  ;;  %v6521_v61 = vld [vmem:[%s6702_s7 + $0xd0] sm:$0xff]   ;;  %s199_s7 = sand.u32 1, %s6585_s13  }
 0x3d8   : > { %s4677_s8 = sshll.u32 %s199_s7, 7  ;;  %s9129_s15 = scalar_lea.sflag [#allocation3], %s199_s7 }
 0x3d9   : > { %v2961_v62 = vpop.f32.mrb[116].mxu0  ;;  %v2564_v53 = vpop.f32.mrb[116].mxu1  ;;  %s8791_s9 = scalar_lea.vmem [#allocation2], %s4677_s8 }
 0x3da   : > { %v3023_v60 = vrot.slane %v2961_v62, 7  ;;  %v6123_v50 = vpop.f32.mrb[117].mxu0  ;;  %v6017_v51 = vpop.f32.mrb[117].mxu1  ;;  %s4571_s19 = sshll.u32 %s8791_s9, 4  ;;  %s9121_s19 = int_to_ptr.vmem [resolvable:$true] %s4571_s19 }
 0x3db   : > { %v2964_v45 = vpop.f32.mrb[118].mxu0  ;;  %v2567_v30 = vpop.f32.mrb[118].mxu1  ;;  %s6523_s27 = scalar_lea.vmem %s9121_s19, 2048  ;;  %p6530_p1 = scmp.lt.s32.totalorder %s9121_s19, %s6528_s29 }
 0x3dc   : > { %v3024_v2 = vrot.slane %v2964_v45, 7  ;;  %v6124_v5 = vpop.f32.mrb[119].mxu0  ;;  %v3030_v58 = vsel %vm793_vm2, %v3022_v18, %v3023_v60  ;;  %v6018_v56 = vpop.f32.mrb[119].mxu1  ;;  %p6524_p12 = scmp.ne.s32.totalorder %s9121_s19, %s6523_s27  ;;  %p6531_p2 = scmp.lt.s32.totalorder %s6529_s30, %s6523_s27 }
 0x3dd   : > { %v8726_v28 = vadd.f32 %v3030_v58, %v2716_v21 }
 0x3de   : > { %6342 = vmatmul.mubr.msk.bf16.gmra.mrb[224].mxu0 %vm412_vm1, %v6520_v40  ;;  %v3029_v35 = vsel %vm793_vm2, %v3023_v60, %v3024_v2  ;;  %6236 = vmatmul.mubr.msk.bf16.gmra.mrb[224].mxu1 %vm412_vm1, %v6521_v61  ;;  %p6525_p13 = pnand %p6524_p12, %p6668_p4  ;;  %p6532_p3 = por %p6531_p2, %p6530_p1 }
 0x3df   : > { %6345 = vmatprep.mubr.msk.bf16.mxu0 %vm6604_vm0, %v9194_v13  ;;  %v8735_v4 = vadd.f32 %v3029_v35, %v2717_v63 }
 0x3e0   : > { %p6526_p0 = pneg %p6525_p13 }
 0x3e1   : > { %9233 = vst [vmem:[#allocation11_spill] sm:$0xff] %v8735_v4  ;;  %v2969_v62 = vpop.f32.mrb[120].mxu0  ;;  %v3170_v18 = vpop.f32.mrb[120].mxu1 }
 0x3e2   : > { %v3025_v50 = vrot.slane %v2969_v62, 7  ;;  %v6127_v53 = vpop.f32.mrb[121].mxu0  ;;  %v6133_v21 = vpop.f32.mrb[121].mxu1  ;;  %p6533_p5 = pnand %p6532_p3, %p6526_p0 }
 0x3e3   : > { %v2972_v45 = vpop.f32.mrb[122].mxu0  ;;  %v3173_v40 = vpop.f32.mrb[122].mxu1 }
 0x3e4   : > { %v3026_v51 = vrot.slane %v2972_v45, 7  ;;  %v6128_v5 = vpop.f32.mrb[123].mxu0  ;;  %v3028_v60 = vsel %vm793_vm2, %v3024_v2, %v3025_v50  ;;  %v6134_v30 = vpop.f32.mrb[123].mxu1 }
 0x3e5   : > { %v8739_v58 = vadd.f32 %v3028_v60, %v2718_v46 }
 0x3e6   : > { %6346 = vmatmul.mubr.msk.bf16.gmra.mrb[228].mxu0 %vm412_vm1, %v6521_v61  ;;  %v3027_v13 = vsel %vm793_vm2, %v3025_v50, %v3026_v51 }
 0x3e7   : > { %9234 = vst [vmem:[#allocation12_spill] sm:$0xff] %v8739_v58  ;;  %v8744_v63 = vadd.f32 %v3027_v13, %v2719_v32 }
 0x3e9   : > { %9235 = vst [vmem:[#allocation13_spill] sm:$0xff] %v8744_v63  ;;  %v8746_v56 = vpop.f32.mrb[124].mxu0  ;;  %v3177_v62 = vpop.f32.mrb[124].mxu1 }
 0x3ea   : > { %9236 = vst [vmem:[#allocation5_spill] sm:$0xff] %v8746_v56  ;;  %v6243_v35 = vpop.f32.mrb[125].mxu0  ;;  %v6137_v18 = vpop.f32.mrb[125].mxu1 }
 0x3eb   : > { %v3477_v53 = vpop.f32.mrb[126].mxu0  ;;  %v3179_v21 = vpop.f32.mrb[126].mxu1 }
 0x3ec   : > { %v6244_v45 = vpop.f32.mrb[127].mxu0  ;;  %v6138_v5 = vpop.f32.mrb[127].mxu1 }
 0x3f1   : > { %v3482_v2 = vpop.f32.mrb[128].mxu0  ;;  %v3183_v46 = vpop.f32.mrb[128].mxu1 }
 0x3f2   : > { %v6247_v40 = vpop.f32.mrb[129].mxu0  ;;  %v6141_v30 = vpop.f32.mrb[129].mxu1 }
 0x3f3   : > { %v3484_v60 = vpop.f32.mrb[130].mxu0  ;;  %v3185_v58 = vpop.f32.mrb[130].mxu1 }
 0x3f4   : > { %v6248_v61 = vpop.f32.mrb[131].mxu0  ;;  %v6142_v4 = vpop.f32.mrb[131].mxu1 }
 0x3f9   : > { %v3488_v50 = vpop.f32.mrb[132].mxu0  ;;  %v3190_v32 = vpop.f32.mrb[132].mxu1 }
 0x3fa   : > { %v6251_v51 = vpop.f32.mrb[133].mxu0  ;;  %v3382_v13 = vadd.f32 %v3190_v32, %v8264_v6  ;;  %v6145_v35 = vpop.f32.mrb[133].mxu1 }
 0x3fb   : > { %v3490_v62 = vpop.f32.mrb[134].mxu0  ;;  %v3193_v53 = vpop.f32.mrb[134].mxu1  ;;  %v9237_v51 = vld [vmem:[#allocation8_spill] sm:$0xff] }
 0x3fc   : > { %v6252_v18 = vpop.f32.mrb[135].mxu0  ;;  %v3383_v45 = vadd.f32 %v3193_v53, %v8276_v20  ;;  %v6146_v21 = vpop.f32.mrb[135].mxu1  ;;  %v8757_v20 = vld [vmem:[%s9177_s2] ss:$0 sm:$0xff] }
 0x401   : > { %v3495_v5 = vpop.f32.mrb[136].mxu0  ;;  %v3198_v2 = vpop.f32.mrb[136].mxu1 }
 0x402   : > { %v6255_v40 = vpop.f32.mrb[137].mxu0  ;;  %v3384_v46 = vadd.f32 %v3198_v2, %v8285_v44  ;;  %v6149_v60 = vpop.f32.mrb[137].mxu1  ;;  %v3689_v4 = vrot.slane %v3495_v5, 1 }
 0x403   : > { %v3498_v58 = vpop.f32.mrb[138].mxu0  ;;  %v3201_v30 = vpop.f32.mrb[138].mxu1 }
 0x404   : > { %v3690_v61 = vrot.slane %v3498_v58, 1  ;;  %v6256_v50 = vpop.f32.mrb[139].mxu0  ;;  %v3385_v6 = vadd.f32 %v3201_v30, %v9237_v51  ;;  %v6150_v32 = vpop.f32.mrb[139].mxu1 }
 0x406   : > { %v3783_v35 = vsel %vm1504_vm3, %v3689_v4, %v3690_v61 }
 0x407   : > { %v3788_v62 = vadd.f32 %v3783_v35, %v3382_v13 }
 0x409   : > { %v3845_v44 = vadd.f32 %v8757_v20, %v3788_v62  ;;  %v3503_v53 = vpop.f32.mrb[140].mxu0  ;;  %v3206_v18 = vpop.f32.mrb[140].mxu1 }
 0x40a   : > { %v3691_v21 = vrot.slane %v3503_v53, 1  ;;  %v6259_v5 = vpop.f32.mrb[141].mxu0  ;;  %v3386_v40 = vadd.f32 %v3206_v18, %v8306_v54  ;;  %v6153_v60 = vpop.f32.mrb[141].mxu1 }
 0x40b   : > { %v3895_v2 = vmax.f32 %v3845_v44, 0.0  ;;  %v3506_v58 = vpop.f32.mrb[142].mxu0  ;;  %v3209_v30 = vpop.f32.mrb[142].mxu1 }
 0x40c   : > { %v3782_v4 = vsel %vm1504_vm3, %v3690_v61, %v3691_v21  ;;  %v3692_v50 = vrot.slane %v3506_v58, 1  ;;  %v6260_v51 = vpop.f32.mrb[143].mxu0  ;;  %v8764_v35 = vadd.f32 %v3209_v30, %v8318_v36  ;;  %v6154_v62 = vpop.f32.mrb[143].mxu1 }
 0x40d   : > { %v5058_v32 = vpack.c.bf16 %v3895_v2, %v3895_v2  ;;  %v3789_v13 = vadd.f32 %v3782_v4, %v3383_v45 }
 0x40e   : > { %v3781_v44 = vsel %vm1504_vm3, %v3691_v21, %v3692_v50 }
 0x40f   : > { %v3981_v53 = vshrl.u32 %v5058_v32, 16  ;;  %v3984_v54 = vshll.u32 %v5058_v32, 16  ;;  %v3846_v18 = vadd.f32 %v8757_v20, %v3789_v13  ;;  %v3790_v5 = vadd.f32 %v3781_v44, %v3384_v46 }
 0x411   : > { %v3983_v61 = vrot.slane %v3981_v53, 4  ;;  %v3986_v60 = vrot.slane %v3984_v54, 5  ;;  %v3896_v58 = vmax.f32 %v3846_v18, 0.0  ;;  %v3847_v45 = vadd.f32 %v8757_v20, %v3790_v5  ;;  %v3511_v2 = vpop.f32.mrb[144].mxu0  ;;  %v3214_v36 = vpop.f32.mrb[144].mxu1 }
 0x412   : > { %v3693_v4 = vrot.slane %v3511_v2, 1  ;;  %v6263_v30 = vpop.f32.mrb[145].mxu0  ;;  %v3388_v32 = vadd.f32 %v3214_v36, %v8327_v7  ;;  %v6157_v13 = vpop.f32.mrb[145].mxu1 }
 0x413   : > { %v3987_v51 = vor.u32 %v3986_v60, %v3983_v61  ;;  %v5059_v21 = vpack.c.bf16 %v3896_v58, %v3896_v58  ;;  %v3897_v62 = vmax.f32 %v3847_v45, 0.0  ;;  %v3514_v46 = vpop.f32.mrb[146].mxu0  ;;  %v3217_v53 = vpop.f32.mrb[146].mxu1 }
 0x414   : > { %v3780_v44 = vsel %vm1504_vm3, %v3692_v50, %v3693_v4  ;;  %v3694_v54 = vrot.slane %v3514_v46, 1  ;;  %v6264_v18 = vpop.f32.mrb[147].mxu0  ;;  %v6158_v2 = vpop.f32.mrb[147].mxu1  ;;  %v8783_v60 = vadd.f32 %v3217_v53, %v8340_v9 }
 0x415   : > { %v3990_v5 = vshll.u32 %v5059_v21, 16  ;;  %v3994_v56 = vshrl.u32 %v5059_v21, 16  ;;  %v5060_v63 = vpack.c.bf16 %v3897_v62, %v3897_v62  ;;  %v3988_v30 = vrot.slane %v3987_v51, 4 }
 0x416   : > { %v3791_v7 = vadd.f32 %v3780_v44, %v3385_v6  ;;  %v3779_v50 = vsel %vm1504_vm3, %v3693_v4, %v3694_v54 }
 0x417   : > { %v3992_v58 = vrot.slane %v3990_v5, 5  ;;  %v3996_v45 = vrot.slane %v3994_v56, 4  ;;  %v4000_v36 = vshll.u32 %v5060_v63, 16  ;;  %v3792_v21 = vadd.f32 %v3779_v50, %v3386_v40 }
 0x418   : > { %v3848_v62 = vadd.f32 %v8757_v20, %v3791_v7 }
 0x419   : > { %v3993_v51 = vsel %vm8778_vm6, %v3988_v30, %v3992_v58  ;;  %v3997_v13 = vor.u32 %v3996_v45, %v3992_v58  ;;  %v3849_v46 = vadd.f32 %v8757_v20, %v3792_v21  ;;  %v3519_v18 = vpop.f32.mrb[148].mxu0  ;;  %v3222_v6 = vpop.f32.mrb[148].mxu1  ;;  %v4002_v63 = vrot.slane %v4000_v36, 5 }
 0x41a   : > { %4006 = vst [vmem:[%s8791_s9] sm:$0xf] %v3993_v51  ;;  %v3898_v9 = vmax.f32 %v3848_v62, 0.0  ;;  %v3695_v4 = vrot.slane %v3519_v18, 1  ;;  %v6267_v44 = vpop.f32.mrb[149].mxu0  ;;  %v3390_v53 = vadd.f32 %v3222_v6, %v8349_v25  ;;  %v6161_v5 = vpop.f32.mrb[149].mxu1 }
 0x41b   : > { %v3998_v56 = vrot.slane %v3997_v13, 4  ;;  %v3899_v40 = vmax.f32 %v3849_v46, 0.0  ;;  %v3522_v2 = vpop.f32.mrb[150].mxu0  ;;  %v3225_v50 = vpop.f32.mrb[150].mxu1 }
 0x41c   : > { %v5061_v30 = vpack.c.bf16 %v3898_v9, %v3898_v9  ;;  %v3778_v7 = vsel %vm1504_vm3, %v3694_v54, %v3695_v4  ;;  %v3696_v58 = vrot.slane %v3522_v2, 1  ;;  %v6268_v45 = vpop.f32.mrb[151].mxu0  ;;  %v8801_v36 = vadd.f32 %v3225_v50, %v8362_v48  ;;  %v6162_v13 = vpop.f32.mrb[151].mxu1 }
 0x41d   : > { %v4003_v21 = vsel %vm8778_vm6, %v3998_v56, %v4002_v63  ;;  %v5062_v62 = vpack.c.bf16 %v3899_v40, %v3899_v40  ;;  %v3793_v51 = vadd.f32 %v3778_v7, %v8764_v35 }
 0x41e   : > { %4007 = vst [vmem:[%s8791_s9 + $0x4] sm:$0xf] %v4003_v21  ;;  %v4017_v25 = vshrl.u32 %v5061_v30, 16  ;;  %v4020_v46 = vshll.u32 %v5061_v30, 16  ;;  %v3777_v18 = vsel %vm1504_vm3, %v3695_v4, %v3696_v58 }
 0x41f   : > { %v4026_v54 = vshll.u32 %v5062_v62, 16  ;;  %v4030_v9 = vshrl.u32 %v5062_v62, 16  ;;  %v3850_v6 = vadd.f32 %v8757_v20, %v3793_v51  ;;  %v3794_v44 = vadd.f32 %v3777_v18, %v3388_v32 }
 0x420   : > { %v4019_v5 = vrot.slane %v4017_v25, 4  ;;  %v4022_v56 = vrot.slane %v4020_v46, 5 }
 0x421   : > { %v4028_v63 = vrot.slane %v4026_v54, 5  ;;  %v4032_v40 = vrot.slane %v4030_v9, 4  ;;  %v3900_v35 = vmax.f32 %v3850_v6, 0.0  ;;  %v3851_v48 = vadd.f32 %v8757_v20, %v3794_v44  ;;  %v3527_v2 = vpop.f32.mrb[152].mxu0  ;;  %v3230_v50 = vpop.f32.mrb[152].mxu1 }
 0x422   : > { %v4023_v7 = vor.u32 %v4022_v56, %v4019_v5  ;;  %v3697_v45 = vrot.slane %v3527_v2, 1  ;;  %v6271_v30 = vpop.f32.mrb[153].mxu0  ;;  %v3392_v62 = vadd.f32 %v3230_v50, %v8371_v49  ;;  %v6165_v51 = vpop.f32.mrb[153].mxu1 }
 0x423   : > { %v4033_v21 = vor.u32 %v4032_v40, %v4028_v63  ;;  %v5063_v13 = vpack.c.bf16 %v3900_v35, %v3900_v35  ;;  %v3901_v4 = vmax.f32 %v3851_v48, 0.0  ;;  %v3530_v32 = vpop.f32.mrb[154].mxu0  ;;  %v3233_v18 = vpop.f32.mrb[154].mxu1 }
 0x424   : > { %v4024_v25 = vrot.slane %v4023_v7, 4  ;;  %v3776_v46 = vsel %vm1504_vm3, %v3696_v58, %v3697_v45  ;;  %v3698_v54 = vrot.slane %v3530_v32, 1  ;;  %v6272_v9 = vpop.f32.mrb[155].mxu0  ;;  %v6166_v56 = vpop.f32.mrb[155].mxu1  ;;  %v8815_v35 = vadd.f32 %v3233_v18, %v8383_v47 }
 0x425   : > { %v4036_v6 = vshll.u32 %v5063_v13, 16  ;;  %v5064_v44 = vpack.c.bf16 %v3901_v4, %v3901_v4  ;;  %v3795_v5 = vadd.f32 %v3776_v46, %v8783_v60  ;;  %v4034_v49 = vrot.slane %v4033_v21, 4 }
 0x426   : > { %v4029_v40 = vsel %vm8778_vm6, %v4024_v25, %v4028_v63  ;;  %v3775_v48 = vsel %vm1504_vm3, %v3697_v45, %v3698_v54 }
 0x427   : > { %4981 = vst [vmem:[%s8791_s9 + $0x8] sm:$0xf] %v4029_v40  ;;  %v4038_v58 = vrot.slane %v4036_v6, 5  ;;  %v4053_v2 = vshrl.u32 %v5064_v44, 16  ;;  %v4056_v7 = vshll.u32 %v5064_v44, 16  ;;  %v3852_v50 = vadd.f32 %v8757_v20, %v3795_v5 }
 0x428   : > { %v3796_v30 = vadd.f32 %v3775_v48, %v3390_v53 }
 0x429   : > { %v4039_v60 = vsel %vm8778_vm6, %v4034_v49, %v4038_v58  ;;  %v4055_v13 = vrot.slane %v4053_v2, 4  ;;  %v4058_v4 = vrot.slane %v4056_v7, 5  ;;  %v3902_v63 = vmax.f32 %v3852_v50, 0.0  ;;  %v3535_v21 = vpop.f32.mrb[156].mxu0  ;;  %v3238_v51 = vpop.f32.mrb[156].mxu1 }
 0x42a   : > { %4982 = vst [vmem:[%s8791_s9 + $0xc] sm:$0xf] %v4039_v60  ;;  %v3853_v47 = vadd.f32 %v8757_v20, %v3796_v30  ;;  %v3699_v32 = vrot.slane %v3535_v21, 1  ;;  %v6275_v45 = vpop.f32.mrb[157].mxu0  ;;  %v3394_v18 = vadd.f32 %v3238_v51, %v8392_v11  ;;  %v6169_v9 = vpop.f32.mrb[157].mxu1 }
 0x42b   : > { %v4059_v25 = vor.u32 %v4058_v4, %v4055_v13  ;;  %v5065_v46 = vpack.c.bf16 %v3902_v63, %v3902_v63  ;;  %v3538_v6 = vpop.f32.mrb[158].mxu0  ;;  %v3241_v5 = vpop.f32.mrb[158].mxu1 }
 0x42c   : > { %v3903_v53 = vmax.f32 %v3853_v47, 0.0  ;;  %v3774_v44 = vsel %vm1504_vm3, %v3698_v54, %v3699_v32  ;;  %v3700_v56 = vrot.slane %v3538_v6, 1  ;;  %v6276_v40 = vpop.f32.mrb[159].mxu0  ;;  %v6170_v2 = vpop.f32.mrb[159].mxu1  ;;  %v8830_v30 = vadd.f32 %v3241_v5, %v8404_v23 }
 0x42d   : > { %v4062_v49 = vshll.u32 %v5065_v46, 16  ;;  %v4066_v48 = vshrl.u32 %v5065_v46, 16  ;;  %v3797_v58 = vadd.f32 %v3774_v44, %v8801_v36  ;;  %v4060_v7 = vrot.slane %v4059_v25, 4 }
 0x42e   : > { %v5066_v50 = vpack.c.bf16 %v3903_v53, %v3903_v53  ;;  %v3773_v11 = vsel %vm1504_vm3, %v3699_v32, %v3700_v56 }
 0x42f   : > { %v4064_v60 = vrot.slane %v4062_v49, 5  ;;  %v4068_v13 = vrot.slane %v4066_v48, 4  ;;  %v3854_v54 = vadd.f32 %v8757_v20, %v3797_v58  ;;  %v3798_v4 = vadd.f32 %v3773_v11, %v3392_v62 }
 0x430   : > { %v4072_v63 = vshll.u32 %v5066_v50, 16 }
 0x431   : > { %v4065_v21 = vsel %vm8778_vm6, %v4060_v7, %v4064_v60  ;;  %v4069_v36 = vor.u32 %v4068_v13, %v4064_v60  ;;  %v3904_v47 = vmax.f32 %v3854_v54, 0.0  ;;  %v3855_v51 = vadd.f32 %v8757_v20, %v3798_v4  ;;  %v3543_v45 = vpop.f32.mrb[160].mxu0  ;;  %v3246_v25 = vpop.f32.mrb[160].mxu1 }
 0x432   : > { %4986 = vst [vmem:[%s8791_s9 + $0x10] sm:$0xf] %v4065_v21  ;;  %v4074_v23 = vrot.slane %v4072_v63, 5  ;;  %v3701_v46 = vrot.slane %v3543_v45, 1  ;;  %v6279_v9 = vpop.f32.mrb[161].mxu0  ;;  %v3396_v62 = vadd.f32 %v3246_v25, %v8413_v3  ;;  %v6173_v44 = vpop.f32.mrb[161].mxu1 }
 0x433   : > { %v4070_v32 = vrot.slane %v4069_v36, 4  ;;  %v5067_v6 = vpack.c.bf16 %v3904_v47, %v3904_v47  ;;  %v3905_v53 = vmax.f32 %v3855_v51, 0.0  ;;  %v3546_v5 = vpop.f32.mrb[162].mxu0  ;;  %v3249_v49 = vpop.f32.mrb[162].mxu1 }
 0x434   : > { %v3772_v40 = vsel %vm1504_vm3, %v3700_v56, %v3701_v46  ;;  %v3702_v48 = vrot.slane %v3546_v5, 1  ;;  %v6280_v58 = vpop.f32.mrb[163].mxu0  ;;  %v6174_v60 = vpop.f32.mrb[163].mxu1  ;;  %v8847_v3 = vadd.f32 %v3249_v49, %v8425_v12 }
 0x435   : > { %v4075_v2 = vsel %vm8778_vm6, %v4070_v32, %v4074_v23  ;;  %v4090_v7 = vshrl.u32 %v5067_v6, 16  ;;  %v4093_v50 = vshll.u32 %v5067_v6, 16  ;;  %v5068_v11 = vpack.c.bf16 %v3905_v53, %v3905_v53 }
 0x436   : > { %4987 = vst [vmem:[%s8791_s9 + $0x14] sm:$0xf] %v4075_v2  ;;  %v3799_v13 = vadd.f32 %v3772_v40, %v8815_v35  ;;  %v3771_v54 = vsel %vm1504_vm3, %v3701_v46, %v3702_v48 }
 0x437   : > { %v4092_v56 = vrot.slane %v4090_v7, 4  ;;  %v4095_v4 = vrot.slane %v4093_v50, 5  ;;  %v4099_v63 = vshll.u32 %v5068_v11, 16  ;;  %v4103_v21 = vshrl.u32 %v5068_v11, 16 }
 0x438   : > { %v3856_v36 = vadd.f32 %v8757_v20, %v3799_v13  ;;  %v3800_v47 = vadd.f32 %v3771_v54, %v3394_v18 }
 0x439   : > { %v4096_v51 = vor.u32 %v4095_v4, %v4092_v56  ;;  %v4101_v45 = vrot.slane %v4099_v63, 5  ;;  %v4105_v23 = vrot.slane %v4103_v21, 4  ;;  %v3551_v25 = vpop.f32.mrb[164].mxu0  ;;  %v3254_v32 = vpop.f32.mrb[164].mxu1 }
 0x43a   : > { %v3906_v9 = vmax.f32 %v3856_v36, 0.0  ;;  %v3857_v35 = vadd.f32 %v8757_v20, %v3800_v47  ;;  %v3703_v12 = vrot.slane %v3551_v25, 1  ;;  %v6283_v6 = vpop.f32.mrb[165].mxu0  ;;  %v3398_v44 = vadd.f32 %v3254_v32, %v8434_v52  ;;  %v6177_v5 = vpop.f32.mrb[165].mxu1 }
 0x43b   : > { %v4097_v53 = vrot.slane %v4096_v51, 4  ;;  %v4106_v46 = vor.u32 %v4105_v23, %v4101_v45  ;;  %v3554_v40 = vpop.f32.mrb[166].mxu0  ;;  %v3257_v2 = vpop.f32.mrb[166].mxu1 }
 0x43c   : > { %v5069_v49 = vpack.c.bf16 %v3906_v9, %v3906_v9  ;;  %v3907_v58 = vmax.f32 %v3857_v35, 0.0  ;;  %v3770_v18 = vsel %vm1504_vm3, %v3702_v48, %v3703_v12  ;;  %v3704_v7 = vrot.slane %v3554_v40, 1  ;;  %v6284_v50 = vpop.f32.mrb[167].mxu0  ;;  %v6178_v54 = vpop.f32.mrb[167].mxu1 }
 0x43d   : > { %v4102_v11 = vsel %vm8778_vm6, %v4097_v53, %v4101_v45  ;;  %v3801_v60 = vadd.f32 %v3770_v18, %v8830_v30  ;;  %v8860_v13 = vadd.f32 %v3257_v2, %v8446_v0  ;;  %v4107_v21 = vrot.slane %v4106_v46, 4 }
 0x43e   : > { %4991 = vst [vmem:[%s8791_s9 + $0x18] sm:$0xf] %v4102_v11  ;;  %v4109_v52 = vshll.u32 %v5069_v49, 16  ;;  %v5070_v56 = vpack.c.bf16 %v3907_v58, %v3907_v58  ;;  %v3769_v4 = vsel %vm1504_vm3, %v3703_v12, %v3704_v7 }
 0x43f   : > { %v3858_v48 = vadd.f32 %v8757_v20, %v3801_v60  ;;  %v3802_v63 = vadd.f32 %v3769_v4, %v3396_v62 }
 0x440   : > { %v4111_v36 = vrot.slane %v4109_v52, 5  ;;  %v4126_v47 = vshrl.u32 %v5070_v56, 16  ;;  %v4129_v51 = vshll.u32 %v5070_v56, 16 }
 0x441   : > { %v3908_v45 = vmax.f32 %v3858_v48, 0.0  ;;  %v3859_v30 = vadd.f32 %v8757_v20, %v3802_v63  ;;  %v3559_v0 = vpop.f32.mrb[168].mxu0  ;;  %v3262_v35 = vpop.f32.mrb[168].mxu1 }
 0x442   : > { %v4112_v23 = vsel %vm8778_vm6, %v4107_v21, %v4111_v36  ;;  %v4128_v25 = vrot.slane %v4126_v47, 4  ;;  %v4131_v9 = vrot.slane %v4129_v51, 5  ;;  %v3705_v32 = vrot.slane %v3559_v0, 1  ;;  %v6287_v12 = vpop.f32.mrb[169].mxu0  ;;  %v6181_v46 = vpop.f32.mrb[169].mxu1 }
 0x443   : > { %4992 = vst [vmem:[%s8791_s9 + $0x1c] sm:$0xf] %v4112_v23  ;;  %v5071_v6 = vpack.c.bf16 %v3908_v45, %v3908_v45  ;;  %v3909_v53 = vmax.f32 %v3859_v30, 0.0  ;;  %v3400_v62 = vadd.f32 %v3262_v35, %v8455_v31  ;;  %v3562_v5 = vpop.f32.mrb[170].mxu0  ;;  %v3265_v58 = vpop.f32.mrb[170].mxu1 }
 0x444   : > { %v4132_v40 = vor.u32 %v4131_v9, %v4128_v25  ;;  %v3768_v49 = vsel %vm1504_vm3, %v3704_v7, %v3705_v32  ;;  %v3706_v18 = vrot.slane %v3562_v5, 1  ;;  %v6288_v2 = vpop.f32.mrb[171].mxu0  ;;  %v6182_v52 = vpop.f32.mrb[171].mxu1  ;;  %v8875_v4 = vadd.f32 %v3265_v58, %v8467_v37 }
 0x445   : > { %v4135_v50 = vshll.u32 %v5071_v6, 16  ;;  %v4139_v11 = vshrl.u32 %v5071_v6, 16  ;;  %v5072_v60 = vpack.c.bf16 %v3909_v53, %v3909_v53  ;;  %v3803_v54 = vadd.f32 %v3768_v49, %v8847_v3 }
 0x446   : > { %v4133_v56 = vrot.slane %v4132_v40, 4  ;;  %v3767_v31 = vsel %vm1504_vm3, %v3705_v32, %v3706_v18 }
 0x447   : > { %v4137_v48 = vrot.slane %v4135_v50, 5  ;;  %v4141_v63 = vrot.slane %v4139_v11, 4  ;;  %v4145_v7 = vshll.u32 %v5072_v60, 16  ;;  %v3860_v21 = vadd.f32 %v8757_v20, %v3803_v54 }
 0x448   : > { %v3804_v36 = vadd.f32 %v3767_v31, %v3398_v44 }
 0x449   : > { %v4138_v47 = vsel %vm8778_vm6, %v4133_v56, %v4137_v48  ;;  %v4142_v51 = vor.u32 %v4141_v63, %v4137_v48  ;;  %v3910_v45 = vmax.f32 %v3860_v21, 0.0  ;;  %v3567_v3 = vpop.f32.mrb[172].mxu0  ;;  %v3270_v37 = vpop.f32.mrb[172].mxu1  ;;  %v4147_v9 = vrot.slane %v4145_v7, 5 }
 0x44a   : > { %4996 = vst [vmem:[%s8791_s9 + $0x20] sm:$0xf] %v4138_v47  ;;  %v3861_v30 = vadd.f32 %v8757_v20, %v3804_v36  ;;  %v3707_v0 = vrot.slane %v3567_v3, 1  ;;  %v6291_v23 = vpop.f32.mrb[173].mxu0  ;;  %v3402_v32 = vadd.f32 %v3270_v37, %v8476_v16  ;;  %v6185_v12 = vpop.f32.mrb[173].mxu1 }
 0x44b   : > { %v4143_v25 = vrot.slane %v4142_v51, 4  ;;  %v5073_v35 = vpack.c.bf16 %v3910_v45, %v3910_v45  ;;  %v3570_v44 = vpop.f32.mrb[174].mxu0  ;;  %v3273_v46 = vpop.f32.mrb[174].mxu1 }
 0x44c   : > { %v3911_v6 = vmax.f32 %v3861_v30, 0.0  ;;  %v3766_v53 = vsel %vm1504_vm3, %v3706_v18, %v3707_v0  ;;  %v3708_v5 = vrot.slane %v3570_v44, 1  ;;  %v6292_v40 = vpop.f32.mrb[175].mxu0  ;;  %v6186_v11 = vpop.f32.mrb[175].mxu1  ;;  %v8892_v16 = vadd.f32 %v3273_v46, %v8488_v33 }
 0x44d   : > { %v4148_v49 = vsel %vm8778_vm6, %v4143_v25, %v4147_v9  ;;  %v4163_v58 = vshrl.u32 %v5073_v35, 16  ;;  %v4166_v2 = vshll.u32 %v5073_v35, 16  ;;  %v3805_v50 = vadd.f32 %v3766_v53, %v8860_v13 }
 0x44e   : > { %4997 = vst [vmem:[%s8791_s9 + $0x24] sm:$0xf] %v4148_v49  ;;  %v5074_v60 = vpack.c.bf16 %v3911_v6, %v3911_v6  ;;  %v3765_v54 = vsel %vm1504_vm3, %v3707_v0, %v3708_v5 }
 0x44f   : > { %v4165_v18 = vrot.slane %v4163_v58, 4  ;;  %v4168_v52 = vrot.slane %v4166_v2, 5  ;;  %v3862_v56 = vadd.f32 %v8757_v20, %v3805_v50  ;;  %v3806_v31 = vadd.f32 %v3765_v54, %v3400_v62 }
 0x450   : > { %v4172_v48 = vshll.u32 %v5074_v60, 16  ;;  %v4176_v63 = vshrl.u32 %v5074_v60, 16 }
 0x451   : > { %v4169_v7 = vor.u32 %v4168_v52, %v4165_v18  ;;  %v3912_v21 = vmax.f32 %v3862_v56, 0.0  ;;  %v3863_v13 = vadd.f32 %v8757_v20, %v3806_v31  ;;  %v3575_v36 = vpop.f32.mrb[176].mxu0  ;;  %v3278_v45 = vpop.f32.mrb[176].mxu1 }
 0x452   : > { %v4174_v47 = vrot.slane %v4172_v48, 5  ;;  %v4178_v51 = vrot.slane %v4176_v63, 4  ;;  %v3709_v33 = vrot.slane %v3575_v36, 1  ;;  %v6295_v3 = vpop.f32.mrb[177].mxu0  ;;  %v3404_v23 = vadd.f32 %v3278_v45, %v8497_v41  ;;  %v6189_v25 = vpop.f32.mrb[177].mxu1 }
 0x453   : > { %v4170_v30 = vrot.slane %v4169_v7, 4  ;;  %v5075_v37 = vpack.c.bf16 %v3912_v21, %v3912_v21  ;;  %v3913_v0 = vmax.f32 %v3863_v13, 0.0  ;;  %v3578_v62 = vpop.f32.mrb[178].mxu0  ;;  %v3281_v12 = vpop.f32.mrb[178].mxu1 }
 0x454   : > { %v4179_v9 = vor.u32 %v4178_v51, %v4174_v47  ;;  %v3764_v35 = vsel %vm1504_vm3, %v3708_v5, %v3709_v33  ;;  %v3710_v44 = vrot.slane %v3578_v62, 1  ;;  %v6296_v6 = vpop.f32.mrb[179].mxu0  ;;  %v6190_v58 = vpop.f32.mrb[179].mxu1  ;;  %v8906_v41 = vadd.f32 %v3281_v12, %v8509_v43 }
 0x455   : > { %v4175_v53 = vsel %vm8778_vm6, %v4170_v30, %v4174_v47  ;;  %v4182_v46 = vshll.u32 %v5075_v37, 16  ;;  %v5076_v40 = vpack.c.bf16 %v3913_v0, %v3913_v0  ;;  %v3807_v49 = vadd.f32 %v3764_v35, %v8875_v4 }
 0x456   : > { %v4180_v2 = vrot.slane %v4179_v9, 4  ;;  %5001 = vst [vmem:[%s8791_s9 + $0x28] sm:$0xf] %v4175_v53  ;;  %v3763_v5 = vsel %vm1504_vm3, %v3709_v33, %v3710_v44 }
 0x457   : > { %v4184_v50 = vrot.slane %v4182_v46, 5  ;;  %v4199_v11 = vshrl.u32 %v5076_v40, 16  ;;  %v4202_v60 = vshll.u32 %v5076_v40, 16  ;;  %v3864_v54 = vadd.f32 %v8757_v20, %v3807_v49 }
 0x458   : > { %v3808_v18 = vadd.f32 %v3763_v5, %v3402_v32 }
 0x459   : > { %v4185_v52 = vsel %vm8778_vm6, %v4180_v2, %v4184_v50  ;;  %v4201_v4 = vrot.slane %v4199_v11, 4  ;;  %v4204_v56 = vrot.slane %v4202_v60, 5  ;;  %v3914_v31 = vmax.f32 %v3864_v54, 0.0  ;;  %v3583_v48 = vpop.f32.mrb[180].mxu0  ;;  %v3286_v63 = vpop.f32.mrb[180].mxu1 }
 0x45a   : > { %5002 = vst [vmem:[%s8791_s9 + $0x2c] sm:$0xf] %v4185_v52  ;;  %v3865_v43 = vadd.f32 %v8757_v20, %v3808_v18  ;;  %v3711_v7 = vrot.slane %v3583_v48, 1  ;;  %v6299_v21 = vpop.f32.mrb[181].mxu0  ;;  %v3406_v47 = vadd.f32 %v3286_v63, %v8518_v55  ;;  %v6193_v51 = vpop.f32.mrb[181].mxu1 }
 0x45b   : > { %v4205_v13 = vor.u32 %v4204_v56, %v4201_v4  ;;  %v5077_v36 = vpack.c.bf16 %v3914_v31, %v3914_v31  ;;  %v3586_v45 = vpop.f32.mrb[182].mxu0  ;;  %v3289_v3 = vpop.f32.mrb[182].mxu1 }
 0x45c   : > { %v3915_v32 = vmax.f32 %v3865_v43, 0.0  ;;  %v3762_v33 = vsel %vm1504_vm3, %v3710_v44, %v3711_v7  ;;  %v3712_v30 = vrot.slane %v3586_v45, 1  ;;  %v6300_v37 = vpop.f32.mrb[183].mxu0  ;;  %v6194_v9 = vpop.f32.mrb[183].mxu1  ;;  %v8920_v6 = vadd.f32 %v3289_v3, %v8530_v8 }
 0x45d   : > { %v4208_v0 = vshll.u32 %v5077_v36, 16  ;;  %v4212_v25 = vshrl.u32 %v5077_v36, 16  ;;  %v3809_v62 = vadd.f32 %v3762_v33, %v8892_v16  ;;  %v4206_v35 = vrot.slane %v4205_v13, 4 }
 0x45e   : > { %v5078_v12 = vpack.c.bf16 %v3915_v32, %v3915_v32  ;;  %v3761_v55 = vsel %vm1504_vm3, %v3711_v7, %v3712_v30 }
 0x45f   : > { %v4210_v53 = vrot.slane %v4208_v0, 5  ;;  %v4214_v46 = vrot.slane %v4212_v25, 4  ;;  %v3866_v44 = vadd.f32 %v8757_v20, %v3809_v62  ;;  %v3810_v40 = vadd.f32 %v3761_v55, %v3404_v23 }
 0x460   : > { %v4218_v49 = vshll.u32 %v5078_v12, 16 }
 0x461   : > { %v4211_v58 = vsel %vm8778_vm6, %v4206_v35, %v4210_v53  ;;  %v4215_v16 = vor.u32 %v4214_v46, %v4210_v53  ;;  %v3916_v2 = vmax.f32 %v3866_v44, 0.0  ;;  %v3867_v5 = vadd.f32 %v8757_v20, %v3810_v40  ;;  %v3591_v50 = vpop.f32.mrb[184].mxu0  ;;  %v3294_v11 = vpop.f32.mrb[184].mxu1 }
 0x462   : > { %5006 = vst [vmem:[%s8791_s9 + $0x30] sm:$0xf] %v4211_v58  ;;  %v4220_v8 = vrot.slane %v4218_v49, 5  ;;  %v3713_v60 = vrot.slane %v3591_v50, 1  ;;  %v6303_v54 = vpop.f32.mrb[185].mxu0  ;;  %v3408_v23 = vadd.f32 %v3294_v11, %v8539_v19  ;;  %v6197_v56 = vpop.f32.mrb[185].mxu1 }
 0x463   : > { %v4216_v18 = vrot.slane %v4215_v16, 4  ;;  %v5079_v52 = vpack.c.bf16 %v3916_v2, %v3916_v2  ;;  %v3917_v4 = vmax.f32 %v3867_v5, 0.0  ;;  %v3594_v31 = vpop.f32.mrb[186].mxu0  ;;  %v3297_v43 = vpop.f32.mrb[186].mxu1 }
 0x464   : > { %v3760_v48 = vsel %vm1504_vm3, %v3712_v30, %v3713_v60  ;;  %v3714_v63 = vrot.slane %v3594_v31, 1  ;;  %v6304_v7 = vpop.f32.mrb[187].mxu0  ;;  %v6198_v45 = vpop.f32.mrb[187].mxu1  ;;  %v8937_v19 = vadd.f32 %v3297_v43, %v8551_v59 }
 0x465   : > { %v4221_v21 = vsel %vm8778_vm6, %v4216_v18, %v4220_v8  ;;  %v4236_v13 = vshrl.u32 %v5079_v52, 16  ;;  %v4239_v36 = vshll.u32 %v5079_v52, 16  ;;  %v5080_v51 = vpack.c.bf16 %v3917_v4, %v3917_v4 }
 0x466   : > { %5007 = vst [vmem:[%s8791_s9 + $0x34] sm:$0xf] %v4221_v21  ;;  %v3811_v32 = vadd.f32 %v3760_v48, %v8906_v41  ;;  %v3759_v33 = vsel %vm1504_vm3, %v3713_v60, %v3714_v63 }
 0x467   : > { %v4238_v3 = vrot.slane %v4236_v13, 4  ;;  %v4241_v30 = vrot.slane %v4239_v36, 5  ;;  %v4245_v37 = vshll.u32 %v5080_v51, 16  ;;  %v4249_v0 = vshrl.u32 %v5080_v51, 16 }
 0x468   : > { %v3868_v25 = vadd.f32 %v8757_v20, %v3811_v32  ;;  %v3812_v62 = vadd.f32 %v3759_v33, %v3406_v47 }
 0x469   : > { %v4242_v9 = vor.u32 %v4241_v30, %v4238_v3  ;;  %v4247_v35 = vrot.slane %v4245_v37, 5  ;;  %v4251_v12 = vrot.slane %v4249_v0, 4  ;;  %v3599_v55 = vpop.f32.mrb[188].mxu0  ;;  %v3302_v46 = vpop.f32.mrb[188].mxu1 }
 0x46a   : > { %v3918_v53 = vmax.f32 %v3868_v25, 0.0  ;;  %v3869_v41 = vadd.f32 %v8757_v20, %v3812_v62  ;;  %v3715_v59 = vrot.slane %v3599_v55, 1  ;;  %v6307_v44 = vpop.f32.mrb[189].mxu0  ;;  %v3410_v58 = vadd.f32 %v3302_v46, %v8560_v24  ;;  %v6201_v16 = vpop.f32.mrb[189].mxu1 }
 0x46b   : > { %v4243_v40 = vrot.slane %v4242_v9, 4  ;;  %v4252_v49 = vor.u32 %v4251_v12, %v4247_v35  ;;  %v3602_v2 = vpop.f32.mrb[190].mxu0  ;;  %v3305_v8 = vpop.f32.mrb[190].mxu1 }
 0x46c   : > { %v5081_v5 = vpack.c.bf16 %v3918_v53, %v3918_v53  ;;  %v3919_v50 = vmax.f32 %v3869_v41, 0.0  ;;  %v3758_v47 = vsel %vm1504_vm3, %v3714_v63, %v3715_v59  ;;  %v3716_v11 = vrot.slane %v3602_v2, 1  ;;  %v6308_v60 = vpop.f32.mrb[191].mxu0  ;;  %v6202_v4 = vpop.f32.mrb[191].mxu1 }
 0x46d   : > { %v4248_v54 = vsel %vm8778_vm6, %v4243_v40, %v4247_v35  ;;  %v3813_v18 = vadd.f32 %v3758_v47, %v8920_v6  ;;  %v8950_v52 = vadd.f32 %v3305_v8, %v8572_v39  ;;  %v4253_v63 = vrot.slane %v4252_v49, 4 }
 0x46e   : > { %5011 = vst [vmem:[%s8791_s9 + $0x38] sm:$0xf] %v4248_v54  ;;  %v4255_v24 = vshll.u32 %v5081_v5, 16  ;;  %v5082_v56 = vpack.c.bf16 %v3919_v50, %v3919_v50  ;;  %v3757_v31 = vsel %vm1504_vm3, %v3715_v59, %v3716_v11 }
 0x46f   : > { %v3870_v48 = vadd.f32 %v8757_v20, %v3813_v18  ;;  %v3814_v43 = vadd.f32 %v3757_v31, %v3408_v23 }
 0x470   : > { %v4257_v7 = vrot.slane %v4255_v24, 5  ;;  %v4272_v21 = vshrl.u32 %v5082_v56, 16  ;;  %v4275_v13 = vshll.u32 %v5082_v56, 16 }
 0x471   : > { %v3920_v36 = vmax.f32 %v3870_v48, 0.0  ;;  %v3871_v6 = vadd.f32 %v8757_v20, %v3814_v43  ;;  %v3607_v39 = vpop.f32.mrb[192].mxu0  ;;  %v3310_v33 = vpop.f32.mrb[192].mxu1 }
 0x472   : > { %v4258_v51 = vsel %vm8778_vm6, %v4253_v63, %v4257_v7  ;;  %v4274_v45 = vrot.slane %v4272_v21, 4  ;;  %v4277_v32 = vrot.slane %v4275_v13, 5  ;;  %v3717_v3 = vrot.slane %v3607_v39, 1  ;;  %v6311_v30 = vpop.f32.mrb[193].mxu0  ;;  %v6205_v25 = vpop.f32.mrb[193].mxu1 }
 0x473   : > { %5012 = vst [vmem:[%s8791_s9 + $0x3c] sm:$0xf] %v4258_v51  ;;  %v5083_v37 = vpack.c.bf16 %v3920_v36, %v3920_v36  ;;  %v3921_v0 = vmax.f32 %v3871_v6, 0.0  ;;  %v3412_v23 = vadd.f32 %v3310_v33, %v8581_v26  ;;  %v3610_v62 = vpop.f32.mrb[194].mxu0  ;;  %v3313_v12 = vpop.f32.mrb[194].mxu1 }
 0x474   : > { %v4278_v9 = vor.u32 %v4277_v32, %v4274_v45  ;;  %v3756_v35 = vsel %vm1504_vm3, %v3716_v11, %v3717_v3  ;;  %v3718_v55 = vrot.slane %v3610_v62, 1  ;;  %v6312_v53 = vpop.f32.mrb[195].mxu0  ;;  %v6206_v40 = vpop.f32.mrb[195].mxu1  ;;  %v8965_v16 = vadd.f32 %v3313_v12, %v8593_v17 }
 0x475   : > { %v4281_v41 = vshll.u32 %v5083_v37, 16  ;;  %v4285_v46 = vshrl.u32 %v5083_v37, 16  ;;  %v5084_v59 = vpack.c.bf16 %v3921_v0, %v3921_v0  ;;  %v3815_v44 = vadd.f32 %v3756_v35, %v8937_v19 }
 0x476   : > { %v4279_v49 = vrot.slane %v4278_v9, 4  ;;  %v3755_v26 = vsel %vm1504_vm3, %v3717_v3, %v3718_v55 }
 0x477   : > { %v4283_v2 = vrot.slane %v4281_v41, 5  ;;  %v4287_v5 = vrot.slane %v4285_v46, 4  ;;  %v4291_v50 = vshll.u32 %v5084_v59, 16  ;;  %v3872_v47 = vadd.f32 %v8757_v20, %v3815_v44 }
 0x478   : > { %v3816_v8 = vadd.f32 %v3755_v26, %v3410_v58 }
 0x479   : > { %v4284_v11 = vsel %vm8778_vm6, %v4279_v49, %v4283_v2  ;;  %v4288_v60 = vor.u32 %v4287_v5, %v4283_v2  ;;  %v3922_v54 = vmax.f32 %v3872_v47, 0.0  ;;  %v3615_v19 = vpop.f32.mrb[196].mxu0  ;;  %v3318_v17 = vpop.f32.mrb[196].mxu1  ;;  %v4293_v31 = vrot.slane %v4291_v50, 5 }
 0x47a   : > { %5016 = vst [vmem:[%s8791_s9 + $0x40] sm:$0xf] %v4284_v11  ;;  %v3873_v18 = vadd.f32 %v8757_v20, %v3816_v8  ;;  %v3719_v4 = vrot.slane %v3615_v19, 1  ;;  %v6315_v24 = vpop.f32.mrb[197].mxu0  ;;  %v3414_v43 = vadd.f32 %v3318_v17, %v8602_v22  ;;  %v6209_v63 = vpop.f32.mrb[197].mxu1 }
 0x47b   : > { %v4289_v56 = vrot.slane %v4288_v60, 4  ;;  %v5085_v48 = vpack.c.bf16 %v3922_v54, %v3922_v54  ;;  %v3618_v58 = vpop.f32.mrb[198].mxu0  ;;  %v3321_v13 = vpop.f32.mrb[198].mxu1  ;;  %v9003_v63 = vld [vmem:[%s9177_s2] ss:$0 sm:$0xff] }
 0x47c   : > { %v3923_v7 = vmax.f32 %v3873_v18, 0.0  ;;  %v3754_v21 = vsel %vm1504_vm3, %v3718_v55, %v3719_v4  ;;  %v3720_v36 = vrot.slane %v3618_v58, 1  ;;  %v6316_v6 = vpop.f32.mrb[199].mxu0  ;;  %v6210_v33 = vpop.f32.mrb[199].mxu1  ;;  %v8982_v22 = vadd.f32 %v3321_v13, %v8614_v1 }
 0x47d   : > { %v4294_v39 = vsel %vm8778_vm6, %v4289_v56, %v4293_v31  ;;  %v4309_v51 = vshrl.u32 %v5085_v48, 16  ;;  %v4312_v45 = vshll.u32 %v5085_v48, 16  ;;  %v3817_v32 = vadd.f32 %v3754_v21, %v8950_v52 }
 0x47e   : > { %5017 = vst [vmem:[%s8791_s9 + $0x44] sm:$0xf] %v4294_v39  ;;  %v5086_v3 = vpack.c.bf16 %v3923_v7, %v3923_v7  ;;  %v3753_v30 = vsel %vm1504_vm3, %v3719_v4, %v3720_v36 }
 0x47f   : > { %v4311_v37 = vrot.slane %v4309_v51, 4  ;;  %v4314_v0 = vrot.slane %v4312_v45, 5  ;;  %v3874_v25 = vadd.f32 %v8757_v20, %v3817_v32  ;;  %v3818_v62 = vadd.f32 %v3753_v30, %v3412_v23 }
 0x480   : > { %v4318_v9 = vshll.u32 %v5086_v3, 16  ;;  %v4322_v35 = vshrl.u32 %v5086_v3, 16 }
 0x481   : > { %v4315_v12 = vor.u32 %v4314_v0, %v4311_v37  ;;  %v3924_v55 = vmax.f32 %v3874_v25, 0.0  ;;  %v3875_v52 = vadd.f32 %v8757_v20, %v3818_v62  ;;  %v3623_v53 = vpop.f32.mrb[200].mxu0  ;;  %v3326_v59 = vpop.f32.mrb[200].mxu1 }
 0x482   : > { %v4320_v41 = vrot.slane %v4318_v9, 5  ;;  %v4324_v46 = vrot.slane %v4322_v35, 4  ;;  %v3721_v1 = vrot.slane %v3623_v53, 1  ;;  %v6319_v44 = vpop.f32.mrb[201].mxu0  ;;  %v3416_v2 = vadd.f32 %v3326_v59, %v8623_v15  ;;  %v6213_v5 = vpop.f32.mrb[201].mxu1 }
 0x483   : > { %v4316_v40 = vrot.slane %v4315_v12, 4  ;;  %v5087_v49 = vpack.c.bf16 %v3924_v55, %v3924_v55  ;;  %v3925_v26 = vmax.f32 %v3875_v52, 0.0  ;;  %v3626_v23 = vpop.f32.mrb[202].mxu0  ;;  %v3329_v8 = vpop.f32.mrb[202].mxu1 }
 0x484   : > { %v4325_v50 = vor.u32 %v4324_v46, %v4320_v41  ;;  %v3752_v47 = vsel %vm1504_vm3, %v3720_v36, %v3721_v1  ;;  %v3722_v20 = vrot.slane %v3626_v23, 1  ;;  %v6320_v11 = vpop.f32.mrb[203].mxu0  ;;  %v6214_v17 = vpop.f32.mrb[203].mxu1  ;;  %v8996_v15 = vadd.f32 %v3329_v8, %v8635_v14 }
 0x485   : > { %v4321_v60 = vsel %vm8778_vm6, %v4316_v40, %v4320_v41  ;;  %v4328_v54 = vshll.u32 %v5087_v49, 16  ;;  %v5088_v19 = vpack.c.bf16 %v3925_v26, %v3925_v26  ;;  %v3819_v18 = vadd.f32 %v3752_v47, %v8965_v16 }
 0x486   : > { %v4326_v4 = vrot.slane %v4325_v50, 4  ;;  %5021 = vst [vmem:[%s8791_s9 + $0x48] sm:$0xf] %v4321_v60  ;;  %v3751_v24 = vsel %vm1504_vm3, %v3721_v1, %v3722_v20 }
 0x487   : > { %v4330_v56 = vrot.slane %v4328_v54, 5  ;;  %v4345_v31 = vshrl.u32 %v5088_v19, 16  ;;  %v4348_v48 = vshll.u32 %v5088_v19, 16  ;;  %v3876_v16 = vadd.f32 %v9003_v63, %v3819_v18 }
 0x488   : > { %v3820_v58 = vadd.f32 %v3751_v24, %v3414_v43 }
 0x489   : > { %v4331_v7 = vsel %vm8778_vm6, %v4326_v4, %v4330_v56  ;;  %v4347_v21 = vrot.slane %v4345_v31, 4  ;;  %v4350_v14 = vrot.slane %v4348_v48, 5  ;;  %v3926_v13 = vmax.f32 %v3876_v16, 0.0  ;;  %v3631_v36 = vpop.f32.mrb[204].mxu0  ;;  %v3334_v39 = vpop.f32.mrb[204].mxu1 }
 0x48a   : > { %5022 = vst [vmem:[%s8791_s9 + $0x4c] sm:$0xf] %v4331_v7  ;;  %v3877_v6 = vadd.f32 %v9003_v63, %v3820_v58  ;;  %v3723_v51 = vrot.slane %v3631_v36, 1  ;;  %v6323_v45 = vpop.f32.mrb[205].mxu0  ;;  %v3418_v3 = vadd.f32 %v3334_v39, %v8644_v38  ;;  %v6217_v30 = vpop.f32.mrb[205].mxu1 }
 0x48b   : > { %v4351_v32 = vor.u32 %v4350_v14, %v4347_v21  ;;  %v5089_v33 = vpack.c.bf16 %v3926_v13, %v3926_v13  ;;  %v3634_v37 = vpop.f32.mrb[206].mxu0  ;;  %v3337_v25 = vpop.f32.mrb[206].mxu1 }
 0x48c   : > { %v3927_v43 = vmax.f32 %v3877_v6, 0.0  ;;  %v3750_v0 = vsel %vm1504_vm3, %v3722_v20, %v3723_v51  ;;  %v3724_v62 = vrot.slane %v3634_v37, 1  ;;  %v6324_v9 = vpop.f32.mrb[207].mxu0  ;;  %v6218_v52 = vpop.f32.mrb[207].mxu1  ;;  %v9015_v46 = vadd.f32 %v3337_v25, %v8656_v29 }
 0x48d   : > { %v4354_v35 = vshll.u32 %v5089_v33, 16  ;;  %v4358_v12 = vshrl.u32 %v5089_v33, 16  ;;  %v3821_v55 = vadd.f32 %v3750_v0, %v8982_v22  ;;  %v4352_v53 = vrot.slane %v4351_v32, 4 }
 0x48e   : > { %v5090_v41 = vpack.c.bf16 %v3927_v43, %v3927_v43  ;;  %v3749_v38 = vsel %vm1504_vm3, %v3723_v51, %v3724_v62 }
 0x48f   : > { %v4356_v59 = vrot.slane %v4354_v35, 5  ;;  %v4360_v1 = vrot.slane %v4358_v12, 4  ;;  %v3878_v44 = vadd.f32 %v9003_v63, %v3821_v55  ;;  %v3822_v40 = vadd.f32 %v3749_v38, %v3416_v2  ;;  %v9240_v35 = vld [vmem:[#allocation9_spill] sm:$0xff] }
 0x490   : > { %v4364_v49 = vshll.u32 %v5090_v41, 16 }
 0x491   : > { %v4357_v26 = vsel %vm8778_vm6, %v4352_v53, %v4356_v59  ;;  %v4361_v22 = vor.u32 %v4360_v1, %v4356_v59  ;;  %v3928_v5 = vmax.f32 %v3878_v44, 0.0  ;;  %v3879_v23 = vadd.f32 %v9003_v63, %v3822_v40  ;;  %v3639_v50 = vpop.f32.mrb[208].mxu0  ;;  %v3342_v47 = vpop.f32.mrb[208].mxu1 }
 0x492   : > { %5026 = vst [vmem:[%s8791_s9 + $0x50] sm:$0xf] %v4357_v26  ;;  %v4366_v29 = vrot.slane %v4364_v49, 5  ;;  %v3725_v8 = vrot.slane %v3639_v50, 1  ;;  %v6327_v20 = vpop.f32.mrb[209].mxu0  ;;  %v3420_v2 = vadd.f32 %v3342_v47, %v8665_v57  ;;  %v6221_v19 = vpop.f32.mrb[209].mxu1 }
 0x493   : > { %v4362_v11 = vrot.slane %v4361_v22, 4  ;;  %v5091_v60 = vpack.c.bf16 %v3928_v5, %v3928_v5  ;;  %v3929_v54 = vmax.f32 %v3879_v23, 0.0  ;;  %v3642_v18 = vpop.f32.mrb[210].mxu0  ;;  %v3345_v4 = vpop.f32.mrb[210].mxu1  ;;  %v9241_v49 = vld [vmem:[#allocation10_spill] sm:$0xff] }
 0x494   : > { %v3748_v17 = vsel %vm1504_vm3, %v3724_v62, %v3725_v8  ;;  %v3726_v24 = vrot.slane %v3642_v18, 1  ;;  %v6328_v56 = vpop.f32.mrb[211].mxu0  ;;  %v6222_v7 = vpop.f32.mrb[211].mxu1  ;;  %v9032_v57 = vadd.f32 %v3345_v4, %v8677_v27 }
 0x495   : > { %v4367_v31 = vsel %vm8778_vm6, %v4362_v11, %v4366_v29  ;;  %v4382_v48 = vshrl.u32 %v5091_v60, 16  ;;  %v4385_v16 = vshll.u32 %v5091_v60, 16  ;;  %v5092_v58 = vpack.c.bf16 %v3929_v54, %v3929_v54 }
 0x496   : > { %5027 = vst [vmem:[%s8791_s9 + $0x54] sm:$0xf] %v4367_v31  ;;  %v3823_v21 = vadd.f32 %v3748_v17, %v8996_v15  ;;  %v3747_v14 = vsel %vm1504_vm3, %v3725_v8, %v3726_v24 }
 0x497   : > { %v4384_v13 = vrot.slane %v4382_v48, 4  ;;  %v4387_v36 = vrot.slane %v4385_v16, 5  ;;  %v4391_v6 = vshll.u32 %v5092_v58, 16  ;;  %v4395_v39 = vshrl.u32 %v5092_v58, 16 }
 0x498   : > { %v3880_v51 = vadd.f32 %v9003_v63, %v3823_v21  ;;  %v3824_v45 = vadd.f32 %v3747_v14, %v3418_v3 }
 0x499   : > { %v4388_v32 = vor.u32 %v4387_v36, %v4384_v13  ;;  %v4393_v33 = vrot.slane %v4391_v6, 5  ;;  %v4397_v30 = vrot.slane %v4395_v39, 4  ;;  %v3647_v37 = vpop.f32.mrb[212].mxu0  ;;  %v3350_v0 = vpop.f32.mrb[212].mxu1 }
 0x49a   : > { %v3930_v43 = vmax.f32 %v3880_v51, 0.0  ;;  %v3881_v15 = vadd.f32 %v9003_v63, %v3824_v45  ;;  %v3727_v27 = vrot.slane %v3647_v37, 1  ;;  %v6331_v25 = vpop.f32.mrb[213].mxu0  ;;  %v3422_v12 = vadd.f32 %v3350_v0, %v9240_v35  ;;  %v6225_v55 = vpop.f32.mrb[213].mxu1 }
 0x49b   : > { %v4389_v62 = vrot.slane %v4388_v32, 4  ;;  %v4398_v9 = vor.u32 %v4397_v30, %v4393_v33  ;;  %v3650_v52 = vpop.f32.mrb[214].mxu0  ;;  %v3353_v38 = vpop.f32.mrb[214].mxu1 }
 0x49c   : > { %v5093_v53 = vpack.c.bf16 %v3930_v43, %v3930_v43  ;;  %v3931_v41 = vmax.f32 %v3881_v15, 0.0  ;;  %v3746_v3 = vsel %vm1504_vm3, %v3726_v24, %v3727_v27  ;;  %v3728_v59 = vrot.slane %v3650_v52, 1  ;;  %v6332_v1 = vpop.f32.mrb[215].mxu0  ;;  %v6226_v22 = vpop.f32.mrb[215].mxu1 }
 0x49d   : > { %v4394_v44 = vsel %vm8778_vm6, %v4389_v62, %v4393_v33  ;;  %v3825_v40 = vadd.f32 %v3746_v3, %v9015_v46  ;;  %v9045_v26 = vadd.f32 %v3353_v38, %v9241_v49  ;;  %v4399_v8 = vrot.slane %v4398_v9, 4 }
 0x49e   : > { %5031 = vst [vmem:[%s8791_s9 + $0x58] sm:$0xf] %v4394_v44  ;;  %v4401_v5 = vshll.u32 %v5093_v53, 16  ;;  %v5094_v23 = vpack.c.bf16 %v3931_v41, %v3931_v41  ;;  %v3745_v50 = vsel %vm1504_vm3, %v3727_v27, %v3728_v59 }
 0x49f   : > { %v3882_v29 = vadd.f32 %v9003_v63, %v3825_v40  ;;  %v3826_v47 = vadd.f32 %v3745_v50, %v3420_v2 }
 0x4a0   : > { %v4403_v20 = vrot.slane %v4401_v5, 5  ;;  %v4418_v11 = vshrl.u32 %v5094_v23, 16  ;;  %v4421_v60 = vshll.u32 %v5094_v23, 16 }
 0x4a1   : > { %v3932_v54 = vmax.f32 %v3882_v29, 0.0  ;;  %v3883_v46 = vadd.f32 %v9003_v63, %v3826_v47  ;;  %v3655_v19 = vpop.f32.mrb[216].mxu0  ;;  %v3358_v24 = vpop.f32.mrb[216].mxu1 }
 0x4a2   : > { %v4404_v18 = vsel %vm8778_vm6, %v4399_v8, %v4403_v20  ;;  %v4420_v17 = vrot.slane %v4418_v11, 4  ;;  %v4423_v4 = vrot.slane %v4421_v60, 5  ;;  %v3729_v56 = vrot.slane %v3655_v19, 1  ;;  %v6335_v31 = vpop.f32.mrb[217].mxu0  ;;  %v6229_v58 = vpop.f32.mrb[217].mxu1 }
 0x4a3   : > { %5032 = vst [vmem:[%s8791_s9 + $0x5c] sm:$0xf] %v4404_v18  ;;  %v5095_v48 = vpack.c.bf16 %v3932_v54, %v3932_v54  ;;  %v3933_v16 = vmax.f32 %v3883_v46, 0.0  ;;  %v3424_v2 = vadd.f32 %v3358_v24, %v8707_v42  ;;  %v3658_v7 = vpop.f32.mrb[218].mxu0  ;;  %v3361_v13 = vpop.f32.mrb[218].mxu1 }
 0x4a4   : > { %v4424_v21 = vor.u32 %v4423_v4, %v4420_v17  ;;  %v3744_v14 = vsel %vm1504_vm3, %v3728_v59, %v3729_v56  ;;  %v3730_v36 = vrot.slane %v3658_v7, 1  ;;  %v6336_v6 = vpop.f32.mrb[219].mxu0  ;;  %v6230_v33 = vpop.f32.mrb[219].mxu1  ;;  %v9060_v37 = vadd.f32 %v3361_v13, %v8719_v10 }
 0x4a5   : > { %v4427_v39 = vshll.u32 %v5095_v48, 16  ;;  %v4431_v51 = vshrl.u32 %v5095_v48, 16  ;;  %v5096_v45 = vpack.c.bf16 %v3933_v16, %v3933_v16  ;;  %v3827_v32 = vadd.f32 %v3744_v14, %v9032_v57  ;;  %v9243_v6 = vld [vmem:[#allocation12_spill] sm:$0xff] }
 0x4a6   : > { %v4425_v30 = vrot.slane %v4424_v21, 4  ;;  %v3743_v42 = vsel %vm1504_vm3, %v3729_v56, %v3730_v36 }
 0x4a7   : > { %v4429_v43 = vrot.slane %v4427_v39, 5  ;;  %v4433_v15 = vrot.slane %v4431_v51, 4  ;;  %v4437_v0 = vshll.u32 %v5096_v45, 16  ;;  %v3884_v27 = vadd.f32 %v9003_v63, %v3827_v32 }
 0x4a8   : > { %v3828_v25 = vadd.f32 %v3743_v42, %v3422_v12 }
 0x4a9   : > { %v4430_v62 = vsel %vm8778_vm6, %v4425_v30, %v4429_v43  ;;  %v4434_v9 = vor.u32 %v4433_v15, %v4429_v43  ;;  %v3934_v35 = vmax.f32 %v3884_v27, 0.0  ;;  %v3663_v57 = vpop.f32.mrb[220].mxu0  ;;  %v3366_v10 = vpop.f32.mrb[220].mxu1  ;;  %v4439_v3 = vrot.slane %v4437_v0, 5 }
 0x4aa   : > { %5036 = vst [vmem:[%s8791_s9 + $0x60] sm:$0xf] %v4430_v62  ;;  %v3885_v55 = vadd.f32 %v9003_v63, %v3828_v25  ;;  %v3731_v52 = vrot.slane %v3663_v57, 1  ;;  %v6339_v53 = vpop.f32.mrb[221].mxu0  ;;  %v3426_v59 = vadd.f32 %v3366_v10, %v8726_v28  ;;  %v6233_v1 = vpop.f32.mrb[221].mxu1  ;;  %v9242_v28 = vld [vmem:[#allocation11_spill] sm:$0xff] }
 0x4ab   : > { %v4435_v41 = vrot.slane %v4434_v9, 4  ;;  %v5097_v38 = vpack.c.bf16 %v3934_v35, %v3934_v35  ;;  %v3666_v12 = vpop.f32.mrb[222].mxu0  ;;  %v3369_v49 = vpop.f32.mrb[222].mxu1  ;;  %v9244_v9 = vld [vmem:[#allocation13_spill] sm:$0xff] }
 0x4ac   : > { %v3935_v44 = vmax.f32 %v3885_v55, 0.0  ;;  %v3742_v40 = vsel %vm1504_vm3, %v3730_v36, %v3731_v52  ;;  %v3732_v22 = vrot.slane %v3666_v12, 1  ;;  %v6340_v5 = vpop.f32.mrb[223].mxu0  ;;  %v6234_v8 = vpop.f32.mrb[223].mxu1  ;;  %v3427_v11 = vadd.f32 %v3369_v49, %v9242_v28 }
 0x4ad   : > { %v4440_v23 = vsel %vm8778_vm6, %v4435_v41, %v4439_v3  ;;  %v4455_v50 = vshrl.u32 %v5097_v38, 16  ;;  %v4458_v29 = vshll.u32 %v5097_v38, 16  ;;  %v3829_v47 = vadd.f32 %v3742_v40, %v9045_v26 }
 0x4ae   : > { %5037 = vst [vmem:[%s8791_s9 + $0x64] sm:$0xf] %v4440_v23  ;;  %v5098_v20 = vpack.c.bf16 %v3935_v44, %v3935_v44  ;;  %v3741_v60 = vsel %vm1504_vm3, %v3731_v52, %v3732_v22 }
 0x4af   : > { %v4457_v54 = vrot.slane %v4455_v50, 4  ;;  %v4460_v46 = vrot.slane %v4458_v29, 5  ;;  %v3886_v19 = vadd.f32 %v9003_v63, %v3829_v47  ;;  %v3830_v18 = vadd.f32 %v3741_v60, %v3424_v2  ;;  %v9245_v50 = vld [vmem:[#allocation5_spill] sm:$0xff] }
 0x4b0   : > { %v4464_v17 = vshll.u32 %v5098_v20, 16  ;;  %v4468_v4 = vshrl.u32 %v5098_v20, 16  ;;  %v3686_v29 = vrot.slane %v9245_v50, 1 }
 0x4b1   : > { %v4461_v24 = vor.u32 %v4460_v46, %v4457_v54  ;;  %v3936_v56 = vmax.f32 %v3886_v19, 0.0  ;;  %v3887_v31 = vadd.f32 %v9003_v63, %v3830_v18  ;;  %v3671_v26 = vpop.f32.mrb[224].mxu0  ;;  %v3374_v58 = vpop.f32.mrb[224].mxu1 }
 0x4b2   : > { %v4466_v48 = vrot.slane %v4464_v17, 5  ;;  %v4470_v16 = vrot.slane %v4468_v4, 4  ;;  %v3733_v7 = vrot.slane %v3671_v26, 1  ;;  %v6343_v21 = vpop.f32.mrb[225].mxu0  ;;  %v3428_v39 = vadd.f32 %v3374_v58, %v9243_v6  ;;  %v6237_v51 = vpop.f32.mrb[225].mxu1 }
 0x4b3   : > { %v4462_v14 = vrot.slane %v4461_v24, 4  ;;  %v5099_v13 = vpack.c.bf16 %v3936_v56, %v3936_v56  ;;  %v3937_v36 = vmax.f32 %v3887_v31, 0.0  ;;  %v3674_v2 = vpop.f32.mrb[226].mxu0  ;;  %v3377_v33 = vpop.f32.mrb[226].mxu1 }
 0x4b4   : > { %v4471_v45 = vor.u32 %v4470_v16, %v4466_v48  ;;  %v3740_v32 = vsel %vm1504_vm3, %v3732_v22, %v3733_v7  ;;  %v3734_v30 = vrot.slane %v3674_v2, 1  ;;  %v6344_v42 = vpop.f32.mrb[227].mxu0  ;;  %v6238_v25 = vpop.f32.mrb[227].mxu1  ;;  %v3429_v35 = vadd.f32 %v3377_v33, %v9244_v9 }
 0x4b5   : > { %v4467_v43 = vsel %vm8778_vm6, %v4462_v14, %v4466_v48  ;;  %v4474_v15 = vshll.u32 %v5099_v13, 16  ;;  %v5100_v0 = vpack.c.bf16 %v3937_v36, %v3937_v36  ;;  %v3831_v27 = vadd.f32 %v3740_v32, %v9060_v37 }
 0x4b6   : > { %v4472_v62 = vrot.slane %v4471_v45, 4  ;;  %5041 = vst [vmem:[%s8791_s9 + $0x68] sm:$0xf] %v4467_v43  ;;  %v3739_v57 = vsel %vm1504_vm3, %v3733_v7, %v3734_v30 }
 0x4b7   : > { %v4476_v55 = vrot.slane %v4474_v15, 5  ;;  %v4491_v10 = vshrl.u32 %v5100_v0, 16  ;;  %v4494_v52 = vshll.u32 %v5100_v0, 16  ;;  %v3888_v53 = vadd.f32 %v9003_v63, %v3831_v27 }
 0x4b8   : > { %v3832_v41 = vadd.f32 %v3739_v57, %v3426_v59 }
 0x4b9   : > { %v4477_v3 = vsel %vm8778_vm6, %v4472_v62, %v4476_v55  ;;  %v4493_v38 = vrot.slane %v4491_v10, 4  ;;  %v4496_v37 = vrot.slane %v4494_v52, 5  ;;  %v3938_v1 = vmax.f32 %v3888_v53, 0.0  ;;  %v3679_v12 = vpop.f32.mrb[228].mxu0 }
 0x4ba   : > { %5042 = vst [vmem:[%s8791_s9 + $0x6c] sm:$0xf] %v4477_v3  ;;  %v3889_v44 = vadd.f32 %v9003_v63, %v3832_v41  ;;  %v3735_v40 = vrot.slane %v3679_v12, 1  ;;  %v6347_v49 = vpop.f32.mrb[229].mxu0 }
 0x4bb   : > { %v4497_v22 = vor.u32 %v4496_v37, %v4493_v38  ;;  %v5101_v5 = vpack.c.bf16 %v3938_v1, %v3938_v1  ;;  %v3682_v23 = vpop.f32.mrb[230].mxu0 }
 0x4bc   : > { %v3939_v47 = vmax.f32 %v3889_v44, 0.0  ;;  %v3738_v59 = vsel %vm1504_vm3, %v3734_v30, %v3735_v40  ;;  %v3736_v8 = vrot.slane %v3682_v23, 1  ;;  %v6348_v20 = vpop.f32.mrb[231].mxu0 }
 0x4bd   : > { %v4500_v28 = vshll.u32 %v5101_v5, 16  ;;  %v4504_v60 = vshrl.u32 %v5101_v5, 16  ;;  %v3833_v54 = vadd.f32 %v3738_v59, %v3427_v11  ;;  %v4498_v46 = vrot.slane %v4497_v22, 4 }
 0x4be   : > { %v5102_v19 = vpack.c.bf16 %v3939_v47, %v3939_v47  ;;  %v3737_v18 = vsel %vm1504_vm3, %v3735_v40, %v3736_v8  ;;  %v3786_v17 = vsel %vm1504_vm3, %v3736_v8, %v3686_v29 }
 0x4bf   : > { %v4502_v4 = vrot.slane %v4500_v28, 5  ;;  %v4506_v24 = vrot.slane %v4504_v60, 4  ;;  %v3890_v56 = vadd.f32 %v9003_v63, %v3833_v54  ;;  %v3834_v31 = vadd.f32 %v3737_v18, %v3428_v39 }
 0x4c0   : > { %v4510_v26 = vshll.u32 %v5102_v19, 16  ;;  %v3835_v48 = vadd.f32 %v3786_v17, %v3429_v35 }
 0x4c1   : > { %v4503_v16 = vsel %vm8778_vm6, %v4498_v46, %v4502_v4  ;;  %v4507_v11 = vor.u32 %v4506_v24, %v4502_v4  ;;  %v3940_v58 = vmax.f32 %v3890_v56, 0.0  ;;  %v3891_v7 = vadd.f32 %v9003_v63, %v3834_v31 }
 0x4c2   : > { %5046 = vst [vmem:[%s8791_s9 + $0x70] sm:$0xf] %v4503_v16  ;;  %v3892_v21 = vadd.f32 %v9003_v63, %v3835_v48  ;;  %v4512_v14 = vrot.slane %v4510_v26, 5 }
 0x4c3   : > { %v4508_v34 = vrot.slane %v4507_v11, 4  ;;  %v5103_v13 = vpack.c.bf16 %v3940_v58, %v3940_v58  ;;  %v3941_v36 = vmax.f32 %v3891_v7, 0.0 }
 0x4c4   : > { %v3942_v6 = vmax.f32 %v3892_v21, 0.0 }
 0x4c5   : > { %v4513_v39 = vsel %vm8778_vm6, %v4508_v34, %v4512_v14  ;;  %v4528_v51 = vshrl.u32 %v5103_v13, 16  ;;  %v4531_v2 = vshll.u32 %v5103_v13, 16  ;;  %v5104_v45 = vpack.c.bf16 %v3941_v36, %v3941_v36 }
 0x4c6   : > { %5047 = vst [vmem:[%s8791_s9 + $0x74] sm:$0xf] %v4513_v39  ;;  %v5105_v32 = vpack.c.bf16 %v3942_v6, %v3942_v6 }
 0x4c7   : > { %v4530_v33 = vrot.slane %v4528_v51, 4  ;;  %v4533_v30 = vrot.slane %v4531_v2, 5  ;;  %v4537_v42 = vshll.u32 %v5104_v45, 16  ;;  %v4541_v63 = vshrl.u32 %v5104_v45, 16 }
 0x4c8   : > { %v4547_v27 = vshll.u32 %v5105_v32, 16 }
 0x4c9   : > { %v4534_v43 = vor.u32 %v4533_v30, %v4530_v33  ;;  %v4539_v15 = vrot.slane %v4537_v42, 5  ;;  %v4543_v0 = vrot.slane %v4541_v63, 4 }
 0x4ca   : > { %v4549_v57 = vrot.slane %v4547_v27, 5 }
 0x4cb   : > { %v4535_v25 = vrot.slane %v4534_v43, 4  ;;  %v4544_v62 = vor.u32 %v4543_v0, %v4539_v15 }
 0x4cd   : > { %v4540_v9 = vsel %vm8778_vm6, %v4535_v25, %v4539_v15  ;;  %v4545_v35 = vrot.slane %v4544_v62, 4 }
 0x4ce   : > { %5051 = vst [vmem:[%s8791_s9 + $0x78] sm:$0xf] %v4540_v9 }
 0x4cf   : > { %v4550_v55 = vsel %vm8778_vm6, %v4545_v35, %v4549_v57 }
 0x4d0   : > { %5052 = vst [vmem:[%s8791_s9 + $0x7c] sm:$0xf] %v4550_v55 }
 0x4d1   : > { %6536 = shalt.err (!%p6533_p5)
}
 0x4d2   : > { %s6537_s4 = scalar_lea.hbm %s9119_s26, 2048  ;;  %s6541_s7 = scalar_lea.hbm %s9178_s3, 4096 }
 0x4d3   : > { %p6538_p6 = scmp.ne.s32.totalorder %s9119_s26, %s6537_s4  ;;  %p6542_p10 = scmp.lt.u32.totalorder %s9119_s26, %s9178_s3 }
 0x4d4   : > { %p6543_p11 = scmp.lt.u32.totalorder %s6541_s7, %s6537_s4  ;;  %p6545_p13 = scmp.lt.u32.totalorder %s6537_s4, %s9119_s26 }
 0x4d5   : > { %p6539_p7 = pnand %p6538_p6, %p6668_p4 }
 0x4d6   : > { %p6544_p12 = por %p6543_p11, %p6542_p10 }
 0x4d7   : > { %p6540_p9 = pneg %p6539_p7 }
 0x4d8   : > { %p6546_p0 = por %p6545_p13, %p6544_p12 }
 0x4da   : > { %p6547_p1 = pnand %p6546_p0, %p6540_p9 }
 0x4dc   : > { %6550 = shalt.err (!%p6547_p1)
}
 0x4dd   : > { %s6606_s10 = smov 64   ;;  %s6607_s11 = smov 4  }
 0x4de   : > { %6352 = dma.vmem_to_hbm [thread:$0]  (%p6668_p4), %s9121_s19, 2048, %s9119_s26, %s9129_s15, %s6606_s10, %s6606_s10, %s6607_s11  }
 0x4df PF: > { %p6358_p2 = scmp.ge.s32.totalorder %s6601_s17, 2  ;;  %s4586_s18 = sand.u32 1, %s6581_s12  }
 0x4e0   : > { %s4587_s21 = scalar_lea.sflag [#allocation3], %s4586_s18 }
 0x4e1   : > { %p6355_p3 = pnand %p6358_p2, %p6675_p8 }
 0x4e3   : > { %6576 = dma.done.wait (!%p6355_p3), %s4587_s21, 2048  }
 0x4e4   : > { %6578 = vsyncadd (!%p6355_p3), %s4587_s21, 4294965248  ;;  %s16_s17 = sadd.s32 1, %s6601_s17   ;;  %s9246_s12 = smov %s6585_s13 }
 0x4e5   : > { %p13_p5 = scmp.ge.s32.totalorder %s16_s17, 4   ;;  %s9247_s13 = smov %s6589_s14 }
 0x4e6   : > { %s9248_s14 = smov %s6681_s25  ;;  %s9249_s15 = smov %s6597_s16 }
 0x4e7   : > { %s9250_s16 = smov %s9252_s20  ;;  %15 = sbr.rel (!%p13_p5) target bundleno = 4 (0x4), region = 96 }
 0x4ee   :  { %4592 = vsyncpa [#allocation3], 1 }
 0x4ef   :  { %4594 = vsyncpa [#allocation3 + $0x1], 1 }

</bundles_post_ra>
